<compile_context>
chip_gen: v6e
topology: v6e:2x2x1
jax: 0.10.0
libtpu: 0.0.40
codegen_flags: <defaults>
</compile_context>

<pallas_src>
import jax
import jax.numpy as jnp
from jax.experimental import pallas as pl
from jax.experimental.pallas import tpu as pltpu


def _conv3x3_prelu(pad_ref, w_ref, b_ref, alpha, H, W, C):
    """3x3 SAME conv + PReLU on a zero-padded (H+2, W+2, C) VMEM buffer.

    Three MXU contractions (one per kernel row); each contracts over (kw, cin)
    (K = 3*C) against the weight slab w_ref[kh] of shape (3*C, C).
    """
    acc = jnp.zeros((H, W, C), jnp.float32)
    for kh in range(3):
        rows = pad_ref[kh:kh + H, :, :]                        # (H, W+2, C)
        win = jnp.concatenate(
            [rows[:, 0:W, :], rows[:, 1:W + 1, :], rows[:, 2:W + 2, :]],
            axis=-1)                                           # (H, W, 3*C)
        acc = acc + jax.lax.dot_general(
            win, w_ref[kh],
            dimension_numbers=(((2,), (0,)), ((), ())),
            preferred_element_type=jnp.float32)
    y = acc + b_ref[...]                                       # (1, C) broadcast
    return jnp.where(y > 0, y, alpha * y)                      # PReLU


def _resblock_kernel(x_ref, w1_ref, b1_ref, w2_ref, b2_ref, a_ref,
                     out_ref, xpad_ref, hpad_ref):
    _, H, W, C = out_ref.shape

    # Build the SAME halo in VMEM (no host-side jnp.pad / extra HBM pass).
    xpad_ref[...] = jnp.zeros_like(xpad_ref)
    xpad_ref[1:H + 1, 1:W + 1, :] = x_ref[0].astype(jnp.float32)

    # Stage 1: conv3x3 + PReLU; result stays entirely in VMEM.
    h = _conv3x3_prelu(xpad_ref, w1_ref, b1_ref, a_ref[0], H, W, C)
    hpad_ref[...] = jnp.zeros_like(hpad_ref)
    hpad_ref[1:H + 1, 1:W + 1, :] = h

    # Stage 2: conv3x3 + PReLU + residual add; single HBM writeback.
    y = _conv3x3_prelu(hpad_ref, w2_ref, b2_ref, a_ref[1], H, W, C)
    out = y + x_ref[0].astype(jnp.float32)
    out_ref[...] = out[None].astype(out_ref.dtype)


def resblock_forward(x_nchw, params):
    """Fused ResBlock forward. Input/output are NCHW (PyTorch convention)."""
    x = jnp.transpose(x_nchw, (0, 2, 3, 1))                    # NCHW -> NHWC
    N, H, W, C = x.shape

    # HWIO (3, 3, C, C) -> (3, 3*C, C): flatten (kw, cin) into one K axis so
    # the kernel does a single contraction per kernel row.
    w1 = params["w1"].reshape(3, 3 * C, C)
    w2 = params["w2"].reshape(3, 3 * C, C)
    b1 = params["b1"].reshape(1, C)
    b2 = params["b2"].reshape(1, C)
    alphas = jnp.stack([jnp.asarray(params["a1"], jnp.float32),
                        jnp.asarray(params["a2"], jnp.float32)])

    out = pl.pallas_call(
        _resblock_kernel,
        out_shape=jax.ShapeDtypeStruct((N, H, W, C), x.dtype),
        grid_spec=pltpu.PrefetchScalarGridSpec(
            num_scalar_prefetch=0,
            grid=(N,),
            in_specs=[
                pl.BlockSpec((1, H, W, C), lambda n: (n, 0, 0, 0)),
                pl.BlockSpec((3, 3 * C, C), lambda n: (0, 0, 0)),
                pl.BlockSpec((1, C), lambda n: (0, 0)),
                pl.BlockSpec((3, 3 * C, C), lambda n: (0, 0, 0)),
                pl.BlockSpec((1, C), lambda n: (0, 0)),
                # PReLU alphas: scalars in SMEM (cheaper than (1,1) VMEM blocks).
                pl.BlockSpec(memory_space=pltpu.MemorySpace.SMEM),
            ],
            out_specs=pl.BlockSpec((1, H, W, C), lambda n: (n, 0, 0, 0)),
            scratch_shapes=[
                pltpu.VMEM((H + 2, W + 2, C), jnp.float32),    # padded x
                pltpu.VMEM((H + 2, W + 2, C), jnp.float32),    # padded h (never hits HBM)
            ],
        ),
        compiler_params=pltpu.CompilerParams(
            dimension_semantics=("parallel",),                 # megacore on v7x
            vmem_limit_bytes=64 * 1024 * 1024,
        ),
    )(x, w1, b1, w2, b2, alphas)
    # TODO(synk): add a row-tiled grid axis (2-row halo) + bf16 HBM storage for
    # large super-resolution images so whole-image blocks fit v7x's 64 MiB VMEM.
    return jnp.transpose(out, (0, 3, 1, 2))                    # NHWC -> NCHW


def _reference_forward(x_nchw, params):
    """Pure-JAX reference (lax.conv) for correctness checking."""
    def conv_prelu(x, w, b, a):
        y = jax.lax.conv_general_dilated(
            x, w, window_strides=(1, 1), padding="SAME",
            dimension_numbers=("NHWC", "HWIO", "NHWC"))
        y = y + b
        return jnp.where(y > 0, y, a * y)

    x = jnp.transpose(x_nchw, (0, 2, 3, 1))
    h = conv_prelu(x, params["w1"], params["b1"], params["a1"])
    o = conv_prelu(h, params["w2"], params["b2"], params["a2"]) + x
    return jnp.transpose(o, (0, 3, 1, 2))


if __name__ == "__main__":
    N, C, H, W = 2, 4, 16, 16
    key = jax.random.PRNGKey(0)
    k1, k2, k3, k4, kx = jax.random.split(key, 5)

    params = {
        # Conv weights in HWIO layout, deterministic synthetic init.
        "w1": jax.random.normal(k1, (3, 3, C, C), jnp.float32) * 0.1,
        "b1": jax.random.normal(k2, (C,), jnp.float32) * 0.05,
        "w2": jax.random.normal(k3, (3, 3, C, C), jnp.float32) * 0.1,
        "b2": jax.random.normal(k4, (C,), jnp.float32) * 0.05,
        # nn.PReLU() default: single parameter initialized to 0.25.
        "a1": jnp.float32(0.25),
        "a2": jnp.float32(0.25),
    }

    x = jax.random.normal(kx, (N, C, H, W), jnp.float32)

    out = jax.block_until_ready(resblock_forward(x, params))
    ref = jax.block_until_ready(_reference_forward(x, params))

    assert out.shape == (N, C, H, W)
    assert jnp.allclose(out, ref, atol=1e-4, rtol=1e-4), "mismatch vs reference"
    print("KERNEL_OK")
</pallas_src>

<mosaic_0001>
module attributes {stable_mosaic.version = 11 : i64} {
  func.func @_resblock_kernel(%arg0: i32, %arg1: memref<1x16x16x4xf32, #tpu.memory_space<vmem>>, %arg2: memref<3x12x4xf32, #tpu.memory_space<vmem>>, %arg3: memref<1x4xf32, #tpu.memory_space<vmem>>, %arg4: memref<3x12x4xf32, #tpu.memory_space<vmem>>, %arg5: memref<1x4xf32, #tpu.memory_space<vmem>>, %arg6: memref<2xf32, #tpu.memory_space<smem>>, %arg7: memref<1x16x16x4xf32, #tpu.memory_space<vmem>>, %arg8: memref<18x18x4xf32, #tpu.memory_space<vmem>>, %arg9: memref<18x18x4xf32, #tpu.memory_space<vmem>>) attributes {dimension_semantics = [#tpu.dimension_semantics<parallel>], iteration_bounds = array<i64: 2>, scalar_prefetch = 0 : i64, scratch_operands = 2 : i64, tpu.core_type = #tpu.core_type<tc>, window_params = [{transform_indices = @transform_0, window_bounds = array<i64: 1, 16, 16, 4>}, {pipeline_mode = #tpu.pipeline_mode<synchronous>, transform_indices = @transform_1, window_bounds = array<i64: 3, 12, 4>}, {pipeline_mode = #tpu.pipeline_mode<synchronous>, transform_indices = @transform_2, window_bounds = array<i64: 1, 4>}, {pipeline_mode = #tpu.pipeline_mode<synchronous>, transform_indices = @transform_3, window_bounds = array<i64: 3, 12, 4>}, {pipeline_mode = #tpu.pipeline_mode<synchronous>, transform_indices = @transform_4, window_bounds = array<i64: 1, 4>}, {transform_indices = @transform_5, window_bounds = array<i64: 2>}, {transform_indices = @transform_6, window_bounds = array<i64: 1, 16, 16, 4>}]} {
    %cst = arith.constant 0.000000e+00 : f32
    %0 = vector.broadcast %cst : f32 to vector<18x18x4xf32>
    %c0 = arith.constant 0 : index
    %c0_0 = arith.constant 0 : index
    %c0_1 = arith.constant 0 : index
    %1 = vector.load %arg8[%c0, %c0_0, %c0_1] : memref<18x18x4xf32, #tpu.memory_space<vmem>>, vector<18x18x4xf32>
    tpu.vector_store %arg8[%c0, %c0_0, %c0_1], %0 {strides = array<i32>} : memref<18x18x4xf32, #tpu.memory_space<vmem>>, vector<18x18x4xf32>,
    %c0_2 = arith.constant 0 : index
    %c0_3 = arith.constant 0 : index
    %c0_4 = arith.constant 0 : index
    %c0_5 = arith.constant 0 : index
    %2 = vector.load %arg1[%c0_2, %c0_3, %c0_4, %c0_5] : memref<1x16x16x4xf32, #tpu.memory_space<vmem>>, vector<1x16x16x4xf32>
    %3 = vector.shape_cast %2 : vector<1x16x16x4xf32> to vector<16x16x4xf32>
    %c1 = arith.constant 1 : index
    %c1_6 = arith.constant 1 : index
    %c0_7 = arith.constant 0 : index
    %4 = vector.load %arg8[%c1, %c1_6, %c0_7] : memref<18x18x4xf32, #tpu.memory_space<vmem>>, vector<16x16x4xf32>
    tpu.vector_store %arg8[%c1, %c1_6, %c0_7], %3 {strides = array<i32>} : memref<18x18x4xf32, #tpu.memory_space<vmem>>, vector<16x16x4xf32>,
    %c0_8 = arith.constant 0 : index
    %5 = memref.load %arg6[%c0_8] : memref<2xf32, #tpu.memory_space<smem>>
    %cst_9 = arith.constant 0.000000e+00 : f32
    %6 = vector.broadcast %cst_9 : f32 to vector<16x16x4xf32>
    %c0_10 = arith.constant 0 : index
    %c0_11 = arith.constant 0 : index
    %c0_12 = arith.constant 0 : index
    %7 = vector.load %arg8[%c0_10, %c0_11, %c0_12] : memref<18x18x4xf32, #tpu.memory_space<vmem>>, vector<16x18x4xf32>
    %8 = vector.extract_strided_slice %7 {offsets = [0, 0, 0], sizes = [16, 16, 4], strides = [1, 1, 1]} : vector<16x18x4xf32> to vector<16x16x4xf32>
    %9 = vector.extract_strided_slice %7 {offsets = [0, 1, 0], sizes = [16, 16, 4], strides = [1, 1, 1]} : vector<16x18x4xf32> to vector<16x16x4xf32>
    %10 = vector.extract_strided_slice %7 {offsets = [0, 2, 0], sizes = [16, 16, 4], strides = [1, 1, 1]} : vector<16x18x4xf32> to vector<16x16x4xf32>
    %11 = tpu.concatenate %8, %9, %10 in 2 : vector<16x16x4xf32>, vector<16x16x4xf32>, vector<16x16x4xf32> -> vector<16x16x12xf32>
    %c0_13 = arith.constant 0 : index
    %c0_14 = arith.constant 0 : index
    %c0_15 = arith.constant 0 : index
    %12 = vector.load %arg2[%c0_13, %c0_14, %c0_15] : memref<3x12x4xf32, #tpu.memory_space<vmem>>, vector<1x12x4xf32>
    %13 = vector.shape_cast %12 : vector<1x12x4xf32> to vector<12x4xf32>
    %cst_16 = arith.constant dense<0.000000e+00> : vector<16x16x4xf32>
    %14 = tpu.matmul %11, %13, %cst_16 {dimension_numbers = #tpu.dot_dimension_numbers<[2], [0], [0, 1], [1], [0, 0, 0, 1, 1, 1], [], []>} : vector<16x16x12xf32>, vector<12x4xf32>, vector<16x16x4xf32> -> vector<16x16x4xf32>
    %15 = arith.addf %6, %14 : vector<16x16x4xf32>
    %c1_17 = arith.constant 1 : index
    %c0_18 = arith.constant 0 : index
    %c0_19 = arith.constant 0 : index
    %16 = vector.load %arg8[%c1_17, %c0_18, %c0_19] : memref<18x18x4xf32, #tpu.memory_space<vmem>>, vector<16x18x4xf32>
    %17 = vector.extract_strided_slice %16 {offsets = [0, 0, 0], sizes = [16, 16, 4], strides = [1, 1, 1]} : vector<16x18x4xf32> to vector<16x16x4xf32>
    %18 = vector.extract_strided_slice %16 {offsets = [0, 1, 0], sizes = [16, 16, 4], strides = [1, 1, 1]} : vector<16x18x4xf32> to vector<16x16x4xf32>
    %19 = vector.extract_strided_slice %16 {offsets = [0, 2, 0], sizes = [16, 16, 4], strides = [1, 1, 1]} : vector<16x18x4xf32> to vector<16x16x4xf32>
    %20 = tpu.concatenate %17, %18, %19 in 2 : vector<16x16x4xf32>, vector<16x16x4xf32>, vector<16x16x4xf32> -> vector<16x16x12xf32>
    %c1_20 = arith.constant 1 : index
    %c0_21 = arith.constant 0 : index
    %c0_22 = arith.constant 0 : index
    %21 = vector.load %arg2[%c1_20, %c0_21, %c0_22] : memref<3x12x4xf32, #tpu.memory_space<vmem>>, vector<1x12x4xf32>
    %22 = vector.shape_cast %21 : vector<1x12x4xf32> to vector<12x4xf32>
    %cst_23 = arith.constant dense<0.000000e+00> : vector<16x16x4xf32>
    %23 = tpu.matmul %20, %22, %cst_23 {dimension_numbers = #tpu.dot_dimension_numbers<[2], [0], [0, 1], [1], [0, 0, 0, 1, 1, 1], [], []>} : vector<16x16x12xf32>, vector<12x4xf32>, vector<16x16x4xf32> -> vector<16x16x4xf32>
    %24 = arith.addf %15, %23 : vector<16x16x4xf32>
    %c2 = arith.constant 2 : index
    %c0_24 = arith.constant 0 : index
    %c0_25 = arith.constant 0 : index
    %25 = vector.load %arg8[%c2, %c0_24, %c0_25] : memref<18x18x4xf32, #tpu.memory_space<vmem>>, vector<16x18x4xf32>
    %26 = vector.extract_strided_slice %25 {offsets = [0, 0, 0], sizes = [16, 16, 4], strides = [1, 1, 1]} : vector<16x18x4xf32> to vector<16x16x4xf32>
    %27 = vector.extract_strided_slice %25 {offsets = [0, 1, 0], sizes = [16, 16, 4], strides = [1, 1, 1]} : vector<16x18x4xf32> to vector<16x16x4xf32>
    %28 = vector.extract_strided_slice %25 {offsets = [0, 2, 0], sizes = [16, 16, 4], strides = [1, 1, 1]} : vector<16x18x4xf32> to vector<16x16x4xf32>
    %29 = tpu.concatenate %26, %27, %28 in 2 : vector<16x16x4xf32>, vector<16x16x4xf32>, vector<16x16x4xf32> -> vector<16x16x12xf32>
    %c2_26 = arith.constant 2 : index
    %c0_27 = arith.constant 0 : index
    %c0_28 = arith.constant 0 : index
    %30 = vector.load %arg2[%c2_26, %c0_27, %c0_28] : memref<3x12x4xf32, #tpu.memory_space<vmem>>, vector<1x12x4xf32>
    %31 = vector.shape_cast %30 : vector<1x12x4xf32> to vector<12x4xf32>
    %cst_29 = arith.constant dense<0.000000e+00> : vector<16x16x4xf32>
    %32 = tpu.matmul %29, %31, %cst_29 {dimension_numbers = #tpu.dot_dimension_numbers<[2], [0], [0, 1], [1], [0, 0, 0, 1, 1, 1], [], []>} : vector<16x16x12xf32>, vector<12x4xf32>, vector<16x16x4xf32> -> vector<16x16x4xf32>
    %33 = arith.addf %24, %32 : vector<16x16x4xf32>
    %c0_30 = arith.constant 0 : index
    %c0_31 = arith.constant 0 : index
    %34 = vector.load %arg3[%c0_30, %c0_31] : memref<1x4xf32, #tpu.memory_space<vmem>>, vector<1x4xf32>
    %35 = vector.shape_cast %34 : vector<1x4xf32> to vector<1x1x4xf32>
    %36 = vector.broadcast %35 : vector<1x1x4xf32> to vector<16x16x4xf32>
    %37 = arith.addf %33, %36 : vector<16x16x4xf32>
    %cst_32 = arith.constant 0.000000e+00 : f32
    %38 = vector.broadcast %cst_32 : f32 to vector<16x16x4xf32>
    %39 = arith.cmpf ogt, %37, %38 : vector<16x16x4xf32>
    %40 = vector.broadcast %5 : f32 to vector<16x16x4xf32>
    %41 = arith.mulf %40, %37 : vector<16x16x4xf32>
    %42 = arith.select %39, %37, %41 : vector<16x16x4xi1>, vector<16x16x4xf32>
    %cst_33 = arith.constant 0.000000e+00 : f32
    %43 = vector.broadcast %cst_33 : f32 to vector<18x18x4xf32>
    %c0_34 = arith.constant 0 : index
    %c0_35 = arith.constant 0 : index
    %c0_36 = arith.constant 0 : index
    %44 = vector.load %arg9[%c0_34, %c0_35, %c0_36] : memref<18x18x4xf32, #tpu.memory_space<vmem>>, vector<18x18x4xf32>
    tpu.vector_store %arg9[%c0_34, %c0_35, %c0_36], %43 {strides = array<i32>} : memref<18x18x4xf32, #tpu.memory_space<vmem>>, vector<18x18x4xf32>,
    %c1_37 = arith.constant 1 : index
    %c1_38 = arith.constant 1 : index
    %c0_39 = arith.constant 0 : index
    %45 = vector.load %arg9[%c1_37, %c1_38, %c0_39] : memref<18x18x4xf32, #tpu.memory_space<vmem>>, vector<16x16x4xf32>
    tpu.vector_store %arg9[%c1_37, %c1_38, %c0_39], %42 {strides = array<i32>} : memref<18x18x4xf32, #tpu.memory_space<vmem>>, vector<16x16x4xf32>,
    %c1_40 = arith.constant 1 : index
    %46 = memref.load %arg6[%c1_40] : memref<2xf32, #tpu.memory_space<smem>>
    %cst_41 = arith.constant 0.000000e+00 : f32
    %47 = vector.broadcast %cst_41 : f32 to vector<16x16x4xf32>
    %c0_42 = arith.constant 0 : index
    %c0_43 = arith.constant 0 : index
    %c0_44 = arith.constant 0 : index
    %48 = vector.load %arg9[%c0_42, %c0_43, %c0_44] : memref<18x18x4xf32, #tpu.memory_space<vmem>>, vector<16x18x4xf32>
    %49 = vector.extract_strided_slice %48 {offsets = [0, 0, 0], sizes = [16, 16, 4], strides = [1, 1, 1]} : vector<16x18x4xf32> to vector<16x16x4xf32>
    %50 = vector.extract_strided_slice %48 {offsets = [0, 1, 0], sizes = [16, 16, 4], strides = [1, 1, 1]} : vector<16x18x4xf32> to vector<16x16x4xf32>
    %51 = vector.extract_strided_slice %48 {offsets = [0, 2, 0], sizes = [16, 16, 4], strides = [1, 1, 1]} : vector<16x18x4xf32> to vector<16x16x4xf32>
    %52 = tpu.concatenate %49, %50, %51 in 2 : vector<16x16x4xf32>, vector<16x16x4xf32>, vector<16x16x4xf32> -> vector<16x16x12xf32>
    %c0_45 = arith.constant 0 : index
    %c0_46 = arith.constant 0 : index
    %c0_47 = arith.constant 0 : index
    %53 = vector.load %arg4[%c0_45, %c0_46, %c0_47] : memref<3x12x4xf32, #tpu.memory_space<vmem>>, vector<1x12x4xf32>
    %54 = vector.shape_cast %53 : vector<1x12x4xf32> to vector<12x4xf32>
    %cst_48 = arith.constant dense<0.000000e+00> : vector<16x16x4xf32>
    %55 = tpu.matmul %52, %54, %cst_48 {dimension_numbers = #tpu.dot_dimension_numbers<[2], [0], [0, 1], [1], [0, 0, 0, 1, 1, 1], [], []>} : vector<16x16x12xf32>, vector<12x4xf32>, vector<16x16x4xf32> -> vector<16x16x4xf32>
    %56 = arith.addf %47, %55 : vector<16x16x4xf32>
    %c1_49 = arith.constant 1 : index
    %c0_50 = arith.constant 0 : index
    %c0_51 = arith.constant 0 : index
    %57 = vector.load %arg9[%c1_49, %c0_50, %c0_51] : memref<18x18x4xf32, #tpu.memory_space<vmem>>, vector<16x18x4xf32>
    %58 = vector.extract_strided_slice %57 {offsets = [0, 0, 0], sizes = [16, 16, 4], strides = [1, 1, 1]} : vector<16x18x4xf32> to vector<16x16x4xf32>
    %59 = vector.extract_strided_slice %57 {offsets = [0, 1, 0], sizes = [16, 16, 4], strides = [1, 1, 1]} : vector<16x18x4xf32> to vector<16x16x4xf32>
    %60 = vector.extract_strided_slice %57 {offsets = [0, 2, 0], sizes = [16, 16, 4], strides = [1, 1, 1]} : vector<16x18x4xf32> to vector<16x16x4xf32>
    %61 = tpu.concatenate %58, %59, %60 in 2 : vector<16x16x4xf32>, vector<16x16x4xf32>, vector<16x16x4xf32> -> vector<16x16x12xf32>
    %c1_52 = arith.constant 1 : index
    %c0_53 = arith.constant 0 : index
    %c0_54 = arith.constant 0 : index
    %62 = vector.load %arg4[%c1_52, %c0_53, %c0_54] : memref<3x12x4xf32, #tpu.memory_space<vmem>>, vector<1x12x4xf32>
    %63 = vector.shape_cast %62 : vector<1x12x4xf32> to vector<12x4xf32>
    %cst_55 = arith.constant dense<0.000000e+00> : vector<16x16x4xf32>
    %64 = tpu.matmul %61, %63, %cst_55 {dimension_numbers = #tpu.dot_dimension_numbers<[2], [0], [0, 1], [1], [0, 0, 0, 1, 1, 1], [], []>} : vector<16x16x12xf32>, vector<12x4xf32>, vector<16x16x4xf32> -> vector<16x16x4xf32>
    %65 = arith.addf %56, %64 : vector<16x16x4xf32>
    %c2_56 = arith.constant 2 : index
    %c0_57 = arith.constant 0 : index
    %c0_58 = arith.constant 0 : index
    %66 = vector.load %arg9[%c2_56, %c0_57, %c0_58] : memref<18x18x4xf32, #tpu.memory_space<vmem>>, vector<16x18x4xf32>
    %67 = vector.extract_strided_slice %66 {offsets = [0, 0, 0], sizes = [16, 16, 4], strides = [1, 1, 1]} : vector<16x18x4xf32> to vector<16x16x4xf32>
    %68 = vector.extract_strided_slice %66 {offsets = [0, 1, 0], sizes = [16, 16, 4], strides = [1, 1, 1]} : vector<16x18x4xf32> to vector<16x16x4xf32>
    %69 = vector.extract_strided_slice %66 {offsets = [0, 2, 0], sizes = [16, 16, 4], strides = [1, 1, 1]} : vector<16x18x4xf32> to vector<16x16x4xf32>
    %70 = tpu.concatenate %67, %68, %69 in 2 : vector<16x16x4xf32>, vector<16x16x4xf32>, vector<16x16x4xf32> -> vector<16x16x12xf32>
    %c2_59 = arith.constant 2 : index
    %c0_60 = arith.constant 0 : index
    %c0_61 = arith.constant 0 : index
    %71 = vector.load %arg4[%c2_59, %c0_60, %c0_61] : memref<3x12x4xf32, #tpu.memory_space<vmem>>, vector<1x12x4xf32>
    %72 = vector.shape_cast %71 : vector<1x12x4xf32> to vector<12x4xf32>
    %cst_62 = arith.constant dense<0.000000e+00> : vector<16x16x4xf32>
    %73 = tpu.matmul %70, %72, %cst_62 {dimension_numbers = #tpu.dot_dimension_numbers<[2], [0], [0, 1], [1], [0, 0, 0, 1, 1, 1], [], []>} : vector<16x16x12xf32>, vector<12x4xf32>, vector<16x16x4xf32> -> vector<16x16x4xf32>
    %74 = arith.addf %65, %73 : vector<16x16x4xf32>
    %c0_63 = arith.constant 0 : index
    %c0_64 = arith.constant 0 : index
    %75 = vector.load %arg5[%c0_63, %c0_64] : memref<1x4xf32, #tpu.memory_space<vmem>>, vector<1x4xf32>
    %76 = vector.shape_cast %75 : vector<1x4xf32> to vector<1x1x4xf32>
    %77 = vector.broadcast %76 : vector<1x1x4xf32> to vector<16x16x4xf32>
    %78 = arith.addf %74, %77 : vector<16x16x4xf32>
    %cst_65 = arith.constant 0.000000e+00 : f32
    %79 = vector.broadcast %cst_65 : f32 to vector<16x16x4xf32>
    %80 = arith.cmpf ogt, %78, %79 : vector<16x16x4xf32>
    %81 = vector.broadcast %46 : f32 to vector<16x16x4xf32>
    %82 = arith.mulf %81, %78 : vector<16x16x4xf32>
    %83 = arith.select %80, %78, %82 : vector<16x16x4xi1>, vector<16x16x4xf32>
    %c0_66 = arith.constant 0 : index
    %c0_67 = arith.constant 0 : index
    %c0_68 = arith.constant 0 : index
    %c0_69 = arith.constant 0 : index
    %84 = vector.load %arg1[%c0_66, %c0_67, %c0_68, %c0_69] : memref<1x16x16x4xf32, #tpu.memory_space<vmem>>, vector<1x16x16x4xf32>
    %85 = vector.shape_cast %84 : vector<1x16x16x4xf32> to vector<16x16x4xf32>
    %86 = arith.addf %83, %85 : vector<16x16x4xf32>
    %87 = vector.shape_cast %86 : vector<16x16x4xf32> to vector<1x16x16x4xf32>
    %c0_70 = arith.constant 0 : index
    %c0_71 = arith.constant 0 : index
    %c0_72 = arith.constant 0 : index
    %c0_73 = arith.constant 0 : index
    %88 = vector.load %arg7[%c0_70, %c0_71, %c0_72, %c0_73] : memref<1x16x16x4xf32, #tpu.memory_space<vmem>>, vector<1x16x16x4xf32>
    tpu.vector_store %arg7[%c0_70, %c0_71, %c0_72, %c0_73], %87 {strides = array<i32>} : memref<1x16x16x4xf32, #tpu.memory_space<vmem>>, vector<1x16x16x4xf32>,
    return
  }
  func.func @transform_0(%arg0: i32) -> (i32, i32, i32, i32) {
    %c0_i32 = arith.constant 0 : i32
    %c0_i32_0 = arith.constant 0 : i32
    %c0_i32_1 = arith.constant 0 : i32
    %c0_i32_2 = arith.constant 0 : i32
    return %arg0, %c0_i32, %c0_i32_0, %c0_i32_1 : i32, i32, i32, i32
  }
  func.func @transform_1(%arg0: i32) -> (i32, i32, i32) {
    %c0_i32 = arith.constant 0 : i32
    %c0_i32_0 = arith.constant 0 : i32
    %c0_i32_1 = arith.constant 0 : i32
    %c0_i32_2 = arith.constant 0 : i32
    return %c0_i32, %c0_i32_0, %c0_i32_1 : i32, i32, i32
  }
  func.func @transform_2(%arg0: i32) -> (i32, i32) {
    %c0_i32 = arith.constant 0 : i32
    %c0_i32_0 = arith.constant 0 : i32
    %c0_i32_1 = arith.constant 0 : i32
    return %c0_i32, %c0_i32_0 : i32, i32
  }
  func.func @transform_3(%arg0: i32) -> (i32, i32, i32) {
    %c0_i32 = arith.constant 0 : i32
    %c0_i32_0 = arith.constant 0 : i32
    %c0_i32_1 = arith.constant 0 : i32
    %c0_i32_2 = arith.constant 0 : i32
    return %c0_i32, %c0_i32_0, %c0_i32_1 : i32, i32, i32
  }
  func.func @transform_4(%arg0: i32) -> (i32, i32) {
    %c0_i32 = arith.constant 0 : i32
    %c0_i32_0 = arith.constant 0 : i32
    %c0_i32_1 = arith.constant 0 : i32
    return %c0_i32, %c0_i32_0 : i32, i32
  }
  func.func @transform_5(%arg0: i32) -> i32 {
    %c0_i32 = arith.constant 0 : i32
    %c0_i32_0 = arith.constant 0 : i32
    return %c0_i32 : i32
  }
  func.func @transform_6(%arg0: i32) -> (i32, i32, i32, i32) {
    %c0_i32 = arith.constant 0 : i32
    %c0_i32_0 = arith.constant 0 : i32
    %c0_i32_1 = arith.constant 0 : i32
    %c0_i32_2 = arith.constant 0 : i32
    return %arg0, %c0_i32, %c0_i32_0, %c0_i32_1 : i32, i32, i32, i32
  }
}

</mosaic_0001>

<bundles_post_ra>
// kernel: tpu_custom_call.1
= control target key start
LH: loop header
LB: loop body
LE: loop exit
PB: predicated region body
PF: predicated region fallthrough
CT: control target
= control target key end

     0   :  { %11 = vsyncpa [#allocation5], 0  ;;  %s6870_s21 = smov 0   ;;  %s10238_s0 = inlined_call_operand.vmem [shape: f32[2,16,16,4], index: 0, kind: input, shape index: {}]   ;;  %s10239_s1 = inlined_call_operand.vmem [shape: f32[3,12,4], index: 1, kind: input, shape index: {}]   ;;  %s10240_s2 = inlined_call_operand.vmem [shape: f32[1,4], index: 2, kind: input, shape index: {}]   ;;  %s10241_s3 = inlined_call_operand.vmem [shape: f32[3,12,4], index: 3, kind: input, shape index: {}]   ;;  %s10242_s4 = inlined_call_operand.vmem [shape: f32[1,4], index: 4, kind: input, shape index: {}]   ;;  %s10243_s5 = inlined_call_operand.vmem [shape: f32[2], index: 5, kind: input, shape index: {}]   ;;  %s10244_s6 = inlined_call_operand.vmem [shape: f32[2,16,16,4], index: 6, kind: output, shape index: {}]  }
   0x1 LB: > { %s6876_s22 = sadd.s32 4294967295, %s6829_s21   ;;  %p6016_p0 = scmp.ge.s32.totalorder %s6829_s21, 1  ;;  %s6829_s21 = sphi %s6870_s21, %s17_s21  }
   0x2   : > { %p179_p1 = scmp.lt.s32.totalorder %s6829_s21, 3  ;;  %s204_s25 = sshll.u32 %s10243_s5, 4  ;;  %s205_s25 = int_to_ptr.vmem [resolvable:$true] %s204_s25 }
   0x3   : > { %p6762_p3 = scmp.eq.s32.totalorder %s6876_s22, 0  ;;  %s6804_s27 = scalar_lea.vmem %s205_s25, 16 }
   0x4   : > { %p6883_p2 = pnand %p6016_p0, %p179_p1  ;;  %p6805_p6 = scmp.ne.s32.totalorder %s205_s25, %s6804_s27 }
   0x5   : > { %p6812_p10 = scmp.lt.s32.totalorder %s205_s25, %s205_s25  ;;  %p6813_p11 = scmp.lt.s32.totalorder %s6804_s27, %s6804_s27 }
   0x6   : > { %p6758_p4 = pneg %p6883_p2 }
   0x7   : > { %p6814_p12 = por %p6813_p11, %p6812_p10 }
   0x8   : > { %p6759_p5 = pnand %p6762_p3, %p6758_p4 }
   0xa   : > { %p6806_p7 = pneg %p6759_p5 }
   0xc   : > { %p6807_p8 = pnand %p6806_p7, %p6805_p6 }
   0xe   : > { %p6808_p9 = pneg %p6807_p8 }
  0x10   : > { %p6815_p13 = pnand %p6814_p12, %p6808_p9 }
  0x12   : > { %6818 = shalt.err (!%p6815_p13)
}
  0x13   : > { %s6831_s28 = smov [#allocation4]   ;;  %225 = sbr.rel (%p6883_p2) target bundleno = 1384 (0x568), region = 44 }
  0x14   : > { %6761 = dma.vmem_to_smem (!%p6759_p5), %s205_s25, 16, %s6831_s28, [#allocation5]  }
  0x18   : > { %6824 = dma.done.wait (%p6762_p3), [#allocation5], 16  }
  0x19   : > { %6826 = vsyncadd (%p6762_p3), [#allocation5], 4294967280 }
  0x1a   : > { %231 = sfence }
  0x1b   : > { %vm266_vm0 = vcmask 31744   ;;  %vm269_vm1 = vcmask 25600   ;;  %p256_p0 = scmp.lt.s32.totalorder %s6876_s22, 1  ;;  %v6832_v0 = vmov 0.0   ;;  %vm484_vm2 = vcmask 1046528   ;;  %s6833_s9 = smov 4  }
  0x1c   : > { %267 = vst.msk [vmem:[#allocation2] sm:$0xff] %vm266_vm0, %v6832_v0  ;;  %268 = vst.msk [vmem:[#allocation2 + $0x8] sm:$0xff] %vm266_vm0, %v6832_v0  ;;  %vm661_vm3 = vcmask 1045504   ;;  %vm1517_vm4 = vcmask 1043456   ;;  %s6834_s14 = smov 8   ;;  %vm870_vm5 = vcmask 64512  }
  0x1d   : > { %271 = vst.msk [vmem:[#allocation2 + $0x18] sm:$0xff] %vm266_vm0, %v6832_v0  ;;  %272 = vst.msk [vmem:[#allocation2 + $0x20] sm:$0xff] %vm266_vm0, %v6832_v0  ;;  %s10304_s22 = smov (!%p256_p0, %s6876_s22), 1  ;;  %vm1420_vm6 = vcmask 97280   ;;  %s387_s25 = sld [smem:[#allocation4]] }
  0x1e   : > { %274 = vst.msk [vmem:[#allocation2 + $0x30] sm:$0xff] %vm266_vm0, %v6832_v0  ;;  %275 = vst.msk [vmem:[#allocation2 + $0x38] sm:$0xff] %vm266_vm0, %v6832_v0  ;;  %s6236_s29 = sshll.u32 %s10304_s22, 8 }
  0x1f   : > { %277 = vst.msk [vmem:[#allocation2 + $0x48] sm:$0xff] %vm266_vm0, %v6832_v0  ;;  %278 = vst.msk [vmem:[#allocation2 + $0x50] sm:$0xff] %vm266_vm0, %v6832_v0  ;;  %s7126_s8 = scalar_lea.vmem %s10238_s0, %s6236_s29  ;;  %s10007_s27 = scalar_lea.vmem %s10244_s6, %s6236_s29 }
  0x20   : > { %280 = vst.msk [vmem:[#allocation2 + $0x60] sm:$0xff] %vm266_vm0, %v6832_v0  ;;  %281 = vst.msk [vmem:[#allocation2 + $0x68] sm:$0xff] %vm266_vm0, %v6832_v0  ;;  %v322_v1 = vld [vmem:[%s7126_s8] sm:$0xff]  ;;  %v323_v2 = vld [vmem:[%s7126_s8 + $0x8] sm:$0xff] }
  0x21   : > { %283 = vst.msk [vmem:[#allocation2 + $0x78] sm:$0xff] %vm266_vm0, %v6832_v0  ;;  %284 = vst.msk [vmem:[#allocation2 + $0x80] sm:$0xff] %vm266_vm0, %v6832_v0  ;;  %v324_v3 = vld [vmem:[%s7126_s8 + $0x10] sm:$0xff]  ;;  %v325_v4 = vld [vmem:[%s7126_s8 + $0x18] sm:$0xff] }
  0x22   : > { %286 = vst.msk [vmem:[#allocation2 + $0x90] sm:$0xff] %vm266_vm0, %v6832_v0  ;;  %287 = vst.msk [vmem:[#allocation2 + $0x98] sm:$0xff] %vm266_vm0, %v6832_v0  ;;  %v326_v5 = vld [vmem:[%s7126_s8 + $0x20] sm:$0xff]  ;;  %v327_v6 = vld [vmem:[%s7126_s8 + $0x28] sm:$0xff] }
  0x23   : > { %289 = vst.msk [vmem:[#allocation2 + $0xa8] sm:$0xff] %vm266_vm0, %v6832_v0  ;;  %290 = vst.msk [vmem:[#allocation2 + $0xb0] sm:$0xff] %vm266_vm0, %v6832_v0  ;;  %v7137_v7 = vld [vmem:[#allocation2] sm:$0xff]  ;;  %v7139_v8 = vld [vmem:[#allocation2 + $0x8] sm:$0xff] }
  0x24   : > { %292 = vst.msk [vmem:[#allocation2 + $0xc0] sm:$0xff] %vm266_vm0, %v6832_v0  ;;  %293 = vst.msk [vmem:[#allocation2 + $0xc8] sm:$0xff] %vm266_vm0, %v6832_v0  ;;  %v485_v10 = vrot.slane %v7137_v7, 1  ;;  %v486_v11 = vrot.slane %v7139_v8, 1  ;;  %v328_v13 = vld [vmem:[%s7126_s8 + $0x30] sm:$0xff]  ;;  %v329_v14 = vld [vmem:[%s7126_s8 + $0x38] sm:$0xff] }
  0x25   : > { %295 = vst.msk [vmem:[#allocation2 + $0xd8] sm:$0xff] %vm266_vm0, %v6832_v0  ;;  %296 = vst.msk [vmem:[#allocation2 + $0xe0] sm:$0xff] %vm266_vm0, %v6832_v0  ;;  %v330_v15 = vld [vmem:[%s7126_s8 + $0x40] sm:$0xff]  ;;  %v331_v16 = vld [vmem:[%s7126_s8 + $0x48] sm:$0xff] }
  0x26   : > { %298 = vst.msk [vmem:[#allocation2 + $0xf0] sm:$0xff] %vm266_vm0, %v6832_v0  ;;  %299 = vst.msk [vmem:[#allocation2 + $0xf8] sm:$0xff] %vm266_vm0, %v6832_v0  ;;  %v332_v17 = vld [vmem:[%s7126_s8 + $0x50] sm:$0xff]  ;;  %v333_v18 = vld [vmem:[%s7126_s8 + $0x58] sm:$0xff]  ;;  %v487_v19 = vsel %vm484_vm2, %v485_v10, %v486_v11 }
  0x27   : > { %301 = vst.msk [vmem:[#allocation2 + $0x108] sm:$0xff] %vm266_vm0, %v6832_v0  ;;  %302 = vst.msk [vmem:[#allocation2 + $0x110] sm:$0xff] %vm266_vm0, %v6832_v0  ;;  %v334_v20 = vld [vmem:[%s7126_s8 + $0x60] sm:$0xff]  ;;  %v335_v21 = vld [vmem:[%s7126_s8 + $0x68] sm:$0xff]  ;;  %565 = vrot.lane.b32.xlu0 %v487_v19, %s6833_s9 }
  0x28   : > { %304 = vst.msk [vmem:[#allocation2 + $0x120] sm:$0xff] %vm266_vm0, %v6832_v0  ;;  %305 = vst.msk [vmem:[#allocation2 + $0x128] sm:$0xff] %vm266_vm0, %v6832_v0  ;;  %v336_v22 = vld [vmem:[%s7126_s8 + $0x70] sm:$0xff]  ;;  %v337_v23 = vld [vmem:[%s7126_s8 + $0x78] sm:$0xff] }
  0x29   : > { %307 = vst.msk [vmem:[#allocation2 + $0x138] sm:$0xff] %vm266_vm0, %v6832_v0  ;;  %308 = vst.msk [vmem:[#allocation2 + $0x140] sm:$0xff] %vm266_vm0, %v6832_v0  ;;  %v338_v24 = vld [vmem:[%s7126_s8 + $0x80] sm:$0xff]  ;;  %v339_v25 = vld [vmem:[%s7126_s8 + $0x88] sm:$0xff] }
  0x2a   : > { %310 = vst.msk [vmem:[#allocation2 + $0x150] sm:$0xff] %vm266_vm0, %v6832_v0  ;;  %311 = vst.msk [vmem:[#allocation2 + $0x158] sm:$0xff] %vm266_vm0, %v6832_v0  ;;  %v340_v27 = vld [vmem:[%s7126_s8 + $0x90] sm:$0xff]  ;;  %v341_v28 = vld [vmem:[%s7126_s8 + $0x98] sm:$0xff] }
  0x2b   : > { %313 = vst.msk [vmem:[#allocation2 + $0x168] sm:$0xff] %vm266_vm0, %v6832_v0  ;;  %314 = vst.msk [vmem:[#allocation2 + $0x170] sm:$0xff] %vm266_vm0, %v6832_v0  ;;  %v342_v29 = vld [vmem:[%s7126_s8 + $0xa0] sm:$0xff]  ;;  %v343_v60 = vld [vmem:[%s7126_s8 + $0xa8] sm:$0xff] }
  0x2c   : > { %316 = vst.msk [vmem:[#allocation2 + $0x180] sm:$0xff] %vm266_vm0, %v6832_v0  ;;  %317 = vst.msk [vmem:[#allocation2 + $0x188] sm:$0xff] %vm266_vm0, %v6832_v0 }
  0x2d   : > { %319 = vst.msk [vmem:[#allocation2 + $0x198] sm:$0xff] %vm266_vm0, %v6832_v0  ;;  %320 = vst.msk [vmem:[#allocation2 + $0x1a0] sm:$0xff] %vm266_vm0, %v6832_v0 }
  0x2e   : > { %3078 = vst.msk [vmem:[#allocation3] sm:$0xff] %vm266_vm0, %v6832_v0  ;;  %3079 = vst.msk [vmem:[#allocation3 + $0x8] sm:$0xff] %vm266_vm0, %v6832_v0 }
  0x2f   : > { %3081 = vst.msk [vmem:[#allocation3 + $0x18] sm:$0xff] %vm266_vm0, %v6832_v0  ;;  %3082 = vst.msk [vmem:[#allocation3 + $0x20] sm:$0xff] %vm266_vm0, %v6832_v0 }
  0x30   : > { %3084 = vst.msk [vmem:[#allocation3 + $0x30] sm:$0xff] %vm266_vm0, %v6832_v0  ;;  %3085 = vst.msk [vmem:[#allocation3 + $0x38] sm:$0xff] %vm266_vm0, %v6832_v0 }
  0x31   : > { %3087 = vst.msk [vmem:[#allocation3 + $0x48] sm:$0xff] %vm266_vm0, %v6832_v0  ;;  %3088 = vst.msk [vmem:[#allocation3 + $0x50] sm:$0xff] %vm266_vm0, %v6832_v0 }
  0x32   : > { %3090 = vst.msk [vmem:[#allocation3 + $0x60] sm:$0xff] %vm266_vm0, %v6832_v0  ;;  %3091 = vst.msk [vmem:[#allocation3 + $0x68] sm:$0xff] %vm266_vm0, %v6832_v0 }
  0x33   : > { %3093 = vst.msk [vmem:[#allocation3 + $0x78] sm:$0xff] %vm266_vm0, %v6832_v0  ;;  %3094 = vst.msk [vmem:[#allocation3 + $0x80] sm:$0xff] %vm266_vm0, %v6832_v0 }
  0x34   : > { %3096 = vst.msk [vmem:[#allocation3 + $0x90] sm:$0xff] %vm266_vm0, %v6832_v0  ;;  %3097 = vst.msk [vmem:[#allocation3 + $0x98] sm:$0xff] %vm266_vm0, %v6832_v0 }
  0x35   : > { %3099 = vst.msk [vmem:[#allocation3 + $0xa8] sm:$0xff] %vm266_vm0, %v6832_v0  ;;  %3100 = vst.msk [vmem:[#allocation3 + $0xb0] sm:$0xff] %vm266_vm0, %v6832_v0 }
  0x36   : > { %3102 = vst.msk [vmem:[#allocation3 + $0xc0] sm:$0xff] %vm266_vm0, %v6832_v0  ;;  %3103 = vst.msk [vmem:[#allocation3 + $0xc8] sm:$0xff] %vm266_vm0, %v6832_v0 }
  0x37   : > { %3105 = vst.msk [vmem:[#allocation3 + $0xd8] sm:$0xff] %vm266_vm0, %v6832_v0  ;;  %3106 = vst.msk [vmem:[#allocation3 + $0xe0] sm:$0xff] %vm266_vm0, %v6832_v0 }
  0x38   : > { %3108 = vst.msk [vmem:[#allocation3 + $0xf0] sm:$0xff] %vm266_vm0, %v6832_v0  ;;  %3109 = vst.msk [vmem:[#allocation3 + $0xf8] sm:$0xff] %vm266_vm0, %v6832_v0 }
  0x39   : > { %3111 = vst.msk [vmem:[#allocation3 + $0x108] sm:$0xff] %vm266_vm0, %v6832_v0  ;;  %3112 = vst.msk [vmem:[#allocation3 + $0x110] sm:$0xff] %vm266_vm0, %v6832_v0 }
  0x3a   : > { %3114 = vst.msk [vmem:[#allocation3 + $0x120] sm:$0xff] %vm266_vm0, %v6832_v0  ;;  %3115 = vst.msk [vmem:[#allocation3 + $0x128] sm:$0xff] %vm266_vm0, %v6832_v0 }
  0x3b   : > { %3117 = vst.msk [vmem:[#allocation3 + $0x138] sm:$0xff] %vm266_vm0, %v6832_v0  ;;  %3118 = vst.msk [vmem:[#allocation3 + $0x140] sm:$0xff] %vm266_vm0, %v6832_v0 }
  0x3c   : > { %3120 = vst.msk [vmem:[#allocation3 + $0x150] sm:$0xff] %vm266_vm0, %v6832_v0  ;;  %3121 = vst.msk [vmem:[#allocation3 + $0x158] sm:$0xff] %vm266_vm0, %v6832_v0 }
  0x3d   : > { %3123 = vst.msk [vmem:[#allocation3 + $0x168] sm:$0xff] %vm266_vm0, %v6832_v0  ;;  %3124 = vst.msk [vmem:[#allocation3 + $0x170] sm:$0xff] %vm266_vm0, %v6832_v0 }
  0x3e   : > { %3126 = vst.msk [vmem:[#allocation3 + $0x180] sm:$0xff] %vm266_vm0, %v6832_v0  ;;  %3127 = vst.msk [vmem:[#allocation3 + $0x188] sm:$0xff] %vm266_vm0, %v6832_v0 }
  0x3f   : > { %3129 = vst.msk [vmem:[#allocation3 + $0x198] sm:$0xff] %vm266_vm0, %v6832_v0  ;;  %3130 = vst.msk [vmem:[#allocation3 + $0x1a0] sm:$0xff] %vm266_vm0, %v6832_v0 }
  0x40   : > { %270 = vst.msk [vmem:[#allocation2 + $0x10] sm:$0x3] %vm269_vm1, %v6832_v0  ;;  %273 = vst.msk [vmem:[#allocation2 + $0x28] sm:$0x3] %vm269_vm1, %v6832_v0 }
  0x41   : > { %276 = vst.msk [vmem:[#allocation2 + $0x40] sm:$0x3] %vm269_vm1, %v6832_v0  ;;  %279 = vst.msk [vmem:[#allocation2 + $0x58] sm:$0x3] %vm269_vm1, %v6832_v0 }
  0x42   : > { %282 = vst.msk [vmem:[#allocation2 + $0x70] sm:$0x3] %vm269_vm1, %v6832_v0  ;;  %285 = vst.msk [vmem:[#allocation2 + $0x88] sm:$0x3] %vm269_vm1, %v6832_v0 }
  0x43   : > { %288 = vst.msk [vmem:[#allocation2 + $0xa0] sm:$0x3] %vm269_vm1, %v6832_v0  ;;  %291 = vst.msk [vmem:[#allocation2 + $0xb8] sm:$0x3] %vm269_vm1, %v6832_v0 }
  0x44   : > { %294 = vst.msk [vmem:[#allocation2 + $0xd0] sm:$0x3] %vm269_vm1, %v6832_v0  ;;  %297 = vst.msk [vmem:[#allocation2 + $0xe8] sm:$0x3] %vm269_vm1, %v6832_v0 }
  0x45   : > { %300 = vst.msk [vmem:[#allocation2 + $0x100] sm:$0x3] %vm269_vm1, %v6832_v0  ;;  %303 = vst.msk [vmem:[#allocation2 + $0x118] sm:$0x3] %vm269_vm1, %v6832_v0 }
  0x46   : > { %306 = vst.msk [vmem:[#allocation2 + $0x130] sm:$0x3] %vm269_vm1, %v6832_v0  ;;  %309 = vst.msk [vmem:[#allocation2 + $0x148] sm:$0x3] %vm269_vm1, %v6832_v0 }
  0x47   : > { %312 = vst.msk [vmem:[#allocation2 + $0x160] sm:$0x3] %vm269_vm1, %v6832_v0  ;;  %315 = vst.msk [vmem:[#allocation2 + $0x178] sm:$0x3] %vm269_vm1, %v6832_v0  ;;  %v7141_v9 = vld [vmem:[#allocation2 + $0x10] sm:$0x3] }
  0x48   : > { %318 = vst.msk [vmem:[#allocation2 + $0x190] sm:$0x3] %vm269_vm1, %v6832_v0  ;;  %321 = vst.msk [vmem:[#allocation2 + $0x1a8] sm:$0x3] %vm269_vm1, %v6832_v0  ;;  %v488_v12 = vrot.slane %v7141_v9, 1 }
  0x49   : > { %3080 = vst.msk [vmem:[#allocation3 + $0x10] sm:$0x3] %vm269_vm1, %v6832_v0  ;;  %3083 = vst.msk [vmem:[#allocation3 + $0x28] sm:$0x3] %vm269_vm1, %v6832_v0 }
  0x4a   : > { %3086 = vst.msk [vmem:[#allocation3 + $0x40] sm:$0x3] %vm269_vm1, %v6832_v0  ;;  %3089 = vst.msk [vmem:[#allocation3 + $0x58] sm:$0x3] %vm269_vm1, %v6832_v0  ;;  %v489_v26 = vsel %vm484_vm2, %v486_v11, %v488_v12 }
  0x4b   : > { %3092 = vst.msk [vmem:[#allocation3 + $0x70] sm:$0x3] %vm269_vm1, %v6832_v0  ;;  %3095 = vst.msk [vmem:[#allocation3 + $0x88] sm:$0x3] %vm269_vm1, %v6832_v0  ;;  %567 = vrot.lane.b32.xlu0 %v489_v26, %s6833_s9  ;;  %v351_v26 = vld [vmem:[%s7126_s8 + $0xe8] sm:$0xff] }
  0x4c   : > { %3098 = vst.msk [vmem:[#allocation3 + $0xa0] sm:$0x3] %vm269_vm1, %v6832_v0  ;;  %3101 = vst.msk [vmem:[#allocation3 + $0xb8] sm:$0x3] %vm269_vm1, %v6832_v0 }
  0x4d   : > { %3104 = vst.msk [vmem:[#allocation3 + $0xd0] sm:$0x3] %vm269_vm1, %v6832_v0  ;;  %3107 = vst.msk [vmem:[#allocation3 + $0xe8] sm:$0x3] %vm269_vm1, %v6832_v0 }
  0x4e   : > { %3110 = vst.msk [vmem:[#allocation3 + $0x100] sm:$0x3] %vm269_vm1, %v6832_v0  ;;  %3113 = vst.msk [vmem:[#allocation3 + $0x118] sm:$0x3] %vm269_vm1, %v6832_v0 }
  0x4f   : > { %3116 = vst.msk [vmem:[#allocation3 + $0x130] sm:$0x3] %vm269_vm1, %v6832_v0  ;;  %3119 = vst.msk [vmem:[#allocation3 + $0x148] sm:$0x3] %vm269_vm1, %v6832_v0 }
  0x50   : > { %3122 = vst.msk [vmem:[#allocation3 + $0x160] sm:$0x3] %vm269_vm1, %v6832_v0  ;;  %3125 = vst.msk [vmem:[#allocation3 + $0x178] sm:$0x3] %vm269_vm1, %v6832_v0 }
  0x51   : > { %3128 = vst.msk [vmem:[#allocation3 + $0x190] sm:$0x3] %vm269_vm1, %v6832_v0  ;;  %3131 = vst.msk [vmem:[#allocation3 + $0x1a8] sm:$0x3] %vm269_vm1, %v6832_v0 }
  0x52   : > { %355 = vst.msk [vmem:[#allocation2 + $0x19] sm:$0xff] %vm266_vm0, %v322_v1  ;;  %356 = vst.msk [vmem:[#allocation2 + $0x21] sm:$0xff] %vm266_vm0, %v323_v2  ;;  %v344_v2 = vld [vmem:[%s7126_s8 + $0xb0] sm:$0xff] }
  0x53   : > { %357 = vst.msk [vmem:[#allocation2 + $0x31] sm:$0xff] %vm266_vm0, %v324_v3  ;;  %358 = vst.msk [vmem:[#allocation2 + $0x39] sm:$0xff] %vm266_vm0, %v325_v4 }
  0x54   : > { %359 = vst.msk [vmem:[#allocation2 + $0x49] sm:$0xff] %vm266_vm0, %v326_v5  ;;  %360 = vst.msk [vmem:[#allocation2 + $0x51] sm:$0xff] %vm266_vm0, %v327_v6  ;;  %v345_v6 = vld [vmem:[%s7126_s8 + $0xb8] sm:$0xff] }
  0x55   : > { %361 = vst.msk [vmem:[#allocation2 + $0x61] sm:$0xff] %vm266_vm0, %v328_v13  ;;  %362 = vst.msk [vmem:[#allocation2 + $0x69] sm:$0xff] %vm266_vm0, %v329_v14  ;;  %v346_v13 = vld [vmem:[%s7126_s8 + $0xc0] sm:$0xff] }
  0x56   : > { %363 = vst.msk [vmem:[#allocation2 + $0x79] sm:$0xff] %vm266_vm0, %v330_v15  ;;  %364 = vst.msk [vmem:[#allocation2 + $0x81] sm:$0xff] %vm266_vm0, %v331_v16  ;;  %v347_v16 = vld [vmem:[%s7126_s8 + $0xc8] sm:$0xff] }
  0x57   : > { %365 = vst.msk [vmem:[#allocation2 + $0x91] sm:$0xff] %vm266_vm0, %v332_v17  ;;  %366 = vst.msk [vmem:[#allocation2 + $0x99] sm:$0xff] %vm266_vm0, %v333_v18 }
  0x58   : > { %367 = vst.msk [vmem:[#allocation2 + $0xa9] sm:$0xff] %vm266_vm0, %v334_v20  ;;  %368 = vst.msk [vmem:[#allocation2 + $0xb1] sm:$0xff] %vm266_vm0, %v335_v21  ;;  %v348_v20 = vld [vmem:[%s7126_s8 + $0xd0] sm:$0xff] }
  0x59   : > { %369 = vst.msk [vmem:[#allocation2 + $0xc1] sm:$0xff] %vm266_vm0, %v336_v22  ;;  %370 = vst.msk [vmem:[#allocation2 + $0xc9] sm:$0xff] %vm266_vm0, %v337_v23  ;;  %v7179_v30 = vld [vmem:[#allocation2 + $0x18] sm:$0xff]  ;;  %v7181_v31 = vld [vmem:[#allocation2 + $0x20] sm:$0xff] }
  0x5a   : > { %371 = vst.msk [vmem:[#allocation2 + $0xd9] sm:$0xff] %vm266_vm0, %v338_v24  ;;  %372 = vst.msk [vmem:[#allocation2 + $0xe1] sm:$0xff] %vm266_vm0, %v339_v25  ;;  %v7183_v32 = vld [vmem:[#allocation2 + $0x30] sm:$0xff]  ;;  %v490_v33 = vrot.slane %v7179_v30, 1  ;;  %v7190_v34 = vrot.slane %v7181_v31, 1  ;;  %v7192_v35 = vld [vmem:[#allocation2 + $0x38] sm:$0xff] }
  0x5b   : > { %373 = vst.msk [vmem:[#allocation2 + $0xf1] sm:$0xff] %vm266_vm0, %v340_v27  ;;  %374 = vst.msk [vmem:[#allocation2 + $0xf9] sm:$0xff] %vm266_vm0, %v341_v28  ;;  %v495_v36 = vrot.slane %v7183_v32, 1  ;;  %v7195_v37 = vld [vmem:[#allocation2 + $0x28] sm:$0x3]  ;;  %v7199_v38 = vrot.slane %v7192_v35, 1 }
  0x5c   : > { %375 = vst.msk [vmem:[#allocation2 + $0x109] sm:$0xff] %vm266_vm0, %v342_v29  ;;  %v493_v39 = vrot.slane %v7195_v37, 1  ;;  %v7202_v40 = vld [vmem:[#allocation2 + $0x48] sm:$0xff]  ;;  %v7204_v41 = vld [vmem:[#allocation2 + $0x50] sm:$0xff]  ;;  %v7206_v42 = vld [vmem:[#allocation2 + $0x40] sm:$0x3]  ;;  %v7210_v43 = vsel %vm484_vm2, %v490_v33, %v7190_v34 }
  0x5d   : > { %v500_v44 = vrot.slane %v7202_v40, 1  ;;  %v7214_v45 = vrot.slane %v7204_v41, 1  ;;  %569 = vrot.lane.b32.xlu1 %v7210_v43, %s6833_s9  ;;  %v7220_v46 = vsel %vm484_vm2, %v495_v36, %v7199_v38  ;;  %v7222_v47 = vld [vmem:[#allocation2 + $0x60] sm:$0xff]  ;;  %v7224_v48 = vld [vmem:[#allocation2 + $0x68] sm:$0xff]  ;;  %v498_v50 = vrot.slane %v7206_v42, 1  ;;  %v7242_v55 = vld [vmem:[#allocation2 + $0x78] sm:$0xff] }
  0x5e   : > { %v494_v49 = vsel %vm484_vm2, %v7190_v34, %v493_v39  ;;  %573 = vrot.lane.b32.xlu0 %v7220_v46, %s6833_s9  ;;  %v7231_v51 = vld [vmem:[#allocation2 + $0x58] sm:$0x3]  ;;  %v505_v53 = vrot.slane %v7222_v47, 1  ;;  %v7239_v54 = vrot.slane %v7224_v48, 1  ;;  %v7244_v56 = vld [vmem:[#allocation2 + $0x80] sm:$0xff]  ;;  %v510_v62 = vrot.slane %v7242_v55, 1 }
  0x5f   : > { %v7235_v52 = vsel %vm484_vm2, %v500_v44, %v7214_v45  ;;  %v499_v57 = vsel %vm484_vm2, %v7199_v38, %v498_v50  ;;  %v503_v58 = vrot.slane %v7231_v51, 1  ;;  %v7251_v59 = vld [vmem:[#allocation2 + $0x70] sm:$0x3]  ;;  %v7260_v63 = vrot.slane %v7244_v56, 1  ;;  %376 = vst.msk [vmem:[#allocation2 + $0x111] sm:$0xff] %vm266_vm0, %v343_v60  ;;  %v7266_v1 = vld [vmem:[#allocation2 + $0x98] sm:$0xff] }
  0x60   : > { %v7256_v61 = vsel %vm484_vm2, %v505_v53, %v7239_v54  ;;  %v7264_v0 = vld [vmem:[#allocation2 + $0x90] sm:$0xff]  ;;  %v508_v4 = vrot.slane %v7251_v59, 1  ;;  %377 = vst.msk [vmem:[#allocation2 + $0x121] sm:$0xff] %vm266_vm0, %v344_v2  ;;  %v405_v5 = vld [vmem:[#allocation2 + $0x88] sm:$0x3]  ;;  %v7282_v12 = vrot.slane %v7266_v1, 1 }
  0x61   : > { %571 = vrot.lane.b32.xlu1 %v494_v49, %s6833_s9  ;;  %v504_v3 = vsel %vm484_vm2, %v7214_v45, %v503_v58  ;;  %v7278_v10 = vsel %vm484_vm2, %v510_v62, %v7260_v63  ;;  %v515_v11 = vrot.slane %v7264_v0, 1  ;;  %378 = vst.msk [vmem:[#allocation2 + $0x129] sm:$0xff] %vm266_vm0, %v345_v6  ;;  %v7287_v14 = vld [vmem:[#allocation2 + $0xa8] sm:$0xff]  ;;  %v7289_v15 = vld [vmem:[#allocation2 + $0xb0] sm:$0xff]  ;;  %379 = vst.msk [vmem:[#allocation2 + $0x139] sm:$0xff] %vm266_vm0, %v346_v13  ;;  %v513_v18 = vrot.slane %v405_v5, 1 }
  0x62   : > { %577 = vrot.lane.b32.xlu0 %v7235_v52, %s6833_s9  ;;  %v509_v17 = vsel %vm484_vm2, %v7239_v54, %v508_v4  ;;  %380 = vst.msk [vmem:[#allocation2 + $0x141] sm:$0xff] %vm266_vm0, %v347_v16  ;;  %v408_v19 = vld [vmem:[#allocation2 + $0xa0] sm:$0x3]  ;;  %v520_v22 = vrot.slane %v7287_v14, 1  ;;  %v7305_v23 = vrot.slane %v7289_v15, 1  ;;  %v349_v24 = vld [vmem:[%s7126_s8 + $0xd8] sm:$0xff] }
  0x63   : > { %v7301_v21 = vsel %vm484_vm2, %v515_v11, %v7282_v12  ;;  %381 = vst.msk [vmem:[#allocation2 + $0x151] sm:$0xff] %vm266_vm0, %v348_v20  ;;  %v350_v25 = vld [vmem:[%s7126_s8 + $0xe0] sm:$0xff]  ;;  %v7314_v28 = vld [vmem:[#allocation2 + $0xc8] sm:$0xff]  ;;  %382 = vst.msk [vmem:[#allocation2 + $0x159] sm:$0xff] %vm266_vm0, %v349_v24  ;;  %v514_v29 = vsel %vm484_vm2, %v7260_v63, %v513_v18  ;;  %v518_v33 = vrot.slane %v408_v19, 1 }
  0x64   : > { %v7312_v27 = vld [vmem:[#allocation2 + $0xc0] sm:$0xff]  ;;  %383 = vst.msk [vmem:[#allocation2 + $0x169] sm:$0xff] %vm266_vm0, %v350_v25  ;;  %384 = vst.msk [vmem:[#allocation2 + $0x171] sm:$0xff] %vm266_vm0, %v351_v26  ;;  %v411_v36 = vld [vmem:[#allocation2 + $0xb8] sm:$0x3]  ;;  %v7326_v44 = vsel %vm484_vm2, %v520_v22, %v7305_v23  ;;  %v7330_v50 = vrot.slane %v7314_v28, 1 }
  0x65   : > { %575 = vrot.lane.b32.xlu1 %v499_v57, %s6833_s9  ;;  %v352_v39 = vld [vmem:[%s7126_s8 + $0xf0] sm:$0xff]  ;;  %v525_v49 = vrot.slane %v7312_v27, 1  ;;  %v353_v53 = vld [vmem:[%s7126_s8 + $0xf8] sm:$0xff]  ;;  %v7337_v58 = vld [vmem:[#allocation2 + $0xe0] sm:$0xff]  ;;  %v519_v60 = vsel %vm484_vm2, %v7282_v12, %v518_v33  ;;  %v523_v62 = vrot.slane %v411_v36, 1 }
  0x66   : > { %581 = vrot.lane.b32.xlu0 %v7256_v61, %s6833_s9  ;;  %385 = vst.msk [vmem:[#allocation2 + $0x181] sm:$0xff] %vm266_vm0, %v352_v39  ;;  %v7335_v57 = vld [vmem:[#allocation2 + $0xd8] sm:$0xff]  ;;  %386 = vst.msk [vmem:[#allocation2 + $0x189] sm:$0xff] %vm266_vm0, %v353_v53  ;;  %v414_v2 = vld [vmem:[#allocation2 + $0xd0] sm:$0x3]  ;;  %v7350_v5 = vrot.slane %v7337_v58, 1 }
  0x67   : > { %v530_v4 = vrot.slane %v7335_v57, 1  ;;  %v7353_v6 = vld [vmem:[#allocation2 + $0xf0] sm:$0xff]  ;;  %v7355_v11 = vld [vmem:[#allocation2 + $0xf8] sm:$0xff]  ;;  %v524_v13 = vsel %vm484_vm2, %v7305_v23, %v523_v62  ;;  %v528_v16 = vrot.slane %v414_v2, 1  ;;  %v907_v22 = vld [vmem:[#allocation2 + $0x28] sm:$0x3] }
  0x68   : > { %v535_v19 = vrot.slane %v7353_v6, 1  ;;  %v7367_v20 = vrot.slane %v7355_v11, 1  ;;  %v1178_v39 = vrot.slane %v7181_v31, 2  ;;  %v910_v53 = vld [vmem:[#allocation2 + $0x40] sm:$0x3] }
  0x69   : > { %579 = vrot.lane.b32.xlu1 %v504_v3, %s6833_s9  ;;  %v7346_v3 = vsel %vm484_vm2, %v525_v49, %v7330_v50  ;;  %v7363_v18 = vsel %vm484_vm2, %v530_v4, %v7350_v5  ;;  %v529_v24 = vsel %vm484_vm2, %v7330_v50, %v528_v16  ;;  %v1180_v49 = vrot.slane %v907_v22, 2  ;;  %v6026_v62 = vld [vmem:[%s10239_s1 + $0x18] sm:$0xf] }
  0x6a   : > { %585 = vrot.lane.b32.xlu0 %v7278_v10, %s6833_s9  ;;  %10251 = vst [vmem:[#allocation7_spill] sm:$0xff] %v7367_v20  ;;  %v7376_v26 = vsel %vm484_vm2, %v535_v19, %v7367_v20  ;;  %v1009_v4 = vrot.slane %v910_v53, 1  ;;  %6442 = vmatprep.subr.msk.mxu0 %vm1517_vm4, %v6026_v62  ;;  %v1185_v19 = vrot.slane %v910_v53, 2  ;;  %v7429_v53 = vrot.slane %v7204_v41, 2 }
  0x6b   : > { %v1181_v2 = vsel %vm661_vm3, %v1178_v39, %v1180_v49  ;;  %6443 = vmatpush3.msk.msra.mxu0 %vm1517_vm4, %v6026_v62  ;;  %v1187_v62 = vrot.slane %v7202_v40, 2 }
  0x6c   : > { %v1010_v16 = vsel %vm484_vm2, %v7199_v38, %v1009_v4 }
  0x6d   : > { %583 = vrot.lane.b32.xlu1 %v509_v17, %s6833_s9  ;;  %v417_v17 = vld [vmem:[#allocation2 + $0xe8] sm:$0x3] }
  0x6e   : > { %589 = vrot.lane.b32.xlu0 %v7301_v21, %s6833_s9  ;;  %v533_v25 = vrot.slane %v417_v17, 1  ;;  %v7407_v17 = vrot.slane %v7192_v35, 2 }
  0x70   : > { %v534_v33 = vsel %vm484_vm2, %v7350_v5, %v533_v25 }
  0x71   : > { %587 = vrot.lane.b32.xlu1 %v514_v29, %s6833_s9  ;;  %v1004_v29 = vrot.slane %v907_v22, 1  ;;  %v1182_v22 = vrot.slane %v7183_v32, 2 }
  0x72   : > { %593 = vrot.lane.b32.xlu0 %v7326_v44, %s6833_s9 }
  0x73   : > { %v1005_v36 = vsel %vm484_vm2, %v7190_v34, %v1004_v29  ;;  %v6025_v34 = vld [vmem:[%s10239_s1 + $0x10] sm:$0xff]  ;;  %v670_v29 = vrot.slane %v7195_v37, 2 }
  0x74   : > { %6444 = vmatprep.subr.mxu0 %v6025_v34  ;;  %v916_v37 = vld [vmem:[#allocation2 + $0x70] sm:$0x3] }
  0x75   : > { %591 = vrot.lane.b32.xlu1 %v519_v60, %s6833_s9  ;;  %v1177_v60 = vrot.slane %v7179_v30, 2  ;;  %6445 = vmatpush3.msra.mxu0 %v6025_v34  ;;  %v7447_v34 = vrot.slane %v7224_v48, 2 }
  0x76   : > { %597 = vrot.lane.b32.xlu0 %v7346_v3, %s6833_s9 }
  0x79   : > { %595 = vrot.lane.b32.xlu1 %v524_v13, %s6833_s9  ;;  %v7400_v13 = vsel %vm661_vm3, %v1177_v60, %v1178_v39 }
  0x7a   : > { %601 = vrot.lane.b32.xlu0 %v7363_v18, %s6833_s9 }
  0x7d   : > { %599 = vrot.lane.b32.xlu1 %v529_v24, %s6833_s9  ;;  %v1186_v24 = vsel %vm661_vm3, %v7407_v17, %v1185_v19  ;;  %v675_v19 = vrot.slane %v7206_v42, 2 }
  0x7e   : > { %605 = vrot.lane.b32.xlu0 %v7376_v26, %s6833_s9 }
  0x81   : > { %603 = vrot.lane.b32.xlu1 %v534_v33, %s6833_s9  ;;  %v7420_v33 = vsel %vm661_vm3, %v1182_v22, %v7407_v17  ;;  %v7455_v22 = vsel %vm661_vm3, %v7407_v17, %v675_v19  ;;  %v1202_v19 = vrot.slane %v7264_v0, 2 }
  0x82   : > { %1083 = vrot.lane.b32.xlu0 %v1005_v36, %s6833_s9  ;;  %v7423_v36 = vsel %vm661_vm3, %v1178_v39, %v670_v29  ;;  %v7470_v29 = vrot.slane %v7244_v56, 2 }
  0x85   : > { %1081 = vrot.lane.b32.xlu1 %v7210_v43, %s6833_s9  ;;  %v913_v43 = vld [vmem:[#allocation2 + $0x58] sm:$0x3] }
  0x86   : > { %1259 = vrot.lane.b32.xlu0 %v1181_v2, %s6834_s14  ;;  %v1014_v25 = vrot.slane %v913_v43, 1  ;;  %v1190_v60 = vrot.slane %v913_v43, 2  ;;  %v1019_v2 = vrot.slane %v916_v37, 1  ;;  %v919_v43 = vld [vmem:[#allocation2 + $0x88] sm:$0x3] }
  0x88   : > { %v1015_v49 = vsel %vm484_vm2, %v7214_v45, %v1014_v25  ;;  %v1191_v39 = vsel %vm661_vm3, %v7429_v53, %v1190_v60  ;;  %v7441_v45 = vsel %vm661_vm3, %v1187_v62, %v7429_v53  ;;  %v1020_v4 = vsel %vm484_vm2, %v7239_v54, %v1019_v2  ;;  %v922_v60 = vld [vmem:[#allocation2 + $0xa0] sm:$0x3] }
  0x89   : > { %1257 = vrot.lane.b32.xlu1 %v7400_v13, %s6834_s14  ;;  %v1029_v62 = vrot.slane %v922_v60, 1  ;;  %v7488_v2 = vrot.slane %v7266_v1, 2 }
  0x8a   : > { %1087 = vrot.lane.b32.xlu0 %v1010_v16, %s6833_s9  ;;  %v1195_v16 = vrot.slane %v916_v37, 2  ;;  %v1197_v37 = vrot.slane %v7242_v55, 2 }
  0x8c   : > { %v1196_v54 = vsel %vm661_vm3, %v7447_v34, %v1195_v16  ;;  %v925_v16 = vld [vmem:[#allocation2 + $0xb8] sm:$0x3] }
  0x8d   : > { %1085 = vrot.lane.b32.xlu1 %v7220_v46, %s6833_s9 }
  0x8e   : > { %1263 = vrot.lane.b32.xlu0 %v1186_v24, %s6834_s14  ;;  %v1024_v24 = vrot.slane %v919_v43, 1 }
  0x90   : > { %v1025_v25 = vsel %vm484_vm2, %v7260_v63, %v1024_v24  ;;  %v7482_v63 = vsel %vm661_vm3, %v1197_v37, %v7470_v29  ;;  %v1210_v24 = vrot.slane %v925_v16, 2 }
  0x91   : > { %1261 = vrot.lane.b32.xlu1 %v7420_v33, %s6834_s14 }
  0x92   : > { %1091 = vrot.lane.b32.xlu0 %v1015_v49, %s6833_s9  ;;  %v1200_v49 = vrot.slane %v919_v43, 2  ;;  %v1034_v43 = vrot.slane %v925_v16, 1 }
  0x95   : > { %1089 = vrot.lane.b32.xlu1 %v7235_v52, %s6833_s9  ;;  %v1192_v52 = vrot.slane %v7222_v47, 2 }
  0x96   : > { %1267 = vrot.lane.b32.xlu0 %v1191_v39, %s6834_s14  ;;  %v1030_v39 = vsel %vm484_vm2, %v7282_v12, %v1029_v62  ;;  %v7500_v12 = vsel %vm661_vm3, %v1202_v19, %v7488_v2 }
  0x97   : > { %v7464_v42 = vsel %vm661_vm3, %v1192_v52, %v7447_v34  ;;  %v1035_v52 = vsel %vm484_vm2, %v7305_v23, %v1034_v43 }
  0x99   : > { %1265 = vrot.lane.b32.xlu1 %v7441_v45, %s6834_s14 }
  0x9a   : > { %1095 = vrot.lane.b32.xlu0 %v1020_v4, %s6833_s9  ;;  %v1205_v4 = vrot.slane %v922_v60, 2 }
  0x9d   : > { %1093 = vrot.lane.b32.xlu1 %v7256_v61, %s6833_s9  ;;  %v1201_v61 = vsel %vm661_vm3, %v7470_v29, %v1200_v49  ;;  %v1207_v49 = vrot.slane %v7287_v14, 2 }
  0x9e   : > { %1271 = vrot.lane.b32.xlu0 %v1196_v54, %s6834_s14  ;;  %v1208_v54 = vrot.slane %v7289_v15, 2 }
  0xa0   : > { %v1209_v37 = vsel %vm661_vm3, %v1207_v49, %v1208_v54  ;;  %v1223_v49 = vrot.slane %v7355_v11, 2 }
  0xa1   : > { %1269 = vrot.lane.b32.xlu1 %v7464_v42, %s6834_s14 }
  0xa2   : > { %1099 = vrot.lane.b32.xlu0 %v1025_v25, %s6833_s9  ;;  %v928_v25 = vld [vmem:[#allocation2 + $0xd0] sm:$0x3] }
  0xa3   : > { %v1039_v60 = vrot.slane %v928_v25, 1  ;;  %v1215_v62 = vrot.slane %v928_v25, 2 }
  0xa5   : > { %1097 = vrot.lane.b32.xlu1 %v7278_v10, %s6833_s9  ;;  %v1206_v10 = vsel %vm661_vm3, %v7488_v2, %v1205_v4  ;;  %v1040_v23 = vsel %vm484_vm2, %v7330_v50, %v1039_v60  ;;  %v1212_v4 = vrot.slane %v7312_v27, 2  ;;  %v7540_v60 = vpop.permute.xlu0 %565 }
  0xa6   : > { %1275 = vrot.lane.b32.xlu0 %v1201_v61, %s6834_s14  ;;  %v1213_v61 = vrot.slane %v7314_v28, 2  ;;  %10252 = vst [vmem:[#allocation8_spill] sm:$0xff] %v7540_v60 }
  0xa8   : > { %v1216_v16 = vsel %vm661_vm3, %v1213_v61, %v1215_v62  ;;  %v1214_v19 = vsel %vm661_vm3, %v1212_v4, %v1213_v61  ;;  %v1222_v61 = vrot.slane %v7353_v6, 2 }
  0xa9   : > { %1273 = vrot.lane.b32.xlu1 %v7482_v63, %s6834_s14 }
  0xaa   : > { %1103 = vrot.lane.b32.xlu0 %v1030_v39, %s6833_s9  ;;  %v931_v39 = vld [vmem:[#allocation2 + $0xe8] sm:$0x3] }
  0xab   : > { %v1220_v43 = vrot.slane %v931_v39, 2 }
  0xad   : > { %1101 = vrot.lane.b32.xlu1 %v7301_v21, %s6833_s9  ;;  %v1211_v21 = vsel %vm661_vm3, %v1208_v54, %v1210_v24  ;;  %v1217_v54 = vrot.slane %v7335_v57, 2 }
  0xae   : > { %1279 = vrot.lane.b32.xlu0 %v1206_v10, %s6834_s14  ;;  %v1218_v10 = vrot.slane %v7337_v58, 2 }
  0xb0   : > { %v1221_v24 = vsel %vm661_vm3, %v1218_v10, %v1220_v43  ;;  %v1219_v25 = vsel %vm661_vm3, %v1217_v54, %v1218_v10 }
  0xb1   : > { %1277 = vrot.lane.b32.xlu1 %v7500_v12, %s6834_s14 }
  0xb2   : > { %1107 = vrot.lane.b32.xlu0 %v1035_v52, %s6833_s9  ;;  %v934_v52 = vld [vmem:[#allocation2 + $0x100] sm:$0x3] }
  0xb5   : > { %1105 = vrot.lane.b32.xlu1 %v7326_v44, %s6833_s9  ;;  %v1044_v44 = vrot.slane %v931_v39, 1 }
  0xb6   : > { %1283 = vrot.lane.b32.xlu0 %v1211_v21, %s6834_s14  ;;  %v1225_v21 = vrot.slane %v934_v52, 2 }
  0xb7   : > { %v1045_v50 = vsel %vm484_vm2, %v7350_v5, %v1044_v44  ;;  %v1224_v44 = vsel %vm661_vm3, %v1222_v61, %v1223_v49 }
  0xb8   : > { %v1226_v62 = vsel %vm661_vm3, %v1223_v49, %v1225_v21  ;;  %v7572_v49 = vld [vmem:[#allocation2 + $0x120] sm:$0xff] }
  0xb9   : > { %1281 = vrot.lane.b32.xlu1 %v1209_v37, %s6834_s14  ;;  %v7543_v37 = vld [vmem:[#allocation2 + $0x110] sm:$0xff] }
  0xba   : > { %1111 = vrot.lane.b32.xlu0 %v1040_v23, %s6833_s9  ;;  %v937_v23 = vld [vmem:[#allocation2 + $0x118] sm:$0x3]  ;;  %v1052_v39 = vrot.slane %v7543_v37, 1  ;;  %v1228_v43 = vrot.slane %v7543_v37, 2 }
  0xbb   : > { %v1054_v4 = vrot.slane %v937_v23, 1 }
  0xbd   : > { %1109 = vrot.lane.b32.xlu1 %v7346_v3, %s6833_s9  ;;  %v1049_v3 = vrot.slane %v934_v52, 1  ;;  %v1055_v10 = vsel %vm484_vm2, %v1052_v39, %v1054_v4  ;;  %v1230_v52 = vrot.slane %v937_v23, 2 }
  0xbe   : > { %1287 = vrot.lane.b32.xlu0 %v1216_v16, %s6834_s14  ;;  %v7551_v16 = vpop.permute.xlu0 %567 }
  0xbf   : > { %v1050_v5 = vsel %vm484_vm2, %v7367_v20, %v1049_v3  ;;  %10253 = vst [vmem:[#allocation9_spill] sm:$0xff] %v7551_v16  ;;  %v1231_v21 = vsel %vm661_vm3, %v1228_v43, %v1230_v52 }
  0xc1   : > { %1285 = vrot.lane.b32.xlu1 %v1214_v19, %s6834_s14 }
  0xc2   : > { %1115 = vrot.lane.b32.xlu0 %v1045_v50, %s6833_s9 }
  0xc5   : > { %1113 = vrot.lane.b32.xlu1 %v7363_v18, %s6833_s9  ;;  %v7547_v18 = vld [vmem:[#allocation2 + $0x108] sm:$0xff] }
  0xc6   : > { %1291 = vrot.lane.b32.xlu0 %v1221_v24, %s6834_s14  ;;  %v1051_v19 = vrot.slane %v7547_v18, 1  ;;  %v7565_v24 = vld [vmem:[#allocation2 + $0x128] sm:$0xff] }
  0xc7   : > { %v1057_v23 = vrot.slane %v7565_v24, 1 }
  0xc8   : > { %v1053_v3 = vsel %vm484_vm2, %v1051_v19, %v1052_v39  ;;  %v1056_v39 = vrot.slane %v7572_v49, 1 }
  0xc9   : > { %1289 = vrot.lane.b32.xlu1 %v1219_v25, %s6834_s14  ;;  %v1227_v25 = vrot.slane %v7547_v18, 2 }
  0xca   : > { %1119 = vrot.lane.b32.xlu0 %v1050_v5, %s6833_s9 }
  0xcb   : > { %v1229_v4 = vsel %vm661_vm3, %v1227_v25, %v1228_v43  ;;  %v1058_v43 = vsel %vm484_vm2, %v1056_v39, %v1057_v23  ;;  %v1232_v25 = vrot.slane %v7572_v49, 2 }
  0xcd   : > { %1117 = vrot.lane.b32.xlu1 %v7376_v26, %s6833_s9  ;;  %v940_v26 = vld [vmem:[#allocation2 + $0x130] sm:$0x3] }
  0xce   : > { %1295 = vrot.lane.b32.xlu0 %v1226_v62, %s6834_s14  ;;  %v1059_v61 = vrot.slane %v940_v26, 1  ;;  %v1235_v52 = vrot.slane %v940_v26, 2 }
  0xcf   : > { %v7558_v50 = vpop.permute.xlu1 %569 }
  0xd0   : > { %10254 = vst [vmem:[#allocation10_spill] sm:$0xff] %v7558_v50  ;;  %v7562_v54 = vpop.permute.xlu0 %573  ;;  %v1060_v19 = vsel %vm484_vm2, %v1057_v23, %v1059_v61 }
  0xd1   : > { %10255 = vst [vmem:[#allocation11_spill] sm:$0xff] %v7562_v54  ;;  %1293 = vrot.lane.b32.xlu1 %v1224_v44, %s6834_s14 }
  0xd2   : > { %1123 = vrot.lane.b32.xlu0 %v1055_v10, %s6833_s9  ;;  %v1233_v10 = vrot.slane %v7565_v24, 2 }
  0xd3   : > { %v7570_v5 = vpop.permute.xlu1 %571 }
  0xd4   : > { %10256 = vst [vmem:[#allocation12_spill] sm:$0xff] %v7570_v5  ;;  %v7576_v62 = vpop.permute.xlu0 %577  ;;  %v1236_v61 = vsel %vm661_vm3, %v1233_v10, %v1235_v52 }
  0xd5   : > { %10257 = vst [vmem:[#allocation13_spill] sm:$0xff] %v7576_v62  ;;  %1121 = vrot.lane.b32.xlu1 %v1053_v3, %s6833_s9  ;;  %v7589_v62 = vld [vmem:[#allocation2 + $0x140] sm:$0xff]  ;;  %v943_v3 = vld [vmem:[#allocation2 + $0x148] sm:$0x3] }
  0xd6   : > { %1299 = vrot.lane.b32.xlu0 %v1231_v21, %s6834_s14  ;;  %v1062_v26 = vrot.slane %v7589_v62, 1  ;;  %v1240_v52 = vrot.slane %v943_v3, 2 }
  0xd7   : > { %v7582_v44 = vpop.permute.xlu1 %575 }
  0xd8   : > { %10258 = vst [vmem:[#allocation14_spill] sm:$0xff] %v7582_v44  ;;  %v7586_v54 = vpop.permute.xlu0 %581  ;;  %v7596_v44 = vld [vmem:[#allocation2 + $0x138] sm:$0xff] }
  0xd9   : > { %10259 = vst [vmem:[#allocation15_spill] sm:$0xff] %v7586_v54  ;;  %1297 = vrot.lane.b32.xlu1 %v1229_v4, %s6834_s14  ;;  %v1064_v54 = vrot.slane %v943_v3, 1  ;;  %v1234_v4 = vsel %vm661_vm3, %v1232_v25, %v1233_v10  ;;  %v1061_v23 = vrot.slane %v7596_v44, 1  ;;  %v1237_v25 = vrot.slane %v7596_v44, 2 }
  0xda   : > { %1127 = vrot.lane.b32.xlu0 %v1060_v19, %s6833_s9 }
  0xdb   : > { %v7594_v21 = vpop.permute.xlu1 %579  ;;  %v1065_v19 = vsel %vm484_vm2, %v1062_v26, %v1064_v54  ;;  %v1063_v10 = vsel %vm484_vm2, %v1061_v23, %v1062_v26 }
  0xdc   : > { %10260 = vst [vmem:[#allocation16_spill] sm:$0xff] %v7594_v21  ;;  %v7600_v5 = vpop.permute.xlu0 %585  ;;  %v1238_v21 = vrot.slane %v7589_v62, 2 }
  0xdd   : > { %10261 = vst [vmem:[#allocation17_spill] sm:$0xff] %v7600_v5  ;;  %1125 = vrot.lane.b32.xlu1 %v1058_v43, %s6833_s9  ;;  %v7613_v5 = vld [vmem:[#allocation2 + $0x158] sm:$0xff]  ;;  %v946_v43 = vld [vmem:[#allocation2 + $0x160] sm:$0x3] }
  0xde   : > { %1303 = vrot.lane.b32.xlu0 %v1236_v61, %s6834_s14  ;;  %10264 = vst [vmem:[#allocation20_spill] sm:$0xff] %v7613_v5  ;;  %v1241_v54 = vsel %vm661_vm3, %v1238_v21, %v1240_v52  ;;  %v1067_v3 = vrot.slane %v7613_v5, 1  ;;  %v1245_v52 = vrot.slane %v946_v43, 2 }
  0xdf   : > { %v7606_v39 = vpop.permute.xlu1 %583 }
  0xe0   : > { %10262 = vst [vmem:[#allocation18_spill] sm:$0xff] %v7606_v39  ;;  %v7610_v50 = vpop.permute.xlu0 %589  ;;  %v7620_v39 = vld [vmem:[#allocation2 + $0x150] sm:$0xff] }
  0xe1   : > { %10263 = vst [vmem:[#allocation19_spill] sm:$0xff] %v7610_v50  ;;  %1301 = vrot.lane.b32.xlu1 %v1234_v4, %s6834_s14  ;;  %10266 = vst [vmem:[#allocation22_spill] sm:$0xff] %v7620_v39  ;;  %v1069_v50 = vrot.slane %v946_v43, 1  ;;  %v1239_v4 = vsel %vm661_vm3, %v1237_v25, %v1238_v21  ;;  %v1066_v26 = vrot.slane %v7620_v39, 1  ;;  %v1242_v25 = vrot.slane %v7620_v39, 2 }
  0xe2   : > { %1131 = vrot.lane.b32.xlu0 %v1065_v19, %s6833_s9 }
  0xe3   : > { %v7618_v61 = vpop.permute.xlu1 %587  ;;  %v1070_v19 = vsel %vm484_vm2, %v1067_v3, %v1069_v50  ;;  %v1068_v21 = vsel %vm484_vm2, %v1066_v26, %v1067_v3 }
  0xe4   : > { %10265 = vst [vmem:[#allocation21_spill] sm:$0xff] %v7618_v61  ;;  %v7624_v20 = vpop.permute.xlu0 %593  ;;  %v1243_v61 = vrot.slane %v7613_v5, 2 }
  0xe5   : > { %10267 = vst [vmem:[#allocation23_spill] sm:$0xff] %v7624_v20  ;;  %1129 = vrot.lane.b32.xlu1 %v1063_v10, %s6833_s9  ;;  %v7637_v20 = vld [vmem:[#allocation2 + $0x170] sm:$0xff]  ;;  %v949_v10 = vld [vmem:[#allocation2 + $0x178] sm:$0x3] }
  0xe6   : > { %1307 = vrot.lane.b32.xlu0 %v1241_v54, %s6834_s14  ;;  %10270 = vst [vmem:[#allocation26_spill] sm:$0xff] %v7637_v20  ;;  %v1246_v50 = vsel %vm661_vm3, %v1243_v61, %v1245_v52  ;;  %v1072_v43 = vrot.slane %v7637_v20, 1  ;;  %v1250_v52 = vrot.slane %v949_v10, 2 }
  0xe7   : > { %v7630_v23 = vpop.permute.xlu1 %591 }
  0xe8   : > { %10268 = vst [vmem:[#allocation24_spill] sm:$0xff] %v7630_v23  ;;  %v7634_v16 = vpop.permute.xlu0 %597  ;;  %v7644_v23 = vld [vmem:[#allocation2 + $0x168] sm:$0xff] }
  0xe9   : > { %10269 = vst [vmem:[#allocation25_spill] sm:$0xff] %v7634_v16  ;;  %1305 = vrot.lane.b32.xlu1 %v1239_v4, %s6834_s14  ;;  %10272 = vst [vmem:[#allocation28_spill] sm:$0xff] %v7644_v23  ;;  %v1074_v16 = vrot.slane %v949_v10, 1  ;;  %v1244_v4 = vsel %vm661_vm3, %v1242_v25, %v1243_v61  ;;  %v1071_v3 = vrot.slane %v7644_v23, 1  ;;  %v1247_v25 = vrot.slane %v7644_v23, 2 }
  0xea   : > { %1135 = vrot.lane.b32.xlu0 %v1070_v19, %s6833_s9 }
  0xeb   : > { %v7642_v54 = vpop.permute.xlu1 %595  ;;  %v1075_v19 = vsel %vm484_vm2, %v1072_v43, %v1074_v16  ;;  %v1073_v61 = vsel %vm484_vm2, %v1071_v3, %v1072_v43  ;;  %v904_v43 = vld [vmem:[%s10239_s1 + $0x8] sm:$0xf] }
  0xec   : > { %10271 = vst [vmem:[#allocation27_spill] sm:$0xff] %v7642_v54  ;;  %v7648_v60 = vpop.permute.xlu0 %601  ;;  %v1248_v54 = vrot.slane %v7637_v20, 2  ;;  %6494 = vmatprep.subr.msk.mxu1 %vm1517_vm4, %v904_v43 }
  0xed   : > { %10273 = vst [vmem:[#allocation29_spill] sm:$0xff] %v7648_v60  ;;  %1133 = vrot.lane.b32.xlu1 %v1068_v21, %s6833_s9  ;;  %v7661_v60 = vld [vmem:[#allocation2 + $0x188] sm:$0xff]  ;;  %v952_v21 = vld [vmem:[#allocation2 + $0x190] sm:$0x3]  ;;  %6495 = vmatpush3.msk.msra.mxu1 %vm1517_vm4, %v904_v43 }
  0xee   : > { %1311 = vrot.lane.b32.xlu0 %v1246_v50, %s6834_s14  ;;  %v1251_v16 = vsel %vm661_vm3, %v1248_v54, %v1250_v52  ;;  %v1077_v10 = vrot.slane %v7661_v60, 1  ;;  %v903_v52 = vld [vmem:[%s10239_s1] sm:$0xff] }
  0xef   : > { %v7654_v26 = vpop.permute.xlu1 %599  ;;  %6496 = vmatprep.subr.mxu1 %v903_v52 }
  0xf0   : > { %10274 = vst [vmem:[#allocation30_spill] sm:$0xff] %v7654_v26  ;;  %v7658_v39 = vpop.permute.xlu0 %605  ;;  %v7668_v26 = vld [vmem:[#allocation2 + $0x180] sm:$0xff]  ;;  %6497 = vmatpush3.msra.mxu1 %v903_v52  ;;  %v665_v52 = vrot.slane %v7141_v9, 2 }
  0xf1   : > { %10275 = vst [vmem:[#allocation31_spill] sm:$0xff] %v7658_v39  ;;  %1309 = vrot.lane.b32.xlu1 %v1244_v4, %s6834_s14  ;;  %v1079_v39 = vrot.slane %v952_v21, 1  ;;  %v1249_v4 = vsel %vm661_vm3, %v1247_v25, %v1248_v54  ;;  %v1076_v3 = vrot.slane %v7668_v26, 1  ;;  %v1253_v54 = vrot.slane %v7661_v60, 2  ;;  %v6093_v9 = vld [vmem:[%s10239_s1 + $0x20] sm:$0xff] }
  0xf2   : > { %1139 = vrot.lane.b32.xlu0 %v1075_v19, %s6833_s9  ;;  %v1255_v25 = vrot.slane %v952_v21, 2  ;;  %v1252_v43 = vrot.slane %v7668_v26, 2 }
  0xf3   : > { %v7666_v50 = vpop.permute.xlu1 %603 }
  0xf4   : > { %10276 = vst [vmem:[#allocation32_spill] sm:$0xff] %v7666_v50  ;;  %v1084_v20 = vpop.permute.xlu0 %1083  ;;  %v1080_v50 = vsel %vm484_vm2, %v1077_v10, %v1079_v39  ;;  %v1256_v21 = vsel %vm661_vm3, %v1253_v54, %v1255_v25 }
  0xf5   : > { %1137 = vrot.lane.b32.xlu1 %v1073_v61, %s6833_s9  ;;  %v1354_v61 = vsel %vm266_vm0, %v7181_v31, %v1084_v20 }
  0xf6   : > { %1315 = vrot.lane.b32.xlu0 %v1251_v16, %s6834_s14  ;;  %v1078_v16 = vsel %vm484_vm2, %v1076_v3, %v1077_v10  ;;  %v2073_v3 = vld [vmem:[#allocation2 + $0x40] sm:$0x3] }
  0xf7   : > { %v1082_v19 = vpop.permute.xlu1 %1081 }
  0xf8   : > { %v1260_v23 = vpop.permute.xlu0 %1259  ;;  %v1353_v5 = vsel %vm266_vm0, %v7179_v30, %v1082_v19  ;;  %v6094_v30 = vld [vmem:[%s10239_s1 + $0x28] sm:$0xf] }
  0xf9   : > { %1313 = vrot.lane.b32.xlu1 %v1249_v4, %s6834_s14  ;;  %v1386_v31 = vsel %vm870_vm5, %v1354_v61, %v1260_v23  ;;  %v663_v4 = vrot.slane %v7139_v8, 2  ;;  %v662_v23 = vrot.slane %v7137_v7, 2  ;;  %6546 = vmatprep.subr.msk.mxu0 %vm1517_vm4, %v6094_v30  ;;  %v2170_v61 = vrot.slane %v2073_v3, 1 }
  0xfa   : > { %1143 = vrot.lane.b32.xlu0 %v1080_v50, %s6833_s9 }
  0xfb   : > { %v1258_v20 = vpop.permute.xlu1 %1257  ;;  %v666_v19 = vsel %vm661_vm3, %v663_v4, %v665_v52  ;;  %v664_v7 = vsel %vm661_vm3, %v662_v23, %v663_v4  ;;  %v7741_v23 = vld [vmem:[#allocation2 + $0x48] sm:$0xff] }
  0xfc   : > { %v1385_v39 = vsel %vm870_vm5, %v1353_v5, %v1258_v20  ;;  %v1088_v10 = vpop.permute.xlu0 %1087  ;;  %v1254_v5 = vsel %vm661_vm3, %v1252_v43, %v1253_v54  ;;  %v2346_v20 = vrot.slane %v2073_v3, 2 }
  0xfd   : > { %1141 = vrot.lane.b32.xlu1 %v1078_v16, %s6833_s9  ;;  %6446 = vmatprep.mubr.msk.f32.mxu0 %vm1420_vm6, %v1385_v39  ;;  %v1356_v50 = vsel %vm266_vm0, %v7192_v35, %v1088_v10  ;;  %v2076_v10 = vld [vmem:[#allocation2 + $0x58] sm:$0x3] }
  0xfe   : > { %6447 = vmatmul.mubr.msk.f32.vlgmr.msra.gmra.mxu0 %vm1420_vm6, %v1386_v31  ;;  %1319 = vrot.lane.b32.xlu0 %v1256_v21, %s6834_s14  ;;  %v2171_v31 = vsel %vm484_vm2, %v7199_v38, %v2170_v61  ;;  %v2347_v4 = vsel %vm661_vm3, %v7407_v17, %v2346_v20  ;;  %v7735_v38 = vld [vmem:[#allocation2 + $0x50] sm:$0xff] }
  0xff   : > { %v1086_v8 = vpop.permute.xlu1 %1085  ;;  %6547 = vmatpush3.msk.msra.mxu0 %vm1517_vm4, %v6094_v30  ;;  %v2173_v17 = vrot.slane %v7735_v38, 1  ;;  %v2349_v61 = vrot.slane %v7735_v38, 2 }
 0x100   : > { %6548 = vmatprep.subr.mxu0 %v6093_v9  ;;  %v1264_v54 = vpop.permute.xlu0 %1263  ;;  %v1355_v25 = vsel %vm266_vm0, %v7183_v32, %v1086_v8  ;;  %v2175_v8 = vrot.slane %v2076_v10, 1 }
 0x101   : > { %1317 = vrot.lane.b32.xlu1 %v1254_v5, %s6834_s14  ;;  %6549 = vmatpush3.msra.mxu0 %v6093_v9  ;;  %v1388_v16 = vsel %vm870_vm5, %v1356_v50, %v1264_v54  ;;  %v2351_v54 = vrot.slane %v2076_v10, 2 }
 0x102   : > { %744 = vrot.lane.b32.xlu0 %v666_v19, %s6834_s14  ;;  %v2176_v19 = vsel %vm484_vm2, %v2173_v17, %v2175_v8 }
 0x103   : > { %v1262_v43 = vpop.permute.xlu1 %1261 }
 0x104   : > { %v1387_v35 = vsel %vm870_vm5, %v1355_v25, %v1262_v43  ;;  %v1092_v39 = vpop.permute.xlu0 %1091 }
 0x105   : > { %742 = vrot.lane.b32.xlu1 %v664_v7, %s6834_s14  ;;  %6449 = vmatprep.mubr.msk.f32.mxu0 %vm1420_vm6, %v1387_v35  ;;  %v1358_v21 = vsel %vm266_vm0, %v7204_v41, %v1092_v39  ;;  %v2079_v39 = vld [vmem:[#allocation2 + $0x70] sm:$0x3] }
 0x106   : > { %6450 = vmatmul.mubr.msk.f32.gmra.mxu0 %vm1420_vm6, %v1388_v16  ;;  %2249 = vrot.lane.b32.xlu0 %v2171_v31, %s6833_s9  ;;  %v2348_v16 = vrot.slane %v7741_v23, 2  ;;  %v2352_v31 = vsel %vm661_vm3, %v2349_v61, %v2351_v54  ;;  %v2180_v10 = vrot.slane %v2079_v39, 1  ;;  %v680_v54 = vrot.slane %v7231_v51, 2 }
 0x107   : > { %v1090_v32 = vpop.permute.xlu1 %1089 }
 0x108   : > { %v1268_v52 = vpop.permute.xlu0 %1267  ;;  %v1357_v3 = vsel %vm266_vm0, %v7202_v40, %v1090_v32  ;;  %v2172_v40 = vrot.slane %v7741_v23, 1 }
 0x109   : > { %2247 = vrot.lane.b32.xlu1 %v7220_v46, %s6833_s9  ;;  %v1390_v30 = vsel %vm870_vm5, %v1358_v21, %v1268_v52  ;;  %v7773_v21 = vld [vmem:[#allocation2 + $0x60] sm:$0xff] }
 0x10a   : > { %2425 = vrot.lane.b32.xlu0 %v2347_v4, %s6834_s14  ;;  %v2174_v25 = vsel %vm484_vm2, %v2172_v40, %v2173_v17  ;;  %v2356_v40 = vrot.slane %v2079_v39, 2 }
 0x10b   : > { %v1266_v5 = vpop.permute.xlu1 %1265 }
 0x10c   : > { %v1389_v41 = vsel %vm870_vm5, %v1357_v3, %v1266_v5  ;;  %v1096_v9 = vpop.permute.xlu0 %1095 }
 0x10d   : > { %2423 = vrot.lane.b32.xlu1 %v7420_v33, %s6834_s14  ;;  %6452 = vmatprep.mubr.msk.f32.mxu0 %vm1420_vm6, %v1389_v41  ;;  %v1360_v50 = vsel %vm266_vm0, %v7224_v48, %v1096_v9 }
 0x10e   : > { %6453 = vmatmul.mubr.msk.f32.gmra.mxu0 %vm1420_vm6, %v1390_v30  ;;  %748 = vrot.lane.b32.xlu0 %v7423_v36, %s6834_s14  ;;  %v2177_v30 = vrot.slane %v7773_v21, 1 }
 0x10f   : > { %v1094_v46 = vpop.permute.xlu1 %1093 }
 0x110   : > { %v1272_v7 = vpop.permute.xlu0 %1271  ;;  %v1359_v36 = vsel %vm266_vm0, %v7222_v47, %v1094_v46  ;;  %v2350_v47 = vsel %vm661_vm3, %v2348_v16, %v2349_v61 }
 0x111   : > { %746 = vrot.lane.b32.xlu1 %v7400_v13, %s6834_s14  ;;  %v1392_v43 = vsel %vm870_vm5, %v1360_v50, %v1272_v7  ;;  %v7768_v13 = vld [vmem:[#allocation2 + $0x68] sm:$0xff] }
 0x112   : > { %2253 = vrot.lane.b32.xlu0 %v2176_v19, %s6833_s9  ;;  %v2178_v52 = vrot.slane %v7768_v13, 1  ;;  %v2354_v9 = vrot.slane %v7768_v13, 2 }
 0x113   : > { %v1270_v48 = vpop.permute.xlu1 %1269 }
 0x114   : > { %v1391_v35 = vsel %vm870_vm5, %v1359_v36, %v1270_v48  ;;  %v1100_v20 = vpop.permute.xlu0 %1099  ;;  %v2357_v61 = vsel %vm661_vm3, %v2354_v9, %v2356_v40  ;;  %v7807_v48 = vld [vmem:[#allocation2 + $0x78] sm:$0xff]  ;;  %v2085_v40 = vld [vmem:[#allocation2 + $0xa0] sm:$0x3] }
 0x115   : > { %2251 = vrot.lane.b32.xlu1 %v2174_v25, %s6833_s9  ;;  %6455 = vmatprep.mubr.msk.f32.mxu0 %vm1420_vm6, %v1391_v35  ;;  %v1362_v4 = vsel %vm266_vm0, %v7244_v56, %v1100_v20  ;;  %v2181_v56 = vsel %vm484_vm2, %v2178_v52, %v2180_v10  ;;  %v2082_v25 = vld [vmem:[#allocation2 + $0x88] sm:$0x3]  ;;  %v681_v35 = vsel %vm661_vm3, %v7429_v53, %v680_v54 }
 0x116   : > { %6456 = vmatmul.mubr.msk.f32.gmra.mxu0 %vm1420_vm6, %v1392_v43  ;;  %2429 = vrot.lane.b32.xlu0 %v2352_v31, %s6834_s14  ;;  %v2185_v20 = vrot.slane %v2082_v25, 1 }
 0x117   : > { %v1098_v32 = vpop.permute.xlu1 %1097 }
 0x118   : > { %v1276_v3 = vpop.permute.xlu0 %1275  ;;  %v1361_v5 = vsel %vm266_vm0, %v7242_v55, %v1098_v32  ;;  %v2179_v55 = vsel %vm484_vm2, %v2177_v30, %v2178_v52  ;;  %v2361_v52 = vrot.slane %v2082_v25, 2  ;;  %v2358_v30 = vrot.slane %v7807_v48, 2 }
 0x119   : > { %2427 = vrot.lane.b32.xlu1 %v2350_v47, %s6834_s14  ;;  %v1394_v41 = vsel %vm870_vm5, %v1362_v4, %v1276_v3 }
 0x11a   : > { %752 = vrot.lane.b32.xlu0 %v7455_v22, %s6834_s14  ;;  %v2353_v22 = vrot.slane %v7773_v21, 2 }
 0x11b   : > { %v1274_v17 = vpop.permute.xlu1 %1273 }
 0x11c   : > { %v1393_v8 = vsel %vm870_vm5, %v1361_v5, %v1274_v17  ;;  %v1104_v46 = vpop.permute.xlu0 %1103  ;;  %v2355_v16 = vsel %vm661_vm3, %v2353_v22, %v2354_v9 }
 0x11d   : > { %750 = vrot.lane.b32.xlu1 %v7420_v33, %s6834_s14  ;;  %6458 = vmatprep.mubr.msk.f32.mxu0 %vm1420_vm6, %v1393_v8  ;;  %v1364_v19 = vsel %vm266_vm0, %v7266_v1, %v1104_v46  ;;  %v7800_v33 = vld [vmem:[#allocation2 + $0x80] sm:$0xff] }
 0x11e   : > { %6459 = vmatmul.mubr.msk.f32.gmra.mxu0 %vm1420_vm6, %v1394_v41  ;;  %2257 = vrot.lane.b32.xlu0 %v2181_v56, %s6833_s9  ;;  %v2183_v31 = vrot.slane %v7800_v33, 1  ;;  %v2359_v4 = vrot.slane %v7800_v33, 2  ;;  %v685_v56 = vrot.slane %v7251_v59, 2 }
 0x11f   : > { %v1102_v50 = vpop.permute.xlu1 %1101 }
 0x120   : > { %v1280_v7 = vpop.permute.xlu0 %1279  ;;  %v1363_v36 = vsel %vm266_vm0, %v7264_v0, %v1102_v50  ;;  %v2182_v0 = vrot.slane %v7807_v48, 1  ;;  %v2186_v53 = vsel %vm484_vm2, %v2183_v31, %v2185_v20  ;;  %v2362_v8 = vsel %vm661_vm3, %v2359_v4, %v2361_v52 }
 0x121   : > { %2255 = vrot.lane.b32.xlu1 %v2179_v55, %s6833_s9  ;;  %v1396_v43 = vsel %vm870_vm5, %v1364_v19, %v1280_v7  ;;  %v7840_v55 = vld [vmem:[#allocation2 + $0x90] sm:$0xff]  ;;  %v686_v22 = vsel %vm661_vm3, %v7447_v34, %v685_v56  ;;  %v2190_v19 = vrot.slane %v2085_v40, 1 }
 0x122   : > { %2433 = vrot.lane.b32.xlu0 %v2357_v61, %s6834_s14  ;;  %v2184_v3 = vsel %vm484_vm2, %v2182_v0, %v2183_v31  ;;  %v2187_v54 = vrot.slane %v7840_v55, 1 }
 0x123   : > { %v1278_v1 = vpop.permute.xlu1 %1277 }
 0x124   : > { %v1395_v51 = vsel %vm870_vm5, %v1363_v36, %v1278_v1  ;;  %v1108_v39 = vpop.permute.xlu0 %1107 }
 0x125   : > { %2431 = vrot.lane.b32.xlu1 %v2355_v16, %s6834_s14  ;;  %6461 = vmatprep.mubr.msk.f32.mxu0 %vm1420_vm6, %v1395_v51  ;;  %v1366_v32 = vsel %vm266_vm0, %v7289_v15, %v1108_v39  ;;  %v2363_v51 = vrot.slane %v7840_v55, 2  ;;  %v6776_v39 = vld [vmem:[#allocation2 + $0x88] sm:$0x3] }
 0x126   : > { %6462 = vmatmul.mubr.msk.f32.gmra.mxu0 %vm1420_vm6, %v1396_v43  ;;  %756 = vrot.lane.b32.xlu0 %v681_v35, %s6834_s14  ;;  %v2366_v43 = vrot.slane %v2085_v40, 2  ;;  %v690_v0 = vrot.slane %v6776_v39, 2 }
 0x127   : > { %v1106_v47 = vpop.permute.xlu1 %1105 }
 0x128   : > { %v1284_v10 = vpop.permute.xlu0 %1283  ;;  %v1365_v5 = vsel %vm266_vm0, %v7287_v14, %v1106_v47  ;;  %v2360_v14 = vsel %vm661_vm3, %v2358_v30, %v2359_v4  ;;  %v691_v30 = vsel %vm661_vm3, %v7470_v29, %v690_v0 }
 0x129   : > { %754 = vrot.lane.b32.xlu1 %v7441_v45, %s6834_s14  ;;  %v1398_v41 = vsel %vm870_vm5, %v1366_v32, %v1284_v10  ;;  %v7835_v45 = vld [vmem:[#allocation2 + $0x98] sm:$0xff]  ;;  %v7874_v10 = vld [vmem:[#allocation2 + $0xa8] sm:$0xff] }
 0x12a   : > { %2261 = vrot.lane.b32.xlu0 %v2186_v53, %s6833_s9  ;;  %v2188_v50 = vrot.slane %v7835_v45, 1  ;;  %v2364_v36 = vrot.slane %v7835_v45, 2  ;;  %v2088_v32 = vld [vmem:[#allocation2 + $0xb8] sm:$0x3] }
 0x12b   : > { %v1282_v15 = vpop.permute.xlu1 %1281 }
 0x12c   : > { %v1397_v17 = vsel %vm870_vm5, %v1365_v5, %v1282_v15  ;;  %v1112_v9 = vpop.permute.xlu0 %1111  ;;  %v2191_v34 = vsel %vm484_vm2, %v2188_v50, %v2190_v19  ;;  %v2367_v20 = vsel %vm661_vm3, %v2364_v36, %v2366_v43  ;;  %v2365_v53 = vsel %vm661_vm3, %v2363_v51, %v2364_v36 }
 0x12d   : > { %2259 = vrot.lane.b32.xlu1 %v2184_v3, %s6833_s9  ;;  %6464 = vmatprep.mubr.msk.f32.mxu0 %vm1420_vm6, %v1397_v17  ;;  %v1368_v59 = vsel %vm266_vm0, %v7314_v28, %v1112_v9  ;;  %v2371_v9 = vrot.slane %v2088_v32, 2 }
 0x12e   : > { %6465 = vmatmul.mubr.msk.f32.gmra.mxu0 %vm1420_vm6, %v1398_v41  ;;  %2437 = vrot.lane.b32.xlu0 %v2362_v8, %s6834_s14  ;;  %v2195_v41 = vrot.slane %v2088_v32, 1 }
 0x12f   : > { %v1110_v46 = vpop.permute.xlu1 %1109 }
 0x130   : > { %v1288_v61 = vpop.permute.xlu0 %1287  ;;  %v1367_v7 = vsel %vm266_vm0, %v7312_v27, %v1110_v46  ;;  %v2189_v27 = vsel %vm484_vm2, %v2187_v54, %v2188_v50  ;;  %v2368_v46 = vrot.slane %v7874_v10, 2 }
 0x131   : > { %2435 = vrot.lane.b32.xlu1 %v2360_v14, %s6834_s14  ;;  %v1400_v25 = vsel %vm870_vm5, %v1368_v59, %v1288_v61  ;;  %v6777_v61 = vld [vmem:[#allocation2 + $0xa0] sm:$0x3] }
 0x132   : > { %760 = vrot.lane.b32.xlu0 %v686_v22, %s6834_s14  ;;  %v695_v54 = vrot.slane %v6777_v61, 2 }
 0x133   : > { %v1286_v16 = vpop.permute.xlu1 %1285 }
 0x134   : > { %v1399_v28 = vsel %vm870_vm5, %v1367_v7, %v1286_v16  ;;  %v1116_v1 = vpop.permute.xlu0 %1115  ;;  %v696_v36 = vsel %vm661_vm3, %v7488_v2, %v695_v54 }
 0x135   : > { %758 = vrot.lane.b32.xlu1 %v7464_v42, %s6834_s14  ;;  %6467 = vmatprep.mubr.msk.f32.mxu0 %vm1420_vm6, %v1399_v28  ;;  %v1370_v31 = vsel %vm266_vm0, %v7337_v58, %v1116_v1  ;;  %v7867_v42 = vld [vmem:[#allocation2 + $0xb0] sm:$0xff]  ;;  %v7906_v28 = vld [vmem:[#allocation2 + $0xc0] sm:$0xff] }
 0x136   : > { %6468 = vmatmul.mubr.msk.f32.gmra.mxu0 %vm1420_vm6, %v1400_v25  ;;  %2265 = vrot.lane.b32.xlu0 %v2191_v34, %s6833_s9  ;;  %v2193_v5 = vrot.slane %v7867_v42, 1  ;;  %v2369_v56 = vrot.slane %v7867_v42, 2  ;;  %v2091_v25 = vld [vmem:[#allocation2 + $0xd0] sm:$0x3]  ;;  %v2197_v51 = vrot.slane %v7906_v28, 1  ;;  %v2373_v32 = vrot.slane %v7906_v28, 2 }
 0x137   : > { %v1114_v35 = vpop.permute.xlu1 %1113  ;;  %v2200_v1 = vrot.slane %v2091_v25, 1  ;;  %v2376_v0 = vrot.slane %v2091_v25, 2 }
 0x138   : > { %v1292_v47 = vpop.permute.xlu0 %1291  ;;  %v1369_v4 = vsel %vm266_vm0, %v7335_v57, %v1114_v35  ;;  %v2192_v57 = vrot.slane %v7874_v10, 1  ;;  %v2196_v29 = vsel %vm484_vm2, %v2193_v5, %v2195_v41  ;;  %v2372_v19 = vsel %vm661_vm3, %v2369_v56, %v2371_v9  ;;  %v7936_v41 = vld [vmem:[#allocation2 + $0xe0] sm:$0xff]  ;;  %v7946_v9 = vld [vmem:[#allocation2 + $0xd8] sm:$0xff] }
 0x139   : > { %2263 = vrot.lane.b32.xlu1 %v2189_v27, %s6833_s9  ;;  %v1402_v52 = vsel %vm870_vm5, %v1370_v31, %v1292_v47  ;;  %v2379_v54 = vrot.slane %v7936_v41, 2 }
 0x13a   : > { %2441 = vrot.lane.b32.xlu0 %v2367_v20, %s6834_s14  ;;  %v2194_v14 = vsel %vm484_vm2, %v2192_v57, %v2193_v5 }
 0x13b   : > { %v1290_v58 = vpop.permute.xlu1 %1289 }
 0x13c   : > { %v1401_v3 = vsel %vm870_vm5, %v1369_v4, %v1290_v58  ;;  %v1120_v15 = vpop.permute.xlu0 %1119  ;;  %v7932_v58 = vld [vmem:[#allocation2 + $0xb0] sm:$0xff] }
 0x13d   : > { %2439 = vrot.lane.b32.xlu1 %v2365_v53, %s6834_s14  ;;  %6470 = vmatprep.mubr.msk.f32.mxu0 %vm1420_vm6, %v1401_v3  ;;  %v1372_v8 = vsel %vm266_vm0, %v7355_v11, %v1120_v15  ;;  %v6779_v3 = vld [vmem:[#allocation2 + $0xb8] sm:$0x3]  ;;  %v2094_v15 = vld [vmem:[#allocation2 + $0xe8] sm:$0x3] }
 0x13e   : > { %6471 = vmatmul.mubr.msk.f32.gmra.mxu0 %vm1420_vm6, %v1402_v52  ;;  %764 = vrot.lane.b32.xlu0 %v691_v30, %s6834_s14  ;;  %v700_v30 = vrot.slane %v6779_v3, 2 }
 0x13f   : > { %v1118_v17 = vpop.permute.xlu1 %1117 }
 0x140   : > { %v1296_v40 = vpop.permute.xlu0 %1295  ;;  %v1371_v59 = vsel %vm266_vm0, %v7353_v6, %v1118_v17  ;;  %v2370_v6 = vsel %vm661_vm3, %v2368_v46, %v2369_v56  ;;  %v7939_v17 = vld [vmem:[#allocation2 + $0xa8] sm:$0xff]  ;;  %v2203_v46 = vrot.slane %v7936_v41, 1 }
 0x141   : > { %762 = vrot.lane.b32.xlu1 %v7482_v63, %s6834_s14  ;;  %v1404_v22 = vsel %vm870_vm5, %v1372_v8, %v1296_v40  ;;  %v7901_v63 = vld [vmem:[#allocation2 + $0xc8] sm:$0xff] }
 0x142   : > { %2269 = vrot.lane.b32.xlu0 %v2196_v29, %s6833_s9  ;;  %v2198_v43 = vrot.slane %v7901_v63, 1  ;;  %v2374_v39 = vrot.slane %v7901_v63, 2 }
 0x143   : > { %v1294_v11 = vpop.permute.xlu1 %1293 }
 0x144   : > { %v1403_v50 = vsel %vm870_vm5, %v1371_v59, %v1294_v11  ;;  %v1124_v7 = vpop.permute.xlu0 %1123  ;;  %v2201_v2 = vsel %vm484_vm2, %v2198_v43, %v2200_v1  ;;  %v2377_v52 = vsel %vm661_vm3, %v2374_v39, %v2376_v0  ;;  %v2375_v57 = vsel %vm661_vm3, %v2373_v32, %v2374_v39  ;;  %v7979_v39 = vld [vmem:[#allocation2 + $0xc0] sm:$0xff]  ;;  %v10277_v32 = vld [vmem:[#allocation20_spill] sm:$0xff] }
 0x145   : > { %2267 = vrot.lane.b32.xlu1 %v2194_v14, %s6833_s9  ;;  %6473 = vmatprep.mubr.msk.f32.mxu0 %vm1420_vm6, %v1403_v50  ;;  %v1374_v34 = vsel %vm266_vm0, %v7543_v37, %v1124_v7  ;;  %v2205_v59 = vrot.slane %v2094_v15, 1  ;;  %v2202_v11 = vrot.slane %v7946_v9, 1  ;;  %v2381_v7 = vrot.slane %v2094_v15, 2  ;;  %v10278_v15 = vld [vmem:[#allocation22_spill] sm:$0xff] }
 0x146   : > { %6474 = vmatmul.mubr.msk.f32.gmra.mxu0 %vm1420_vm6, %v1404_v22  ;;  %2445 = vrot.lane.b32.xlu0 %v2372_v19, %s6834_s14  ;;  %v702_v0 = vrot.slane %v7979_v39, 2 }
 0x147   : > { %v1122_v16 = vpop.permute.xlu1 %1121  ;;  %v2206_v61 = vsel %vm484_vm2, %v2203_v46, %v2205_v59  ;;  %v2382_v1 = vsel %vm661_vm3, %v2379_v54, %v2381_v7  ;;  %v6785_v7 = vld [vmem:[#allocation2 + $0xe8] sm:$0x3] }
 0x148   : > { %v1300_v27 = vpop.permute.xlu0 %1299  ;;  %v1373_v35 = vsel %vm266_vm0, %v7547_v18, %v1122_v16  ;;  %v2199_v18 = vsel %vm484_vm2, %v2197_v51, %v2198_v43  ;;  %v2378_v16 = vrot.slane %v7946_v9, 2 }
 0x149   : > { %2443 = vrot.lane.b32.xlu1 %v2370_v6, %s6834_s14  ;;  %v1406_v31 = vsel %vm870_vm5, %v1374_v34, %v1300_v27  ;;  %v2204_v6 = vsel %vm484_vm2, %v2202_v11, %v2203_v46  ;;  %v7970_v27 = vld [vmem:[#allocation2 + $0xc8] sm:$0xff]  ;;  %v10279_v11 = vld [vmem:[#allocation26_spill] sm:$0xff] }
 0x14a   : > { %768 = vrot.lane.b32.xlu0 %v696_v36, %s6834_s14  ;;  %v703_v51 = vrot.slane %v7970_v27, 2 }
 0x14b   : > { %v1298_v20 = vpop.permute.xlu1 %1297 }
 0x14c   : > { %v1405_v37 = vsel %vm870_vm5, %v1373_v35, %v1298_v20  ;;  %v1128_v47 = vpop.permute.xlu0 %1127  ;;  %v6782_v35 = vld [vmem:[#allocation2 + $0xd0] sm:$0x3] }
 0x14d   : > { %766 = vrot.lane.b32.xlu1 %v7500_v12, %s6834_s14  ;;  %6476 = vmatprep.mubr.msk.f32.mxu0 %vm1420_vm6, %v1405_v37  ;;  %v1376_v4 = vsel %vm266_vm0, %v7565_v24, %v1128_v47  ;;  %v698_v12 = vrot.slane %v7932_v58, 2  ;;  %v697_v24 = vrot.slane %v7939_v17, 2  ;;  %v2097_v37 = vld [vmem:[#allocation2 + $0x100] sm:$0x3] }
 0x14e   : > { %6477 = vmatmul.mubr.msk.f32.gmra.mxu0 %vm1420_vm6, %v1406_v31  ;;  %2273 = vrot.lane.b32.xlu0 %v2201_v2, %s6833_s9  ;;  %v705_v31 = vrot.slane %v6782_v35, 2  ;;  %v2380_v2 = vsel %vm661_vm3, %v2378_v16, %v2379_v54  ;;  %v8012_v16 = vld [vmem:[#allocation2 + $0x110] sm:$0xff] }
 0x14f   : > { %v1126_v53 = vpop.permute.xlu1 %1125  ;;  %v701_v14 = vsel %vm661_vm3, %v698_v12, %v700_v30  ;;  %v704_v30 = vsel %vm661_vm3, %v702_v0, %v703_v51  ;;  %v8027_v0 = vrot.slane %v8012_v16, 1 }
 0x150   : > { %v1304_v5 = vpop.permute.xlu0 %1303  ;;  %v1375_v8 = vsel %vm266_vm0, %v7572_v49, %v1126_v53  ;;  %v699_v49 = vsel %vm661_vm3, %v697_v24, %v698_v12  ;;  %v2210_v12 = vrot.slane %v2097_v37, 1 }
 0x151   : > { %2271 = vrot.lane.b32.xlu1 %v2199_v18, %s6833_s9  ;;  %v1408_v29 = vsel %vm870_vm5, %v1376_v4, %v1304_v5  ;;  %v7983_v18 = vld [vmem:[#allocation2 + $0xf0] sm:$0xff]  ;;  %v706_v4 = vsel %vm661_vm3, %v703_v51, %v705_v31 }
 0x152   : > { %2449 = vrot.lane.b32.xlu0 %v2377_v52, %s6834_s14  ;;  %v2207_v5 = vrot.slane %v7983_v18, 1 }
 0x153   : > { %v1302_v56 = vpop.permute.xlu1 %1301 }
 0x154   : > { %v1407_v40 = vsel %vm870_vm5, %v1375_v8, %v1302_v56  ;;  %v1132_v22 = vpop.permute.xlu0 %1131 }
 0x155   : > { %2447 = vrot.lane.b32.xlu1 %v2375_v57, %s6834_s14  ;;  %6479 = vmatprep.mubr.msk.f32.mxu0 %vm1420_vm6, %v1407_v40  ;;  %v1378_v19 = vsel %vm266_vm0, %v7589_v62, %v1132_v22  ;;  %v2383_v22 = vrot.slane %v7983_v18, 2 }
 0x156   : > { %6480 = vmatmul.mubr.msk.f32.gmra.mxu0 %vm1420_vm6, %v1408_v29  ;;  %772 = vrot.lane.b32.xlu0 %v701_v14, %s6834_s14  ;;  %v2386_v14 = vrot.slane %v2097_v37, 2 }
 0x157   : > { %v1130_v50 = vpop.permute.xlu1 %1129 }
 0x158   : > { %v1308_v25 = vpop.permute.xlu0 %1307  ;;  %v1377_v34 = vsel %vm266_vm0, %v7596_v44, %v1130_v50  ;;  %v7975_v44 = vld [vmem:[#allocation2 + $0xf8] sm:$0xff] }
 0x159   : > { %770 = vrot.lane.b32.xlu1 %v699_v49, %s6834_s14  ;;  %v1410_v36 = vsel %vm870_vm5, %v1378_v19, %v1308_v25  ;;  %v2208_v52 = vrot.slane %v7975_v44, 1  ;;  %v2384_v40 = vrot.slane %v7975_v44, 2  ;;  %v710_v25 = vrot.slane %v6785_v7, 2  ;;  %v6789_v7 = vld [vmem:[#allocation2] sm:$0xff] }
 0x15a   : > { %2277 = vrot.lane.b32.xlu0 %v2206_v61, %s6833_s9  ;;  %v8008_v61 = vld [vmem:[#allocation2 + $0xe0] sm:$0xff] }
 0x15b   : > { %v1306_v62 = vpop.permute.xlu1 %1305  ;;  %v2211_v56 = vsel %vm484_vm2, %v2208_v52, %v2210_v12  ;;  %v2209_v59 = vsel %vm484_vm2, %v2207_v5, %v2208_v52  ;;  %v2387_v19 = vsel %vm661_vm3, %v2384_v40, %v2386_v14  ;;  %v708_v54 = vrot.slane %v8008_v61, 2 }
 0x15c   : > { %v1409_v43 = vsel %vm870_vm5, %v1377_v34, %v1306_v62  ;;  %v1136_v20 = vpop.permute.xlu0 %1135  ;;  %v2100_v34 = vld [vmem:[#allocation2 + $0x118] sm:$0x3] }
 0x15d   : > { %2275 = vrot.lane.b32.xlu1 %v2204_v6, %s6833_s9  ;;  %6482 = vmatprep.mubr.msk.f32.mxu0 %vm1420_vm6, %v1409_v43  ;;  %v1380_v53 = vsel %vm266_vm0, %v10277_v32, %v1136_v20  ;;  %v8015_v62 = vld [vmem:[#allocation2 + $0xd8] sm:$0xff]  ;;  %v8022_v20 = vld [vmem:[#allocation2 + $0x108] sm:$0xff]  ;;  %v2391_v5 = vrot.slane %v2100_v34, 2 }
 0x15e   : > { %6483 = vmatmul.mubr.msk.f32.gmra.mxu0 %vm1420_vm6, %v1410_v36  ;;  %2453 = vrot.lane.b32.xlu0 %v2382_v1, %s6834_s14  ;;  %v2385_v36 = vsel %vm661_vm3, %v2383_v22, %v2384_v40  ;;  %v707_v43 = vrot.slane %v8015_v62, 2  ;;  %v10280_v1 = vld [vmem:[#allocation28_spill] sm:$0xff]  ;;  %v8058_v22 = vld [vmem:[#allocation2 + $0xf8] sm:$0xff] }
 0x15f   : > { %v1134_v47 = vpop.permute.xlu1 %1133 }
 0x160   : > { %v1312_v3 = vpop.permute.xlu0 %1311  ;;  %v1379_v57 = vsel %vm266_vm0, %v10278_v15, %v1134_v47  ;;  %v2215_v47 = vrot.slane %v2100_v34, 1  ;;  %v6790_v34 = vld [vmem:[#allocation2 + $0x8] sm:$0xff] }
 0x161   : > { %2451 = vrot.lane.b32.xlu1 %v2380_v2, %s6834_s14  ;;  %v1412_v24 = vsel %vm870_vm5, %v1380_v53, %v1312_v3  ;;  %v711_v2 = vsel %vm661_vm3, %v708_v54, %v710_v25  ;;  %v709_v53 = vsel %vm661_vm3, %v707_v43, %v708_v54  ;;  %v10281_v25 = vld [vmem:[#allocation8_spill] sm:$0xff] }
 0x162   : > { %776 = vrot.lane.b32.xlu0 %v706_v4, %s6834_s14  ;;  %v2212_v4 = vrot.slane %v8022_v20, 1  ;;  %v2216_v3 = vsel %vm484_vm2, %v8027_v0, %v2215_v47 }
 0x163   : > { %v1310_v8 = vpop.permute.xlu1 %1309 }
 0x164   : > { %v1411_v29 = vsel %vm870_vm5, %v1379_v57, %v1310_v8  ;;  %v1140_v46 = vpop.permute.xlu0 %1139  ;;  %v8045_v57 = vsel %vm484_vm2, %v2212_v4, %v8027_v0 }
 0x165   : > { %774 = vrot.lane.b32.xlu1 %v704_v30, %s6834_s14  ;;  %6485 = vmatprep.mubr.msk.f32.mxu0 %vm1420_vm6, %v1411_v29  ;;  %v1382_v50 = vsel %vm266_vm0, %v10279_v11, %v1140_v46  ;;  %v8040_v30 = vrot.slane %v8012_v16, 2  ;;  %v8055_v46 = vld [vmem:[#allocation2 + $0xf0] sm:$0xff]  ;;  %v8064_v11 = vld [vmem:[#allocation2 + $0x120] sm:$0xff] }
 0x166   : > { %6486 = vmatmul.mubr.msk.f32.gmra.mxu0 %vm1420_vm6, %v1412_v24  ;;  %2281 = vrot.lane.b32.xlu0 %v2211_v56, %s6833_s9  ;;  %v2388_v24 = vrot.slane %v8022_v20, 2  ;;  %v420_v56 = vld [vmem:[#allocation2 + $0x100] sm:$0x3] }
 0x167   : > { %v1138_v49 = vpop.permute.xlu1 %1137  ;;  %v2392_v14 = vsel %vm661_vm3, %v8040_v30, %v2391_v5  ;;  %v538_v54 = vrot.slane %v420_v56, 1  ;;  %v715_v4 = vrot.slane %v420_v56, 2 }
 0x168   : > { %v1316_v6 = vpop.permute.xlu0 %1315  ;;  %v1381_v51 = vsel %vm266_vm0, %v10280_v1, %v1138_v49  ;;  %v713_v49 = vrot.slane %v8058_v22, 2 }
 0x169   : > { %2279 = vrot.lane.b32.xlu1 %v2209_v59, %s6833_s9  ;;  %v1414_v35 = vsel %vm870_vm5, %v1382_v50, %v1316_v6  ;;  %v712_v59 = vrot.slane %v8055_v46, 2  ;;  %v8066_v50 = vld [vmem:[#allocation2 + $0x128] sm:$0xff]  ;;  %v838_v6 = vsel %vm266_vm0, %v6789_v7, %v10281_v25 }
 0x16a   : > { %2457 = vrot.lane.b32.xlu0 %v2387_v19, %s6834_s14  ;;  %v8071_v19 = vsel %vm661_vm3, %v2388_v24, %v8040_v30  ;;  %v2393_v24 = vrot.slane %v8064_v11, 2 }
 0x16b   : > { %v1314_v31 = vpop.permute.xlu1 %1313 }
 0x16c   : > { %v1413_v37 = vsel %vm870_vm5, %v1381_v51, %v1314_v31  ;;  %v1144_v32 = vpop.permute.xlu0 %1143  ;;  %v2217_v31 = vrot.slane %v8064_v11, 1 }
 0x16d   : > { %2455 = vrot.lane.b32.xlu1 %v2385_v36, %s6834_s14  ;;  %6488 = vmatprep.mubr.msk.f32.mxu0 %vm1420_vm6, %v1413_v37  ;;  %v1384_v12 = vsel %vm266_vm0, %v7661_v60, %v1144_v32  ;;  %v10282_v36 = vld [vmem:[#allocation9_spill] sm:$0xff]  ;;  %v8082_v37 = vrot.slane %v8066_v50, 1  ;;  %v10283_v32 = vld [vmem:[#allocation7_spill] sm:$0xff] }
 0x16e   : > { %6489 = vmatmul.mubr.msk.f32.gmra.mxu0 %vm1420_vm6, %v1414_v35  ;;  %780 = vrot.lane.b32.xlu0 %v711_v2, %s6834_s14  ;;  %v839_v43 = vsel %vm266_vm0, %v6790_v34, %v10282_v36  ;;  %v714_v35 = vsel %vm661_vm3, %v712_v59, %v713_v49  ;;  %v6793_v34 = vld [vmem:[#allocation2 + $0x18] sm:$0xff] }
 0x16f   : > { %v1142_v52 = vpop.permute.xlu1 %1141  ;;  %v10284_v36 = vld [vmem:[#allocation10_spill] sm:$0xff] }
 0x170   : > { %v1320_v15 = vpop.permute.xlu0 %1319  ;;  %v1383_v8 = vsel %vm266_vm0, %v7668_v26, %v1142_v52 }
 0x171   : > { %778 = vrot.lane.b32.xlu1 %v709_v53, %s6834_s14  ;;  %v1416_v60 = vsel %vm870_vm5, %v1384_v12, %v1320_v15  ;;  %v539_v53 = vsel %vm484_vm2, %v10283_v32, %v538_v54  ;;  %v2103_v12 = vld [vmem:[#allocation2 + $0x130] sm:$0x3]  ;;  %v8098_v15 = vsel %vm484_vm2, %v2217_v31, %v8082_v37  ;;  %v10285_v31 = vld [vmem:[#allocation12_spill] sm:$0xff] }
 0x172   : > { %2285 = vrot.lane.b32.xlu0 %v2216_v3, %s6833_s9  ;;  %v8092_v3 = vld [vmem:[#allocation2 + $0x38] sm:$0xff]  ;;  %v2220_v56 = vrot.slane %v2103_v12, 1  ;;  %v2396_v25 = vrot.slane %v2103_v12, 2  ;;  %v8134_v12 = vld [vmem:[#allocation2 + $0x140] sm:$0xff] }
 0x173   : > { %v1318_v29 = vpop.permute.xlu1 %1317 }
 0x174   : > { %v1415_v40 = vsel %vm870_vm5, %v1383_v8, %v1318_v29  ;;  %v745_v26 = vpop.permute.xlu0 %744  ;;  %v8102_v8 = vrot.slane %v8066_v50, 2  ;;  %v716_v29 = vsel %vm661_vm3, %v713_v49, %v715_v4  ;;  %v2221_v49 = vsel %vm484_vm2, %v8082_v37, %v2220_v56 }
 0x175   : > { %2283 = vrot.lane.b32.xlu1 %v8045_v57, %s6833_s9  ;;  %6491 = vmatprep.mubr.msk.f32.mxu0 %vm1420_vm6, %v1415_v40  ;;  %v872_v2 = vsel %vm870_vm5, %v839_v43, %v745_v26  ;;  %v6792_v40 = vld [vmem:[#allocation2 + $0x30] sm:$0xff]  ;;  %v840_v43 = vsel %vm266_vm0, %v6793_v34, %v10284_v36  ;;  %v8142_v56 = vrot.slane %v8134_v12, 1 }
 0x176   : > { %6492 = vmatmul.mubr.msk.f32.gmra.mxu0 %vm1420_vm6, %v1416_v60  ;;  %2461 = vrot.lane.b32.xlu0 %v2392_v14, %s6834_s14  ;;  %v8113_v7 = vsel %vm661_vm3, %v2393_v24, %v8102_v8  ;;  %v2397_v32 = vsel %vm661_vm3, %v8102_v8, %v2396_v25 }
 0x177   : > { %v743_v1 = vpop.permute.xlu1 %742 }
 0x178   : > { %v871_v51 = vsel %vm870_vm5, %v838_v6, %v743_v1  ;;  %v2250_v47 = vpop.permute.xlu0 %2249 }
 0x179   : > { %2459 = vrot.lane.b32.xlu1 %v8071_v19, %s6834_s14  ;;  %6498 = vmatprep.mubr.msk.f32.mxu1 %vm1420_vm6, %v871_v51  ;;  %v2520_v5 = vsel %vm266_vm0, %v8092_v3, %v2250_v47  ;;  %v423_v51 = vld [vmem:[#allocation2 + $0x118] sm:$0x3] }
 0x17a   : > { %6499 = vmatmul.mubr.msk.f32.vlgmr.msra.gmra.mxu1 %vm1420_vm6, %v872_v2  ;;  %782 = vrot.lane.b32.xlu0 %v714_v35, %s6834_s14  ;;  %v6794_v35 = vld [vmem:[#allocation2 + $0x20] sm:$0xff] }
 0x17b   : > { %v2248_v52 = vpop.permute.xlu1 %2247  ;;  %v841_v2 = vsel %vm266_vm0, %v6794_v35, %v10285_v31  ;;  %v10287_v35 = vld [vmem:[#allocation14_spill] sm:$0xff] }
 0x17c   : > { %v2426_v60 = vpop.permute.xlu0 %2425  ;;  %v2519_v14 = vsel %vm266_vm0, %v6792_v40, %v2248_v52  ;;  %v8132_v52 = vld [vmem:[#allocation2 + $0x138] sm:$0xff]  ;;  %v843_v31 = vsel %vm266_vm0, %v8092_v3, %v10287_v35  ;;  %v2109_v35 = vld [vmem:[#allocation2 + $0x160] sm:$0x3] }
 0x17d   : > { %607 = vrot.lane.b32.xlu1 %v539_v53, %s6833_s9  ;;  %v2552_v59 = vsel %vm870_vm5, %v2520_v5, %v2426_v60  ;;  %v543_v5 = vrot.slane %v423_v51, 1 }
 0x17e   : > { %2287 = vrot.lane.b32.xlu0 %v8098_v15, %s6833_s9 }
 0x17f   : > { %v2424_v26 = vpop.permute.xlu1 %2423 }
 0x180   : > { %v2551_v54 = vsel %vm870_vm5, %v2519_v14, %v2424_v26  ;;  %v749_v6 = vpop.permute.xlu0 %748  ;;  %v720_v26 = vrot.slane %v423_v51, 2 }
 0x181   : > { %784 = vrot.lane.b32.xlu1 %v716_v29, %s6834_s14  ;;  %6550 = vmatprep.mubr.msk.f32.mxu0 %vm1420_vm6, %v2551_v54  ;;  %v874_v53 = vsel %vm870_vm5, %v841_v2, %v749_v6  ;;  %v2222_v29 = vrot.slane %v8132_v52, 1  ;;  %v2106_v6 = vld [vmem:[#allocation2 + $0x148] sm:$0x3] }
 0x182   : > { %6551 = vmatmul.mubr.msk.f32.vlgmr.msra.gmra.mxu0 %vm1420_vm6, %v2552_v59  ;;  %2463 = vrot.lane.b32.xlu0 %v8113_v7, %s6834_s14  ;;  %v544_v59 = vsel %vm484_vm2, %v8027_v0, %v543_v5  ;;  %v8160_v0 = vrot.slane %v8134_v12, 2 }
 0x183   : > { %v747_v1 = vpop.permute.xlu1 %746  ;;  %v8156_v34 = vsel %vm484_vm2, %v2222_v29, %v8142_v56  ;;  %v8192_v29 = vld [vmem:[#allocation2 + $0x150] sm:$0xff] }
 0x184   : > { %v873_v47 = vsel %vm870_vm5, %v840_v43, %v747_v1  ;;  %v2254_v4 = vpop.permute.xlu0 %2253  ;;  %v10286_v43 = vld [vmem:[#allocation11_spill] sm:$0xff] }
 0x185   : > { %2289 = vrot.lane.b32.xlu1 %v2221_v49, %s6833_s9  ;;  %6501 = vmatprep.mubr.msk.f32.mxu1 %vm1420_vm6, %v873_v47  ;;  %v2522_v60 = vsel %vm266_vm0, %v7735_v38, %v2254_v4  ;;  %v842_v1 = vsel %vm266_vm0, %v6792_v40, %v10286_v43  ;;  %v426_v4 = vld [vmem:[#allocation2 + $0x130] sm:$0x3] }
 0x186   : > { %6502 = vmatmul.mubr.msk.f32.gmra.mxu1 %vm1420_vm6, %v874_v53  ;;  %2465 = vrot.lane.b32.xlu0 %v2397_v32, %s6834_s14  ;;  %v2401_v32 = vrot.slane %v2106_v6, 2  ;;  %v6796_v43 = vld [vmem:[#allocation2 + $0x50] sm:$0xff] }
 0x187   : > { %v2252_v24 = vpop.permute.xlu1 %2251 }
 0x188   : > { %v2430_v14 = vpop.permute.xlu0 %2429  ;;  %v2521_v54 = vsel %vm266_vm0, %v7741_v23, %v2252_v24  ;;  %v721_v23 = vsel %vm661_vm3, %v8040_v30, %v720_v26  ;;  %v2402_v24 = vsel %vm661_vm3, %v8160_v0, %v2401_v32 }
 0x189   : > { %609 = vrot.lane.b32.xlu1 %v8045_v57, %s6833_s9  ;;  %v2554_v25 = vsel %vm870_vm5, %v2522_v60, %v2430_v14  ;;  %v2398_v57 = vrot.slane %v8132_v52, 2  ;;  %v8194_v14 = vld [vmem:[#allocation2 + $0x158] sm:$0xff] }
 0x18a   : > { %786 = vrot.lane.b32.xlu0 %v8071_v19, %s6834_s14  ;;  %v2225_v19 = vrot.slane %v2106_v6, 1  ;;  %v8203_v6 = vrot.slane %v8194_v14, 1  ;;  %v8224_v32 = vrot.slane %v8194_v14, 2 }
 0x18b   : > { %v2428_v38 = vpop.permute.xlu1 %2427  ;;  %v8177_v47 = vsel %vm661_vm3, %v2398_v57, %v8160_v0  ;;  %v725_v57 = vrot.slane %v426_v4, 2 }
 0x18c   : > { %v2553_v49 = vsel %vm870_vm5, %v2521_v54, %v2428_v38  ;;  %v753_v36 = vpop.permute.xlu0 %752  ;;  %v2226_v40 = vsel %vm484_vm2, %v8142_v56, %v2225_v19  ;;  %v2227_v38 = vrot.slane %v8192_v29, 1 }
 0x18d   : > { %611 = vrot.lane.b32.xlu1 %v544_v59, %s6833_s9  ;;  %6553 = vmatprep.mubr.msk.f32.mxu0 %vm1420_vm6, %v2553_v49  ;;  %v876_v30 = vsel %vm870_vm5, %v843_v31, %v753_v36  ;;  %v548_v59 = vrot.slane %v426_v4, 1  ;;  %v6795_v36 = vld [vmem:[#allocation2 + $0x48] sm:$0xff] }
 0x18e   : > { %6554 = vmatmul.mubr.msk.f32.gmra.mxu0 %vm1420_vm6, %v2554_v25  ;;  %2291 = vrot.lane.b32.xlu0 %v8156_v34, %s6833_s9 }
 0x18f   : > { %v751_v51 = vpop.permute.xlu1 %750 }
 0x190   : > { %v875_v2 = vsel %vm870_vm5, %v842_v1, %v751_v51  ;;  %v2258_v53 = vpop.permute.xlu0 %2257  ;;  %v10289_v1 = vld [vmem:[#allocation16_spill] sm:$0xff] }
 0x191   : > { %788 = vrot.lane.b32.xlu1 %v721_v23, %s6834_s14  ;;  %6504 = vmatprep.mubr.msk.f32.mxu1 %vm1420_vm6, %v875_v2  ;;  %v2524_v5 = vsel %vm266_vm0, %v7768_v13, %v2258_v53  ;;  %v10288_v23 = vld [vmem:[#allocation13_spill] sm:$0xff]  ;;  %v845_v51 = vsel %vm266_vm0, %v6796_v43, %v10289_v1  ;;  %v8220_v2 = vsel %vm484_vm2, %v2227_v38, %v8203_v6  ;;  %v6798_v43 = vld [vmem:[#allocation2 + $0x68] sm:$0xff]  ;;  %v10291_v1 = vld [vmem:[#allocation18_spill] sm:$0xff] }
 0x192   : > { %6505 = vmatmul.mubr.msk.f32.gmra.mxu1 %vm1420_vm6, %v876_v30  ;;  %2467 = vrot.lane.b32.xlu0 %v8177_v47, %s6834_s14  ;;  %v844_v19 = vsel %vm266_vm0, %v6795_v36, %v10288_v23  ;;  %v10290_v36 = vld [vmem:[#allocation15_spill] sm:$0xff] }
 0x193   : > { %v2256_v3 = vpop.permute.xlu1 %2255 }
 0x194   : > { %v2434_v60 = vpop.permute.xlu0 %2433  ;;  %v2523_v26 = vsel %vm266_vm0, %v7773_v21, %v2256_v3  ;;  %v549_v21 = vsel %vm484_vm2, %v8082_v37, %v548_v59  ;;  %v2403_v37 = vrot.slane %v8192_v29, 2 }
 0x195   : > { %2293 = vrot.lane.b32.xlu1 %v2226_v40, %s6833_s9  ;;  %v2556_v54 = vsel %vm870_vm5, %v2524_v5, %v2434_v60  ;;  %v2230_v40 = vrot.slane %v2109_v35, 1 }
 0x196   : > { %2469 = vrot.lane.b32.xlu0 %v2402_v24, %s6834_s14  ;;  %v8238_v5 = vsel %vm661_vm3, %v2403_v37, %v8224_v32  ;;  %v2406_v24 = vrot.slane %v2109_v35, 2 }
 0x197   : > { %v2432_v25 = vpop.permute.xlu1 %2431  ;;  %v2231_v59 = vsel %vm484_vm2, %v8203_v6, %v2230_v40 }
 0x198   : > { %v2555_v13 = vsel %vm870_vm5, %v2523_v26, %v2432_v25  ;;  %v757_v49 = vpop.permute.xlu0 %756 }
 0x199   : > { %613 = vrot.lane.b32.xlu1 %v8098_v15, %s6833_s9  ;;  %6556 = vmatprep.mubr.msk.f32.mxu0 %vm1420_vm6, %v2555_v13  ;;  %v878_v30 = vsel %vm870_vm5, %v845_v51, %v757_v49  ;;  %v2407_v13 = vsel %vm661_vm3, %v8224_v32, %v2406_v24  ;;  %v8253_v49 = vld [vmem:[#allocation2 + $0x168] sm:$0xff]  ;;  %v847_v51 = vsel %vm266_vm0, %v6798_v43, %v10291_v1 }
 0x19a   : > { %6557 = vmatmul.mubr.msk.f32.gmra.mxu0 %vm1420_vm6, %v2556_v54  ;;  %790 = vrot.lane.b32.xlu0 %v8113_v7, %s6834_s14  ;;  %v726_v7 = vsel %vm661_vm3, %v8102_v8, %v725_v57  ;;  %v429_v54 = vld [vmem:[#allocation2 + $0x148] sm:$0x3]  ;;  %v6797_v57 = vld [vmem:[#allocation2 + $0x60] sm:$0xff]  ;;  %v2232_v35 = vrot.slane %v8253_v49, 1 }
 0x19b   : > { %v755_v15 = vpop.permute.xlu1 %754  ;;  %v846_v23 = vsel %vm266_vm0, %v6797_v57, %v10290_v36  ;;  %v432_v36 = vld [vmem:[#allocation2 + $0x160] sm:$0x3] }
 0x19c   : > { %v877_v31 = vsel %vm870_vm5, %v844_v19, %v755_v15  ;;  %v2262_v53 = vpop.permute.xlu0 %2261 }
 0x19d   : > { %615 = vrot.lane.b32.xlu1 %v549_v21, %s6833_s9  ;;  %6507 = vmatprep.mubr.msk.f32.mxu1 %vm1420_vm6, %v877_v31  ;;  %v2526_v4 = vsel %vm266_vm0, %v7800_v33, %v2262_v53  ;;  %v553_v21 = vrot.slane %v429_v54, 1 }
 0x19e   : > { %6508 = vmatmul.mubr.msk.f32.gmra.mxu1 %vm1420_vm6, %v878_v30  ;;  %2295 = vrot.lane.b32.xlu0 %v8220_v2, %s6833_s9 }
 0x19f   : > { %v2260_v3 = vpop.permute.xlu1 %2259  ;;  %v554_v53 = vsel %vm484_vm2, %v8142_v56, %v553_v21 }
 0x1a0   : > { %v2438_v60 = vpop.permute.xlu0 %2437  ;;  %v2525_v8 = vsel %vm266_vm0, %v7807_v48, %v2260_v3  ;;  %v8255_v48 = vld [vmem:[#allocation2 + $0x170] sm:$0xff]  ;;  %v2112_v3 = vld [vmem:[#allocation2 + $0x178] sm:$0x3] }
 0x1a1   : > { %792 = vrot.lane.b32.xlu1 %v726_v7, %s6834_s14  ;;  %v2558_v26 = vsel %vm870_vm5, %v2526_v4, %v2438_v60  ;;  %v8266_v31 = vrot.slane %v8255_v48, 1  ;;  %v730_v7 = vrot.slane %v429_v54, 2  ;;  %v8285_v60 = vrot.slane %v8255_v48, 2 }
 0x1a2   : > { %2471 = vrot.lane.b32.xlu0 %v8238_v5, %s6834_s14 }
 0x1a3   : > { %v2436_v33 = vpop.permute.xlu1 %2435  ;;  %v8281_v24 = vsel %vm484_vm2, %v2232_v35, %v8266_v31  ;;  %v731_v56 = vsel %vm661_vm3, %v8160_v0, %v730_v7  ;;  %v6799_v0 = vld [vmem:[#allocation2 + $0x78] sm:$0xff] }
 0x1a4   : > { %v2557_v25 = vsel %vm870_vm5, %v2525_v8, %v2436_v33  ;;  %v761_v38 = vpop.permute.xlu0 %760 }
 0x1a5   : > { %2297 = vrot.lane.b32.xlu1 %v2231_v59, %s6833_s9  ;;  %6559 = vmatprep.mubr.msk.f32.mxu0 %vm1420_vm6, %v2557_v25  ;;  %v880_v37 = vsel %vm870_vm5, %v847_v51, %v761_v38  ;;  %v2411_v25 = vrot.slane %v2112_v3, 2  ;;  %v10292_v38 = vld [vmem:[#allocation17_spill] sm:$0xff] }
 0x1a6   : > { %6560 = vmatmul.mubr.msk.f32.gmra.mxu0 %vm1420_vm6, %v2558_v26  ;;  %2473 = vrot.lane.b32.xlu0 %v2407_v13, %s6834_s14  ;;  %v848_v21 = vsel %vm266_vm0, %v6799_v0, %v10292_v38 }
 0x1a7   : > { %v759_v19 = vpop.permute.xlu1 %758  ;;  %v2412_v51 = vsel %vm661_vm3, %v8285_v60, %v2411_v25 }
 0x1a8   : > { %v879_v15 = vsel %vm870_vm5, %v846_v23, %v759_v19  ;;  %v2266_v30 = vpop.permute.xlu0 %2265  ;;  %v6800_v23 = vld [vmem:[#allocation2 + $0x80] sm:$0xff]  ;;  %v10293_v19 = vld [vmem:[#allocation21_spill] sm:$0xff] }
 0x1a9   : > { %617 = vrot.lane.b32.xlu1 %v8156_v34, %s6833_s9  ;;  %6510 = vmatprep.mubr.msk.f32.mxu1 %vm1420_vm6, %v879_v15  ;;  %v2528_v4 = vsel %vm266_vm0, %v7835_v45, %v2266_v30  ;;  %v2408_v34 = vrot.slane %v8253_v49, 2  ;;  %v849_v43 = vsel %vm266_vm0, %v6800_v23, %v10293_v19  ;;  %v8319_v30 = vld [vmem:[#allocation2 + $0x188] sm:$0xff] }
 0x1aa   : > { %6511 = vmatmul.mubr.msk.f32.gmra.mxu1 %vm1420_vm6, %v880_v37  ;;  %794 = vrot.lane.b32.xlu0 %v8177_v47, %s6834_s14  ;;  %v2235_v47 = vrot.slane %v2112_v3, 1  ;;  %v8317_v37 = vld [vmem:[#allocation2 + $0x180] sm:$0xff]  ;;  %v2414_v25 = vrot.slane %v8319_v30, 2 }
 0x1ab   : > { %v2264_v40 = vpop.permute.xlu1 %2263  ;;  %v8298_v54 = vsel %vm661_vm3, %v2408_v34, %v8285_v60  ;;  %v2237_v3 = vrot.slane %v8317_v37, 1 }
 0x1ac   : > { %v2442_v59 = vpop.permute.xlu0 %2441  ;;  %v2527_v8 = vsel %vm266_vm0, %v7840_v55, %v2264_v40  ;;  %v2236_v55 = vsel %vm484_vm2, %v8266_v31, %v2235_v47 }
 0x1ad   : > { %619 = vrot.lane.b32.xlu1 %v554_v53, %s6833_s9  ;;  %v2560_v45 = vsel %vm870_vm5, %v2528_v4, %v2442_v59  ;;  %v558_v53 = vrot.slane %v432_v36, 1  ;;  %v2238_v4 = vrot.slane %v8319_v30, 1 }
 0x1ae   : > { %2299 = vrot.lane.b32.xlu0 %v8281_v24, %s6833_s9 }
 0x1af   : > { %v2440_v26 = vpop.permute.xlu1 %2439  ;;  %v559_v59 = vsel %vm484_vm2, %v8203_v6, %v558_v53 }
 0x1b0   : > { %v2559_v33 = vsel %vm870_vm5, %v2527_v8, %v2440_v26  ;;  %v765_v13 = vpop.permute.xlu0 %764 }
 0x1b1   : > { %796 = vrot.lane.b32.xlu1 %v731_v56, %s6834_s14  ;;  %6562 = vmatprep.mubr.msk.f32.mxu0 %vm1420_vm6, %v2559_v33  ;;  %v882_v15 = vsel %vm870_vm5, %v849_v43, %v765_v13  ;;  %v735_v56 = vrot.slane %v432_v36, 2  ;;  %v2239_v33 = vsel %vm484_vm2, %v2237_v3, %v2238_v4  ;;  %v6801_v13 = vld [vmem:[#allocation2 + $0x90] sm:$0xff]  ;;  %v8362_v3 = vld [vmem:[#allocation2 + $0x198] sm:$0xff] }
 0x1b2   : > { %6563 = vmatmul.mubr.msk.f32.gmra.mxu0 %vm1420_vm6, %v2560_v45  ;;  %2475 = vrot.lane.b32.xlu0 %v8298_v54, %s6834_s14  ;;  %v2115_v45 = vld [vmem:[#allocation2 + $0x190] sm:$0x3] }
 0x1b3   : > { %v763_v57 = vpop.permute.xlu1 %762  ;;  %v2416_v43 = vrot.slane %v2115_v45, 2 }
 0x1b4   : > { %v881_v1 = vsel %vm870_vm5, %v848_v21, %v763_v57  ;;  %v2270_v35 = vpop.permute.xlu0 %2269  ;;  %v6802_v21 = vld [vmem:[#allocation2 + $0x98] sm:$0xff]  ;;  %v10295_v57 = vld [vmem:[#allocation24_spill] sm:$0xff] }
 0x1b5   : > { %2301 = vrot.lane.b32.xlu1 %v2236_v55, %s6833_s9  ;;  %6513 = vmatprep.mubr.msk.f32.mxu1 %vm1420_vm6, %v881_v1  ;;  %v2530_v40 = vsel %vm266_vm0, %v7867_v42, %v2270_v35  ;;  %v10294_v55 = vld [vmem:[#allocation19_spill] sm:$0xff]  ;;  %v851_v36 = vsel %vm266_vm0, %v6802_v21, %v10295_v57  ;;  %v435_v35 = vld [vmem:[#allocation2 + $0x178] sm:$0x3] }
 0x1b6   : > { %6514 = vmatmul.mubr.msk.f32.gmra.mxu1 %vm1420_vm6, %v882_v15  ;;  %2477 = vrot.lane.b32.xlu0 %v2412_v51, %s6834_s14  ;;  %v850_v0 = vsel %vm266_vm0, %v6801_v13, %v10294_v55 }
 0x1b7   : > { %v2268_v7 = vpop.permute.xlu1 %2267 }
 0x1b8   : > { %v2446_v34 = vpop.permute.xlu0 %2445  ;;  %v2529_v47 = vsel %vm266_vm0, %v7874_v10, %v2268_v7  ;;  %v736_v10 = vsel %vm661_vm3, %v8224_v32, %v735_v56  ;;  %v2417_v7 = vsel %vm661_vm3, %v2414_v25, %v2416_v43 }
 0x1b9   : > { %621 = vrot.lane.b32.xlu1 %v8220_v2, %s6833_s9  ;;  %v2562_v8 = vsel %vm870_vm5, %v2530_v40, %v2446_v34  ;;  %v2413_v2 = vrot.slane %v8317_v37, 2  ;;  %v8364_v34 = vld [vmem:[#allocation2 + $0x1a0] sm:$0xff] }
 0x1ba   : > { %798 = vrot.lane.b32.xlu0 %v8238_v5, %s6834_s14  ;;  %v2240_v5 = vrot.slane %v2115_v45, 1  ;;  %v2419_v55 = vrot.slane %v8364_v34, 2 }
 0x1bb   : > { %v2444_v42 = vpop.permute.xlu1 %2443  ;;  %v2415_v19 = vsel %vm661_vm3, %v2413_v2, %v2414_v25  ;;  %v10297_v25 = vld [vmem:[#allocation27_spill] sm:$0xff] }
 0x1bc   : > { %v2561_v26 = vsel %vm870_vm5, %v2529_v47, %v2444_v42  ;;  %v769_v6 = vpop.permute.xlu0 %768  ;;  %v2241_v51 = vsel %vm484_vm2, %v2238_v4, %v2240_v5  ;;  %v2243_v42 = vrot.slane %v8364_v34, 1 }
 0x1bd   : > { %623 = vrot.lane.b32.xlu1 %v559_v59, %s6833_s9  ;;  %6565 = vmatprep.mubr.msk.f32.mxu0 %vm1420_vm6, %v2561_v26  ;;  %v884_v1 = vsel %vm870_vm5, %v851_v36, %v769_v6  ;;  %v563_v59 = vrot.slane %v435_v35, 1  ;;  %v740_v26 = vrot.slane %v435_v35, 2  ;;  %v853_v6 = vsel %vm266_vm0, %v7932_v58, %v10297_v25 }
 0x1be   : > { %6566 = vmatmul.mubr.msk.f32.gmra.mxu0 %vm1420_vm6, %v2562_v8  ;;  %2303 = vrot.lane.b32.xlu0 %v2239_v33, %s6833_s9  ;;  %v2242_v8 = vrot.slane %v8362_v3, 1  ;;  %v10296_v33 = vld [vmem:[#allocation23_spill] sm:$0xff] }
 0x1bf   : > { %v767_v38 = vpop.permute.xlu1 %766  ;;  %v852_v2 = vsel %vm266_vm0, %v7939_v17, %v10296_v33  ;;  %v741_v58 = vsel %vm661_vm3, %v8285_v60, %v740_v26  ;;  %v10300_v26 = vld [vmem:[#allocation29_spill] sm:$0xff] }
 0x1c0   : > { %v883_v23 = vsel %vm870_vm5, %v850_v0, %v767_v38  ;;  %v2274_v32 = vpop.permute.xlu0 %2273  ;;  %v2244_v13 = vsel %vm484_vm2, %v2242_v8, %v2243_v42 }
 0x1c1   : > { %800 = vrot.lane.b32.xlu1 %v736_v10, %s6834_s14  ;;  %6516 = vmatprep.mubr.msk.f32.mxu1 %vm1420_vm6, %v883_v23  ;;  %v2532_v53 = vsel %vm266_vm0, %v7901_v63, %v2274_v32  ;;  %v2118_v10 = vld [vmem:[#allocation2 + $0x1a8] sm:$0x3] }
 0x1c2   : > { %6517 = vmatmul.mubr.msk.f32.gmra.mxu1 %vm1420_vm6, %v884_v1  ;;  %2479 = vrot.lane.b32.xlu0 %v2415_v19, %s6834_s14  ;;  %v2421_v19 = vrot.slane %v2118_v10, 2 }
 0x1c3   : > { %v2272_v15 = vpop.permute.xlu1 %2271 }
 0x1c4   : > { %v2450_v40 = vpop.permute.xlu0 %2449  ;;  %v2531_v4 = vsel %vm266_vm0, %v7906_v28, %v2272_v15  ;;  %v564_v28 = vsel %vm484_vm2, %v8266_v31, %v563_v59  ;;  %v2418_v31 = vrot.slane %v8362_v3, 2  ;;  %v10298_v15 = vld [vmem:[#allocation25_spill] sm:$0xff] }
 0x1c5   : > { %2305 = vrot.lane.b32.xlu1 %v2241_v51, %s6833_s9  ;;  %v2564_v56 = vsel %vm870_vm5, %v2532_v53, %v2450_v40  ;;  %v10299_v53 = vld [vmem:[#allocation30_spill] sm:$0xff] }
 0x1c6   : > { %2481 = vrot.lane.b32.xlu0 %v2417_v7, %s6834_s14  ;;  %v2420_v57 = vsel %vm661_vm3, %v2418_v31, %v2419_v55  ;;  %v855_v7 = vsel %vm266_vm0, %v7970_v27, %v10299_v53 }
 0x1c7   : > { %v2448_v47 = vpop.permute.xlu1 %2447 }
 0x1c8   : > { %v2563_v63 = vsel %vm870_vm5, %v2531_v4, %v2448_v47  ;;  %v773_v45 = vpop.permute.xlu0 %772 }
 0x1c9   : > { %625 = vrot.lane.b32.xlu1 %v8281_v24, %s6833_s9  ;;  %6568 = vmatprep.mubr.msk.f32.mxu0 %vm1420_vm6, %v2563_v63  ;;  %v886_v0 = vsel %vm870_vm5, %v853_v6, %v773_v45 }
 0x1ca   : > { %6569 = vmatmul.mubr.msk.f32.gmra.mxu0 %vm1420_vm6, %v2564_v56  ;;  %802 = vrot.lane.b32.xlu0 %v8298_v54, %s6834_s14  ;;  %v2245_v54 = vrot.slane %v2118_v10, 1 }
 0x1cb   : > { %v771_v24 = vpop.permute.xlu1 %770 }
 0x1cc   : > { %v885_v5 = vsel %vm870_vm5, %v852_v2, %v771_v24  ;;  %v2278_v17 = vpop.permute.xlu0 %2277  ;;  %v2246_v23 = vsel %vm484_vm2, %v2243_v42, %v2245_v54  ;;  %v10301_v2 = vld [vmem:[#allocation32_spill] sm:$0xff]  ;;  %v10302_v54 = vld [vmem:[#allocation31_spill] sm:$0xff] }
 0x1cd   : > { %627 = vrot.lane.b32.xlu1 %v564_v28, %s6833_s9  ;;  %6519 = vmatprep.mubr.msk.f32.mxu1 %vm1420_vm6, %v885_v5  ;;  %v2534_v21 = vsel %vm266_vm0, %v7936_v41, %v2278_v17  ;;  %v2422_v41 = vsel %vm661_vm3, %v2419_v55, %v2421_v19  ;;  %v8430_v28 = vpop.f32.mrf.mxu0 }
 0x1ce   : > { %6520 = vmatmul.mubr.msk.f32.gmra.mxu1 %vm1420_vm6, %v886_v0  ;;  %2307 = vrot.lane.b32.xlu0 %v2244_v13, %s6833_s9 }
 0x1cf   : > { %v2276_v38 = vpop.permute.xlu1 %2275  ;;  %v8442_v10 = vpop.f32.mrf.mxu0 }
 0x1d0   : > { %v2454_v36 = vpop.permute.xlu0 %2453  ;;  %v2533_v43 = vsel %vm266_vm0, %v7946_v9, %v2276_v38  ;;  %v854_v9 = vsel %vm266_vm0, %v7979_v39, %v10298_v15  ;;  %v858_v38 = vsel %vm266_vm0, %v8055_v46, %v10302_v54 }
 0x1d1   : > { %804 = vrot.lane.b32.xlu1 %v741_v58, %s6834_s14  ;;  %v2566_v60 = vsel %vm870_vm5, %v2534_v21, %v2454_v36  ;;  %v8445_v13 = vpop.f32.mrf.mxu0 }
 0x1d2   : > { %2483 = vrot.lane.b32.xlu0 %v2420_v57, %s6834_s14 }
 0x1d3   : > { %v2452_v1 = vpop.permute.xlu1 %2451  ;;  %v8452_v17 = vpop.f32.mrf.mxu0 }
 0x1d4   : > { %v2565_v32 = vsel %vm870_vm5, %v2533_v43, %v2452_v1  ;;  %v777_v51 = vpop.permute.xlu0 %776 }
 0x1d5   : > { %2309 = vrot.lane.b32.xlu1 %v2246_v23, %s6833_s9  ;;  %6571 = vmatprep.mubr.msk.f32.mxu0 %vm1420_vm6, %v2565_v32  ;;  %v888_v59 = vsel %vm870_vm5, %v855_v7, %v777_v51  ;;  %v8459_v57 = vpop.f32.mrf.mxu0 }
 0x1d6   : > { %6572 = vmatmul.mubr.msk.f32.gmra.mxu0 %vm1420_vm6, %v2566_v60 }
 0x1d7   : > { %v775_v35 = vpop.permute.xlu1 %774  ;;  %v8464_v43 = vpop.f32.mrf.mxu0 }
 0x1d8   : > { %v887_v40 = vsel %vm870_vm5, %v854_v9, %v775_v35  ;;  %v2282_v4 = vpop.permute.xlu0 %2281 }
 0x1d9   : > { %2485 = vrot.lane.b32.xlu1 %v2422_v41, %s6834_s14  ;;  %6522 = vmatprep.mubr.msk.f32.mxu1 %vm1420_vm6, %v887_v40  ;;  %v2536_v39 = vsel %vm266_vm0, %v7975_v44, %v2282_v4  ;;  %v856_v44 = vsel %vm266_vm0, %v8015_v62, %v10300_v26  ;;  %v8470_v32 = vpop.f32.mrf.mxu0 }
 0x1da   : > { %6523 = vmatmul.mubr.msk.f32.gmra.mxu1 %vm1420_vm6, %v888_v59 }
 0x1db   : > { %v2280_v56 = vpop.permute.xlu1 %2279  ;;  %v8476_v35 = vpop.f32.mrf.mxu0 }
 0x1dc   : > { %v2458_v47 = vpop.permute.xlu0 %2457  ;;  %v2535_v63 = vsel %vm266_vm0, %v7983_v18, %v2280_v56  ;;  %v857_v18 = vsel %vm266_vm0, %v8008_v61, %v10301_v2 }
 0x1dd   : > { %v2568_v27 = vsel %vm870_vm5, %v2536_v39, %v2458_v47 }
 0x1de   : > { %v8480_v7 = vpop.f32.mrf.mxu0 }
 0x1df   : > { %v2456_v8 = vpop.permute.xlu1 %2455 }
 0x1e0   : > { %v2567_v42 = vsel %vm870_vm5, %v2535_v63, %v2456_v8  ;;  %v781_v45 = vpop.permute.xlu0 %780  ;;  %v8486_v39 = vpop.f32.mrf.mxu0 }
 0x1e1   : > { %6574 = vmatprep.mubr.msk.f32.mxu0 %vm1420_vm6, %v2567_v42  ;;  %v890_v6 = vsel %vm870_vm5, %v857_v18, %v781_v45 }
 0x1e2   : > { %6575 = vmatmul.mubr.msk.f32.gmra.mxu0 %vm1420_vm6, %v2568_v27 }
 0x1e3   : > { %v779_v33 = vpop.permute.xlu1 %778 }
 0x1e4   : > { %v889_v25 = vsel %vm870_vm5, %v856_v44, %v779_v33  ;;  %v2286_v24 = vpop.permute.xlu0 %2285 }
 0x1e5   : > { %6525 = vmatprep.mubr.msk.f32.mxu1 %vm1420_vm6, %v889_v25  ;;  %v2538_v62 = vsel %vm266_vm0, %v8012_v16, %v2286_v24 }
 0x1e6   : > { %6526 = vmatmul.mubr.msk.f32.gmra.mxu1 %vm1420_vm6, %v890_v6  ;;  %v8490_v27 = vpop.f32.mrf.mxu0 }
 0x1e7   : > { %v2284_v5 = vpop.permute.xlu1 %2283 }
 0x1e8   : > { %v2462_v31 = vpop.permute.xlu0 %2461  ;;  %v2537_v61 = vsel %vm266_vm0, %v8022_v20, %v2284_v5  ;;  %v8496_v44 = vpop.f32.mrf.mxu0 }
 0x1e9   : > { %v2570_v55 = vsel %vm870_vm5, %v2538_v62, %v2462_v31 }
 0x1eb   : > { %v2460_v0 = vpop.permute.xlu1 %2459 }
 0x1ec   : > { %v2569_v58 = vsel %vm870_vm5, %v2537_v61, %v2460_v0  ;;  %v783_v21 = vpop.permute.xlu0 %782 }
 0x1ed   : > { %6577 = vmatprep.mubr.msk.f32.mxu0 %vm1420_vm6, %v2569_v58  ;;  %v891_v36 = vsel %vm870_vm5, %v858_v38, %v783_v21 }
 0x1ee   : > { %6578 = vmatmul.mubr.msk.f32.gmra.mxu0 %vm1420_vm6, %v2570_v55  ;;  %6528 = vmatprep.mubr.msk.f32.mxu1 %vm1420_vm6, %v891_v36  ;;  %v8500_v2 = vpop.f32.mrf.mxu0 }
 0x1ef   : > { %v608_v23 = vpop.permute.xlu1 %607 }
 0x1f0   : > { %v2288_v19 = vpop.permute.xlu0 %2287  ;;  %v859_v60 = vsel %vm266_vm0, %v8058_v22, %v608_v23  ;;  %v8506_v24 = vpop.f32.mrf.mxu0 }
 0x1f1   : > { %v2539_v46 = vsel %vm266_vm0, %v8064_v11, %v2288_v19 }
 0x1f3   : > { %v785_v1 = vpop.permute.xlu1 %784 }
 0x1f4   : > { %v892_v51 = vsel %vm870_vm5, %v859_v60, %v785_v1  ;;  %v2464_v41 = vpop.permute.xlu0 %2463 }
 0x1f5   : > { %6529 = vmatmul.mubr.msk.f32.gmra.mxu1 %vm1420_vm6, %v892_v51  ;;  %v2571_v15 = vsel %vm870_vm5, %v2539_v46, %v2464_v41 }
 0x1f6   : > { %6580 = vmatprep.mubr.msk.f32.mxu0 %vm1420_vm6, %v2571_v15  ;;  %v8510_v31 = vpop.f32.mrf.mxu0 }
 0x1f7   : > { %v2290_v9 = vpop.permute.xlu1 %2289 }
 0x1f8   : > { %v2540_v22 = vsel %vm266_vm0, %v8066_v50, %v2290_v9  ;;  %v2466_v53 = vpop.permute.xlu0 %2465  ;;  %v8516_v54 = vpop.f32.mrf.mxu0 }
 0x1f9   : > { %v2572_v40 = vsel %vm870_vm5, %v2540_v22, %v2466_v53 }
 0x1fa   : > { %6581 = vmatmul.mubr.msk.f32.gmra.mxu0 %vm1420_vm6, %v2572_v40 }
 0x1fb   : > { %v610_v59 = vpop.permute.xlu1 %609 }
 0x1fc   : > { %v860_v4 = vsel %vm266_vm0, %v8022_v20, %v610_v59  ;;  %v787_v56 = vpop.permute.xlu0 %786 }
 0x1fd   : > { %v893_v47 = vsel %vm870_vm5, %v860_v4, %v787_v56 }
 0x1fe   : > { %6531 = vmatprep.mubr.msk.f32.mxu1 %vm1420_vm6, %v893_v47  ;;  %v8518_v21 = vpop.f32.mrf.mxu0 }
 0x1ff   : > { %v612_v63 = vpop.permute.xlu1 %611 }
 0x200   : > { %v2292_v8 = vpop.permute.xlu0 %2291  ;;  %v861_v42 = vsel %vm266_vm0, %v8012_v16, %v612_v63  ;;  %v8526_v46 = vpop.f32.mrf.mxu0 }
 0x201   : > { %v2541_v45 = vsel %vm266_vm0, %v8132_v52, %v2292_v8 }
 0x203   : > { %v789_v26 = vpop.permute.xlu1 %788 }
 0x204   : > { %v894_v20 = vsel %vm870_vm5, %v861_v42, %v789_v26  ;;  %v2468_v33 = vpop.permute.xlu0 %2467 }
 0x205   : > { %6532 = vmatmul.mubr.msk.f32.gmra.mxu1 %vm1420_vm6, %v894_v20  ;;  %v2573_v18 = vsel %vm870_vm5, %v2541_v45, %v2468_v33 }
 0x206   : > { %6583 = vmatprep.mubr.msk.f32.mxu0 %vm1420_vm6, %v2573_v18  ;;  %v8530_v41 = vpop.f32.mrf.mxu0 }
 0x207   : > { %v2294_v25 = vpop.permute.xlu1 %2293 }
 0x208   : > { %v2542_v16 = vsel %vm266_vm0, %v8134_v12, %v2294_v25  ;;  %v2470_v6 = vpop.permute.xlu0 %2469  ;;  %v8536_v53 = vpop.f32.mrf.mxu0 }
 0x209   : > { %v2574_v5 = vsel %vm870_vm5, %v2542_v16, %v2470_v6 }
 0x20a   : > { %6584 = vmatmul.mubr.msk.f32.gmra.mxu0 %vm1420_vm6, %v2574_v5 }
 0x20b   : > { %v614_v62 = vpop.permute.xlu1 %613 }
 0x20c   : > { %v862_v61 = vsel %vm266_vm0, %v8064_v11, %v614_v62  ;;  %v791_v55 = vpop.permute.xlu0 %790 }
 0x20d   : > { %v895_v0 = vsel %vm870_vm5, %v862_v61, %v791_v55 }
 0x20e   : > { %6534 = vmatprep.mubr.msk.f32.mxu1 %vm1420_vm6, %v895_v0  ;;  %v8540_v4 = vpop.f32.mrf.mxu0 }
 0x20f   : > { %v616_v58 = vpop.permute.xlu1 %615 }
 0x210   : > { %v2296_v38 = vpop.permute.xlu0 %2295  ;;  %v863_v36 = vsel %vm266_vm0, %v8066_v50, %v616_v58  ;;  %v8544_v8 = vpop.f32.mrf.mxu0 }
 0x211   : > { %v2543_v23 = vsel %vm266_vm0, %v8192_v29, %v2296_v38 }
 0x213   : > { %v793_v19 = vpop.permute.xlu1 %792 }
 0x214   : > { %v896_v11 = vsel %vm870_vm5, %v863_v36, %v793_v19  ;;  %v2472_v60 = vpop.permute.xlu0 %2471 }
 0x215   : > { %6535 = vmatmul.mubr.msk.f32.gmra.mxu1 %vm1420_vm6, %v896_v11  ;;  %v2575_v1 = vsel %vm870_vm5, %v2543_v23, %v2472_v60 }
 0x216   : > { %6586 = vmatprep.mubr.msk.f32.mxu0 %vm1420_vm6, %v2575_v1  ;;  %v8550_v20 = vpop.f32.mrf.mxu0 }
 0x217   : > { %v2298_v51 = vpop.permute.xlu1 %2297 }
 0x218   : > { %v2544_v50 = vsel %vm266_vm0, %v8194_v14, %v2298_v51  ;;  %v2474_v15 = vpop.permute.xlu0 %2473  ;;  %v8556_v16 = vpop.f32.mrf.mxu0 }
 0x219   : > { %v2576_v9 = vsel %vm870_vm5, %v2544_v50, %v2474_v15 }
 0x21a   : > { %6587 = vmatmul.mubr.msk.f32.gmra.mxu0 %vm1420_vm6, %v2576_v9 }
 0x21b   : > { %v618_v22 = vpop.permute.xlu1 %617 }
 0x21c   : > { %v864_v40 = vsel %vm266_vm0, %v8132_v52, %v618_v22  ;;  %v795_v59 = vpop.permute.xlu0 %794 }
 0x21d   : > { %v897_v56 = vsel %vm870_vm5, %v864_v40, %v795_v59 }
 0x21e   : > { %6537 = vmatprep.mubr.msk.f32.mxu1 %vm1420_vm6, %v897_v56  ;;  %v8560_v5 = vpop.f32.mrf.mxu0 }
 0x21f   : > { %v620_v47 = vpop.permute.xlu1 %619 }
 0x220   : > { %v2300_v63 = vpop.permute.xlu0 %2299  ;;  %v865_v42 = vsel %vm266_vm0, %v8134_v12, %v620_v47  ;;  %v8566_v58 = vpop.f32.mrf.mxu0 }
 0x221   : > { %v2545_v45 = vsel %vm266_vm0, %v8253_v49, %v2300_v63 }
 0x223   : > { %v797_v26 = vpop.permute.xlu1 %796 }
 0x224   : > { %v898_v52 = vsel %vm870_vm5, %v865_v42, %v797_v26  ;;  %v2476_v33 = vpop.permute.xlu0 %2475 }
 0x225   : > { %6538 = vmatmul.mubr.msk.f32.gmra.mxu1 %vm1420_vm6, %v898_v52  ;;  %v2577_v18 = vsel %vm870_vm5, %v2545_v45, %v2476_v33 }
 0x226   : > { %6589 = vmatprep.mubr.msk.f32.mxu0 %vm1420_vm6, %v2577_v18  ;;  %v8570_v23 = vpop.f32.mrf.mxu0 }
 0x227   : > { %v2302_v25 = vpop.permute.xlu1 %2301 }
 0x228   : > { %v2546_v12 = vsel %vm266_vm0, %v8255_v48, %v2302_v25  ;;  %v2478_v6 = vpop.permute.xlu0 %2477  ;;  %v8576_v51 = vpop.f32.mrf.mxu0 }
 0x229   : > { %v2578_v62 = vsel %vm870_vm5, %v2546_v12, %v2478_v6  ;;  %v8602_v6 = vld [vmem:[%s10240_s2] ss:$0 sm:$0xff] }
 0x22a   : > { %6590 = vmatmul.mubr.msk.f32.gmra.mxu0 %vm1420_vm6, %v2578_v62 }
 0x22b   : > { %v622_v61 = vpop.permute.xlu1 %621 }
 0x22c   : > { %v866_v55 = vsel %vm266_vm0, %v8192_v29, %v622_v61  ;;  %v799_v0 = vpop.permute.xlu0 %798 }
 0x22d   : > { %v899_v38 = vsel %vm870_vm5, %v866_v55, %v799_v0 }
 0x22e   : > { %6540 = vmatprep.mubr.msk.f32.mxu1 %vm1420_vm6, %v899_v38  ;;  %v8580_v15 = vpop.f32.mrf.mxu0  ;;  %v8609_v38 = vstv %s387_s25 }
 0x22f   : > { %v624_v36 = vpop.permute.xlu1 %623 }
 0x230   : > { %v2304_v19 = vpop.permute.xlu0 %2303  ;;  %v867_v11 = vsel %vm266_vm0, %v8194_v14, %v624_v36 }
 0x231   : > { %v2547_v60 = vsel %vm266_vm0, %v8317_v37, %v2304_v19  ;;  %v8586_v37 = vpop.f32.mrf.mxu0 }
 0x233   : > { %v801_v1 = vpop.permute.xlu1 %800 }
 0x234   : > { %v900_v29 = vsel %vm870_vm5, %v867_v11, %v801_v1  ;;  %v2480_v50 = vpop.permute.xlu0 %2479 }
 0x235   : > { %6541 = vmatmul.mubr.msk.f32.gmra.mxu1 %vm1420_vm6, %v900_v29  ;;  %v2579_v9 = vsel %vm870_vm5, %v2547_v60, %v2480_v50 }
 0x236   : > { %6592 = vmatprep.mubr.msk.f32.mxu0 %vm1420_vm6, %v2579_v9  ;;  %v8590_v47 = vpop.f32.mrf.mxu0 }
 0x237   : > { %v2306_v22 = vpop.permute.xlu1 %2305 }
 0x238   : > { %v2548_v14 = vsel %vm266_vm0, %v8319_v30, %v2306_v22  ;;  %v2482_v40 = vpop.permute.xlu0 %2481  ;;  %v8596_v52 = vpop.f32.mrf.mxu0 }
 0x239   : > { %v2580_v59 = vsel %vm870_vm5, %v2548_v14, %v2482_v40 }
 0x23a   : > { %6593 = vmatmul.mubr.msk.f32.gmra.mxu0 %vm1420_vm6, %v2580_v59  ;;  %v6500_v63 = vpop.f32.mrf.mxu1 }
 0x23b   : > { %v626_v56 = vpop.permute.xlu1 %625  ;;  %v1917_v18 = vadd.f32 %v6500_v63, %v8430_v28  ;;  %v6131_v63 = vld [vmem:[%s10241_s3 + $0x18] sm:$0xf] }
 0x23c   : > { %v868_v42 = vsel %vm266_vm0, %v8253_v49, %v626_v56  ;;  %v803_v45 = vpop.permute.xlu0 %802  ;;  %v1911_v33 = vpop.f32.mrf.mxu1  ;;  %6598 = vmatprep.subr.msk.mxu1 %vm1517_vm4, %v6131_v63 }
 0x23d   : > { %v901_v26 = vsel %vm870_vm5, %v868_v42, %v803_v45  ;;  %v1912_v49 = vadd.f32 %v1911_v33, %v8442_v10  ;;  %6599 = vmatpush3.msk.msra.mxu1 %vm1517_vm4, %v6131_v63 }
 0x23e   : > { %6543 = vmatprep.mubr.msk.f32.mxu1 %vm1420_vm6, %v901_v26 }
 0x23f   : > { %v628_v30 = vpop.permute.xlu1 %627 }
 0x240   : > { %v2308_v25 = vpop.permute.xlu0 %2307  ;;  %v869_v62 = vsel %vm266_vm0, %v8255_v48, %v628_v30 }
 0x241   : > { %v2549_v55 = vsel %vm266_vm0, %v8362_v3, %v2308_v25 }
 0x242   : > { %v6552_v12 = vpop.f32.mrf.mxu0 }
 0x243   : > { %v2911_v61 = vadd.f32 %v6552_v12, %v1917_v18  ;;  %v805_v0 = vpop.permute.xlu1 %804 }
 0x244   : > { %v902_v28 = vsel %vm870_vm5, %v869_v62, %v805_v0  ;;  %v2751_v36 = vpop.f32.mrf.mxu0  ;;  %v2484_v60 = vpop.permute.xlu0 %2483 }
 0x245   : > { %v2950_v19 = vadd.f32 %v8602_v6, %v2911_v61  ;;  %v2910_v11 = vadd.f32 %v2751_v36, %v1912_v49  ;;  %6544 = vmatmul.mubr.msk.f32.gmra.mxu1 %vm1420_vm6, %v902_v28  ;;  %v2581_v10 = vsel %vm870_vm5, %v2549_v55, %v2484_v60 }
 0x246   : > { %6595 = vmatprep.mubr.msk.f32.mxu0 %vm1420_vm6, %v2581_v10  ;;  %v6503_v29 = vpop.f32.mrf.mxu1 }
 0x247   : > { %vm2982_vm7 = vcmp.gt.f32.partialorder %v2950_v19, 0.0  ;;  %v3015_v48 = vmul.f32 %v8609_v38, %v2950_v19  ;;  %v2949_v1 = vadd.f32 %v8602_v6, %v2910_v11  ;;  %v2310_v3 = vpop.permute.xlu1 %2309  ;;  %v1927_v42 = vadd.f32 %v6503_v29, %v8445_v13 }
 0x248   : > { %v2550_v14 = vsel %vm266_vm0, %v8364_v34, %v2310_v3  ;;  %v1921_v59 = vpop.f32.mrf.mxu1  ;;  %v6130_v34 = vld [vmem:[%s10241_s3 + $0x10] sm:$0xff] }
 0x249   : > { %v3047_v50 = vsel %vm2982_vm7, %v2950_v19, %v3015_v48  ;;  %vm2981_vm8 = vcmp.gt.f32.partialorder %v2949_v1, 0.0  ;;  %v3014_v9 = vmul.f32 %v8609_v38, %v2949_v1  ;;  %v1922_v26 = vadd.f32 %v1921_v59, %v8452_v17  ;;  %6600 = vmatprep.subr.mxu1 %v6130_v34 }
 0x24a   : > { %3134 = vst.msk [vmem:[#allocation3 + $0x21] sm:$0xff] %vm266_vm0, %v3047_v50  ;;  %6601 = vmatpush3.msra.mxu1 %v6130_v34 }
 0x24b   : > { %v3046_v22 = vsel %vm2981_vm8, %v2949_v1, %v3014_v9  ;;  %v2486_v40 = vpop.permute.xlu1 %2485 }
 0x24c   : > { %3133 = vst.msk [vmem:[#allocation3 + $0x19] sm:$0xff] %vm266_vm0, %v3046_v22  ;;  %v2582_v56 = vsel %vm870_vm5, %v2550_v14, %v2486_v40 }
 0x24d   : > { %6596 = vmatmul.mubr.msk.f32.gmra.mxu0 %vm1420_vm6, %v2582_v56 }
 0x24e   : > { %v6555_v45 = vpop.f32.mrf.mxu0 }
 0x24f   : > { %v2913_v30 = vadd.f32 %v6555_v45, %v1927_v42 }
 0x250   : > { %v2761_v33 = vpop.f32.mrf.mxu0 }
 0x251   : > { %v2952_v18 = vadd.f32 %v8602_v6, %v2913_v30  ;;  %v2912_v13 = vadd.f32 %v2761_v33, %v1922_v26  ;;  %v3682_v25 = vld [vmem:[#allocation3 + $0x28] sm:$0x3] }
 0x252   : > { %v6506_v55 = vpop.f32.mrf.mxu1  ;;  %v3779_v28 = vrot.slane %v3682_v25, 1  ;;  %v3955_v29 = vrot.slane %v3682_v25, 2 }
 0x253   : > { %vm2984_vm9 = vcmp.gt.f32.partialorder %v2952_v18, 0.0  ;;  %v3017_v12 = vmul.f32 %v8609_v38, %v2952_v18  ;;  %v2951_v49 = vadd.f32 %v8602_v6, %v2912_v13  ;;  %v8638_v62 = vld [vmem:[#allocation3 + $0x18] sm:$0xff]  ;;  %v8640_v61 = vld [vmem:[#allocation3 + $0x20] sm:$0xff]  ;;  %v1937_v50 = vadd.f32 %v6506_v55, %v8459_v57 }
 0x254   : > { %v3776_v17 = vrot.slane %v8638_v62, 1  ;;  %v3777_v0 = vrot.slane %v8640_v61, 1  ;;  %v3952_v10 = vrot.slane %v8638_v62, 2  ;;  %v3953_v48 = vrot.slane %v8640_v61, 2  ;;  %v1931_v3 = vpop.f32.mrf.mxu1 }
 0x255   : > { %v3049_v36 = vsel %vm2984_vm9, %v2952_v18, %v3017_v12  ;;  %vm2983_vm10 = vcmp.gt.f32.partialorder %v2951_v49, 0.0  ;;  %v3016_v19 = vmul.f32 %v8609_v38, %v2951_v49  ;;  %v1932_v40 = vadd.f32 %v1931_v3, %v8464_v43 }
 0x256   : > { %3136 = vst.msk [vmem:[#allocation3 + $0x39] sm:$0xff] %vm266_vm0, %v3049_v36  ;;  %v3778_v11 = vsel %vm484_vm2, %v3776_v17, %v3777_v0  ;;  %v3780_v60 = vsel %vm484_vm2, %v3777_v0, %v3779_v28  ;;  %v3954_v22 = vsel %vm661_vm3, %v3952_v10, %v3953_v48  ;;  %v3956_v14 = vsel %vm661_vm3, %v3953_v48, %v3955_v29 }
 0x257   : > { %v3048_v1 = vsel %vm2983_vm10, %v2951_v49, %v3016_v19  ;;  %3856 = vrot.lane.b32.xlu0 %v3778_v11, %s6833_s9  ;;  %3858 = vrot.lane.b32.xlu1 %v3780_v60, %s6833_s9 }
 0x258   : > { %3135 = vst.msk [vmem:[#allocation3 + $0x31] sm:$0xff] %vm266_vm0, %v3048_v1 }
 0x25a   : > { %v6558_v9 = vpop.f32.mrf.mxu0 }
 0x25b   : > { %v2915_v59 = vadd.f32 %v6558_v9, %v1937_v50  ;;  %4032 = vrot.lane.b32.xlu0 %v3954_v22, %s6834_s14  ;;  %4034 = vrot.lane.b32.xlu1 %v3956_v14, %s6834_s14 }
 0x25c   : > { %v2771_v56 = vpop.f32.mrf.mxu0 }
 0x25d   : > { %v2954_v63 = vadd.f32 %v8602_v6, %v2915_v59  ;;  %v2914_v42 = vadd.f32 %v2771_v56, %v1932_v40  ;;  %v3685_v45 = vld [vmem:[#allocation3 + $0x40] sm:$0x3] }
 0x25e   : > { %v6509_v43 = vpop.f32.mrf.mxu1  ;;  %v3784_v13 = vrot.slane %v3685_v45, 1  ;;  %v3960_v19 = vrot.slane %v3685_v45, 2 }
 0x25f   : > { %vm2986_vm11 = vcmp.gt.f32.partialorder %v2954_v63, 0.0  ;;  %v3019_v57 = vmul.f32 %v8609_v38, %v2954_v63  ;;  %v2953_v34 = vadd.f32 %v8602_v6, %v2914_v42  ;;  %v8662_v26 = vld [vmem:[#allocation3 + $0x30] sm:$0xff]  ;;  %v8664_v30 = vld [vmem:[#allocation3 + $0x38] sm:$0xff]  ;;  %v1947_v11 = vadd.f32 %v6509_v43, %v8470_v32 }
 0x260   : > { %v3781_v33 = vrot.slane %v8662_v26, 1  ;;  %v3782_v18 = vrot.slane %v8664_v30, 1  ;;  %v3957_v17 = vrot.slane %v8662_v26, 2  ;;  %v3958_v0 = vrot.slane %v8664_v30, 2  ;;  %v1941_v36 = vpop.f32.mrf.mxu1 }
 0x261   : > { %v3051_v25 = vsel %vm2986_vm11, %v2954_v63, %v3019_v57  ;;  %vm2985_vm12 = vcmp.gt.f32.partialorder %v2953_v34, 0.0  ;;  %v3018_v12 = vmul.f32 %v8609_v38, %v2953_v34  ;;  %v1942_v1 = vadd.f32 %v1941_v36, %v8476_v35 }
 0x262   : > { %3138 = vst.msk [vmem:[#allocation3 + $0x51] sm:$0xff] %vm266_vm0, %v3051_v25  ;;  %v3783_v49 = vsel %vm484_vm2, %v3781_v33, %v3782_v18  ;;  %v3785_v55 = vsel %vm484_vm2, %v3782_v18, %v3784_v13  ;;  %v3959_v10 = vsel %vm661_vm3, %v3957_v17, %v3958_v0  ;;  %v3961_v48 = vsel %vm661_vm3, %v3958_v0, %v3960_v19 }
 0x263   : > { %v3050_v28 = vsel %vm2985_vm12, %v2953_v34, %v3018_v12  ;;  %3860 = vrot.lane.b32.xlu0 %v3783_v49, %s6833_s9  ;;  %3862 = vrot.lane.b32.xlu1 %v3785_v55, %s6833_s9 }
 0x264   : > { %3137 = vst.msk [vmem:[#allocation3 + $0x49] sm:$0xff] %vm266_vm0, %v3050_v28 }
 0x266   : > { %v6561_v60 = vpop.f32.mrf.mxu0 }
 0x267   : > { %v2917_v3 = vadd.f32 %v6561_v60, %v1947_v11  ;;  %4036 = vrot.lane.b32.xlu0 %v3959_v10, %s6834_s14  ;;  %4038 = vrot.lane.b32.xlu1 %v3961_v48, %s6834_s14 }
 0x268   : > { %v2781_v29 = vpop.f32.mrf.mxu0 }
 0x269   : > { %v2956_v50 = vadd.f32 %v8602_v6, %v2917_v3  ;;  %v2916_v9 = vadd.f32 %v2781_v29, %v1942_v1  ;;  %v3688_v22 = vld [vmem:[#allocation3 + $0x58] sm:$0x3] }
 0x26a   : > { %v6512_v35 = vpop.f32.mrf.mxu1  ;;  %v3789_v42 = vrot.slane %v3688_v22, 1  ;;  %v3965_v12 = vrot.slane %v3688_v22, 2 }
 0x26b   : > { %vm2988_vm13 = vcmp.gt.f32.partialorder %v2956_v50, 0.0  ;;  %v3021_v32 = vmul.f32 %v8609_v38, %v2956_v50  ;;  %v2955_v14 = vadd.f32 %v8602_v6, %v2916_v9  ;;  %v8686_v40 = vld [vmem:[#allocation3 + $0x48] sm:$0xff]  ;;  %v8688_v59 = vld [vmem:[#allocation3 + $0x50] sm:$0xff]  ;;  %v1957_v49 = vadd.f32 %v6512_v35, %v8480_v7 }
 0x26c   : > { %v3786_v56 = vrot.slane %v8686_v40, 1  ;;  %v3787_v63 = vrot.slane %v8688_v59, 1  ;;  %v3962_v33 = vrot.slane %v8686_v40, 2  ;;  %v3963_v18 = vrot.slane %v8688_v59, 2  ;;  %v1951_v25 = vpop.f32.mrf.mxu1 }
 0x26d   : > { %v3053_v45 = vsel %vm2988_vm13, %v2956_v50, %v3021_v32  ;;  %vm2987_vm14 = vcmp.gt.f32.partialorder %v2955_v14, 0.0  ;;  %v3020_v57 = vmul.f32 %v8609_v38, %v2955_v14  ;;  %v1952_v28 = vadd.f32 %v1951_v25, %v8486_v39 }
 0x26e   : > { %3140 = vst.msk [vmem:[#allocation3 + $0x69] sm:$0xff] %vm266_vm0, %v3053_v45  ;;  %v3788_v34 = vsel %vm484_vm2, %v3786_v56, %v3787_v63  ;;  %v3790_v43 = vsel %vm484_vm2, %v3787_v63, %v3789_v42  ;;  %v3964_v17 = vsel %vm661_vm3, %v3962_v33, %v3963_v18  ;;  %v3966_v0 = vsel %vm661_vm3, %v3963_v18, %v3965_v12 }
 0x26f   : > { %v3052_v13 = vsel %vm2987_vm14, %v2955_v14, %v3020_v57  ;;  %3864 = vrot.lane.b32.xlu0 %v3788_v34, %s6833_s9  ;;  %3866 = vrot.lane.b32.xlu1 %v3790_v43, %s6833_s9 }
 0x270   : > { %3139 = vst.msk [vmem:[#allocation3 + $0x61] sm:$0xff] %vm266_vm0, %v3052_v13 }
 0x272   : > { %v6564_v55 = vpop.f32.mrf.mxu0 }
 0x273   : > { %v2919_v36 = vadd.f32 %v6564_v55, %v1957_v49  ;;  %4040 = vrot.lane.b32.xlu0 %v3964_v17, %s6834_s14  ;;  %4042 = vrot.lane.b32.xlu1 %v3966_v0, %s6834_s14 }
 0x274   : > { %v2791_v19 = vpop.f32.mrf.mxu0 }
 0x275   : > { %v2958_v11 = vadd.f32 %v8602_v6, %v2919_v36  ;;  %v2918_v60 = vadd.f32 %v2791_v19, %v1952_v28  ;;  %v3691_v10 = vld [vmem:[#allocation3 + $0x70] sm:$0x3] }
 0x276   : > { %v6515_v39 = vpop.f32.mrf.mxu1  ;;  %v3794_v50 = vrot.slane %v3691_v10, 1  ;;  %v3970_v57 = vrot.slane %v3691_v10, 2 }
 0x277   : > { %vm2990_vm15 = vcmp.gt.f32.partialorder %v2958_v11, 0.0  ;;  %v3023_v7 = vmul.f32 %v8609_v38, %v2958_v11  ;;  %v2957_v48 = vadd.f32 %v8602_v6, %v2918_v60  ;;  %v8710_v1 = vld [vmem:[#allocation3 + $0x68] sm:$0xff]  ;;  %v8712_v3 = vld [vmem:[#allocation3 + $0x60] sm:$0xff]  ;;  %v1967_v34 = vadd.f32 %v6515_v39, %v8490_v27 }
 0x278   : > { %v3792_v29 = vrot.slane %v8710_v1, 1  ;;  %v3791_v9 = vrot.slane %v8712_v3, 1  ;;  %v3967_v56 = vrot.slane %v8712_v3, 2  ;;  %v3968_v63 = vrot.slane %v8710_v1, 2  ;;  %v1961_v45 = vpop.f32.mrf.mxu1 }
 0x279   : > { %v3055_v22 = vsel %vm2990_vm15, %v2958_v11, %v3023_v7  ;;  %vm2989_vm1 = vcmp.gt.f32.partialorder %v2957_v48, 0.0  ;;  %v3022_v32 = vmul.f32 %v8609_v38, %v2957_v48  ;;  %v1962_v13 = vadd.f32 %v1961_v45, %v8496_v44 }
 0x27a   : > { %3142 = vst.msk [vmem:[#allocation3 + $0x81] sm:$0xff] %vm266_vm0, %v3055_v22  ;;  %v3795_v14 = vsel %vm484_vm2, %v3792_v29, %v3794_v50  ;;  %v3793_v35 = vsel %vm484_vm2, %v3791_v9, %v3792_v29  ;;  %v3969_v33 = vsel %vm661_vm3, %v3967_v56, %v3968_v63  ;;  %v3971_v18 = vsel %vm661_vm3, %v3968_v63, %v3970_v57 }
 0x27b   : > { %v3054_v42 = vsel %vm2989_vm1, %v2957_v48, %v3022_v32  ;;  %3870 = vrot.lane.b32.xlu1 %v3795_v14, %s6833_s9  ;;  %3868 = vrot.lane.b32.xlu0 %v3793_v35, %s6833_s9 }
 0x27c   : > { %3141 = vst.msk [vmem:[#allocation3 + $0x79] sm:$0xff] %vm266_vm0, %v3054_v42 }
 0x27e   : > { %v6567_v43 = vpop.f32.mrf.mxu0 }
 0x27f   : > { %v2921_v25 = vadd.f32 %v6567_v43, %v1967_v34  ;;  %4044 = vrot.lane.b32.xlu0 %v3969_v33, %s6834_s14  ;;  %4046 = vrot.lane.b32.xlu1 %v3971_v18, %s6834_s14 }
 0x280   : > { %v2801_v12 = vpop.f32.mrf.mxu0 }
 0x281   : > { %v2960_v49 = vadd.f32 %v8602_v6, %v2921_v25  ;;  %v2920_v55 = vadd.f32 %v2801_v12, %v1962_v13  ;;  %v3694_v17 = vld [vmem:[#allocation3 + $0x88] sm:$0x3] }
 0x282   : > { %v6518_v44 = vpop.f32.mrf.mxu1  ;;  %v3799_v11 = vrot.slane %v3694_v17, 1  ;;  %v3975_v32 = vrot.slane %v3694_v17, 2 }
 0x283   : > { %vm2992_vm7 = vcmp.gt.f32.partialorder %v2960_v49, 0.0  ;;  %v3025_v27 = vmul.f32 %v8609_v38, %v2960_v49  ;;  %v2959_v0 = vadd.f32 %v8602_v6, %v2920_v55  ;;  %v8734_v28 = vld [vmem:[#allocation3 + $0x80] sm:$0xff]  ;;  %v8736_v36 = vld [vmem:[#allocation3 + $0x78] sm:$0xff]  ;;  %v1977_v14 = vadd.f32 %v6518_v44, %v8500_v2 }
 0x284   : > { %v3797_v19 = vrot.slane %v8734_v28, 1  ;;  %v3796_v60 = vrot.slane %v8736_v36, 1  ;;  %v3973_v29 = vrot.slane %v8734_v28, 2  ;;  %v3972_v50 = vrot.slane %v8736_v36, 2  ;;  %v1971_v22 = vpop.f32.mrf.mxu1 }
 0x285   : > { %v3057_v10 = vsel %vm2992_vm7, %v2960_v49, %v3025_v27  ;;  %vm2991_vm8 = vcmp.gt.f32.partialorder %v2959_v0, 0.0  ;;  %v3024_v7 = vmul.f32 %v8609_v38, %v2959_v0  ;;  %v1972_v42 = vadd.f32 %v1971_v22, %v8506_v24 }
 0x286   : > { %3144 = vst.msk [vmem:[#allocation3 + $0x99] sm:$0xff] %vm266_vm0, %v3057_v10  ;;  %v3800_v48 = vsel %vm484_vm2, %v3797_v19, %v3799_v11  ;;  %v3798_v39 = vsel %vm484_vm2, %v3796_v60, %v3797_v19  ;;  %v3976_v56 = vsel %vm661_vm3, %v3973_v29, %v3975_v32  ;;  %v3974_v63 = vsel %vm661_vm3, %v3972_v50, %v3973_v29 }
 0x287   : > { %v3056_v9 = vsel %vm2991_vm8, %v2959_v0, %v3024_v7  ;;  %3874 = vrot.lane.b32.xlu1 %v3800_v48, %s6833_s9  ;;  %3872 = vrot.lane.b32.xlu0 %v3798_v39, %s6833_s9 }
 0x288   : > { %3143 = vst.msk [vmem:[#allocation3 + $0x91] sm:$0xff] %vm266_vm0, %v3056_v9 }
 0x28a   : > { %v6570_v35 = vpop.f32.mrf.mxu0 }
 0x28b   : > { %v2923_v45 = vadd.f32 %v6570_v35, %v1977_v14  ;;  %4050 = vrot.lane.b32.xlu1 %v3976_v56, %s6834_s14  ;;  %4048 = vrot.lane.b32.xlu0 %v3974_v63, %s6834_s14 }
 0x28c   : > { %v2811_v57 = vpop.f32.mrf.mxu0 }
 0x28d   : > { %v2962_v34 = vadd.f32 %v8602_v6, %v2923_v45  ;;  %v2922_v43 = vadd.f32 %v2811_v57, %v1972_v42  ;;  %v3697_v33 = vld [vmem:[#allocation3 + $0xa0] sm:$0x3] }
 0x28e   : > { %v6521_v24 = vpop.f32.mrf.mxu1  ;;  %v3804_v49 = vrot.slane %v3697_v33, 1  ;;  %v3980_v7 = vrot.slane %v3697_v33, 2 }
 0x28f   : > { %vm2994_vm9 = vcmp.gt.f32.partialorder %v2962_v34, 0.0  ;;  %v3027_v2 = vmul.f32 %v8609_v38, %v2962_v34  ;;  %v2961_v18 = vadd.f32 %v8602_v6, %v2922_v43  ;;  %v8758_v13 = vld [vmem:[#allocation3 + $0x98] sm:$0xff]  ;;  %v8760_v25 = vld [vmem:[#allocation3 + $0x90] sm:$0xff]  ;;  %v1987_v48 = vadd.f32 %v6521_v24, %v8510_v31 }
 0x290   : > { %v3802_v12 = vrot.slane %v8758_v13, 1  ;;  %v3801_v55 = vrot.slane %v8760_v25, 1  ;;  %v3978_v19 = vrot.slane %v8758_v13, 2  ;;  %v3977_v11 = vrot.slane %v8760_v25, 2  ;;  %v1981_v10 = vpop.f32.mrf.mxu1 }
 0x291   : > { %v3059_v17 = vsel %vm2994_vm9, %v2962_v34, %v3027_v2  ;;  %vm2993_vm10 = vcmp.gt.f32.partialorder %v2961_v18, 0.0  ;;  %v3026_v27 = vmul.f32 %v8609_v38, %v2961_v18  ;;  %v1982_v9 = vadd.f32 %v1981_v10, %v8516_v54 }
 0x292   : > { %3146 = vst.msk [vmem:[#allocation3 + $0xb1] sm:$0xff] %vm266_vm0, %v3059_v17  ;;  %v3805_v0 = vsel %vm484_vm2, %v3802_v12, %v3804_v49  ;;  %v3803_v44 = vsel %vm484_vm2, %v3801_v55, %v3802_v12  ;;  %v3981_v29 = vsel %vm661_vm3, %v3978_v19, %v3980_v7  ;;  %v3979_v50 = vsel %vm661_vm3, %v3977_v11, %v3978_v19 }
 0x293   : > { %v3058_v60 = vsel %vm2993_vm10, %v2961_v18, %v3026_v27  ;;  %3878 = vrot.lane.b32.xlu1 %v3805_v0, %s6833_s9  ;;  %3876 = vrot.lane.b32.xlu0 %v3803_v44, %s6833_s9 }
 0x294   : > { %3145 = vst.msk [vmem:[#allocation3 + $0xa9] sm:$0xff] %vm266_vm0, %v3058_v60 }
 0x296   : > { %v6573_v39 = vpop.f32.mrf.mxu0 }
 0x297   : > { %v2925_v22 = vadd.f32 %v6573_v39, %v1987_v48  ;;  %4054 = vrot.lane.b32.xlu1 %v3981_v29, %s6834_s14  ;;  %4052 = vrot.lane.b32.xlu0 %v3979_v50, %s6834_s14 }
 0x298   : > { %v2821_v32 = vpop.f32.mrf.mxu0 }
 0x299   : > { %v2964_v14 = vadd.f32 %v8602_v6, %v2925_v22  ;;  %v2924_v35 = vadd.f32 %v2821_v32, %v1982_v9  ;;  %v3700_v56 = vld [vmem:[#allocation3 + $0xb8] sm:$0x3] }
 0x29a   : > { %v6524_v54 = vpop.f32.mrf.mxu1  ;;  %v3809_v34 = vrot.slane %v3700_v56, 1  ;;  %v3985_v27 = vrot.slane %v3700_v56, 2 }
 0x29b   : > { %vm2996_vm11 = vcmp.gt.f32.partialorder %v2964_v14, 0.0  ;;  %v3029_v31 = vmul.f32 %v8609_v38, %v2964_v14  ;;  %v2963_v63 = vadd.f32 %v8602_v6, %v2924_v35  ;;  %v8782_v42 = vld [vmem:[#allocation3 + $0xb0] sm:$0xff]  ;;  %v8784_v45 = vld [vmem:[#allocation3 + $0xa8] sm:$0xff]  ;;  %v1997_v0 = vadd.f32 %v6524_v54, %v8518_v21 }
 0x29c   : > { %v3807_v57 = vrot.slane %v8782_v42, 1  ;;  %v3806_v43 = vrot.slane %v8784_v45, 1  ;;  %v3983_v12 = vrot.slane %v8782_v42, 2  ;;  %v3982_v49 = vrot.slane %v8784_v45, 2  ;;  %v1991_v17 = vpop.f32.mrf.mxu1 }
 0x29d   : > { %v3061_v33 = vsel %vm2996_vm11, %v2964_v14, %v3029_v31  ;;  %vm2995_vm12 = vcmp.gt.f32.partialorder %v2963_v63, 0.0  ;;  %v3028_v2 = vmul.f32 %v8609_v38, %v2963_v63  ;;  %v1992_v60 = vadd.f32 %v1991_v17, %v8526_v46 }
 0x29e   : > { %3148 = vst.msk [vmem:[#allocation3 + $0xc9] sm:$0xff] %vm266_vm0, %v3061_v33  ;;  %v3810_v18 = vsel %vm484_vm2, %v3807_v57, %v3809_v34  ;;  %v3808_v24 = vsel %vm484_vm2, %v3806_v43, %v3807_v57  ;;  %v3986_v19 = vsel %vm661_vm3, %v3983_v12, %v3985_v27  ;;  %v3984_v11 = vsel %vm661_vm3, %v3982_v49, %v3983_v12 }
 0x29f   : > { %v3060_v55 = vsel %vm2995_vm12, %v2963_v63, %v3028_v2  ;;  %3882 = vrot.lane.b32.xlu1 %v3810_v18, %s6833_s9  ;;  %3880 = vrot.lane.b32.xlu0 %v3808_v24, %s6833_s9 }
 0x2a0   : > { %3147 = vst.msk [vmem:[#allocation3 + $0xc1] sm:$0xff] %vm266_vm0, %v3060_v55 }
 0x2a2   : > { %v6576_v44 = vpop.f32.mrf.mxu0 }
 0x2a3   : > { %v2927_v10 = vadd.f32 %v6576_v44, %v1997_v0  ;;  %4058 = vrot.lane.b32.xlu1 %v3986_v19, %s6834_s14  ;;  %4056 = vrot.lane.b32.xlu0 %v3984_v11, %s6834_s14 }
 0x2a4   : > { %v2831_v7 = vpop.f32.mrf.mxu0 }
 0x2a5   : > { %v2966_v48 = vadd.f32 %v8602_v6, %v2927_v10  ;;  %v2926_v39 = vadd.f32 %v2831_v7, %v1992_v60  ;;  %v3703_v29 = vld [vmem:[#allocation3 + $0xd0] sm:$0x3] }
 0x2a6   : > { %v6527_v46 = vpop.f32.mrf.mxu1  ;;  %v3814_v14 = vrot.slane %v3703_v29, 1  ;;  %v3990_v2 = vrot.slane %v3703_v29, 2 }
 0x2a7   : > { %vm2998_vm13 = vcmp.gt.f32.partialorder %v2966_v48, 0.0  ;;  %v3031_v21 = vmul.f32 %v8609_v38, %v2966_v48  ;;  %v2965_v50 = vadd.f32 %v8602_v6, %v2926_v39  ;;  %v8806_v9 = vld [vmem:[#allocation3 + $0xc8] sm:$0xff]  ;;  %v8808_v22 = vld [vmem:[#allocation3 + $0xc0] sm:$0xff]  ;;  %v2007_v18 = vadd.f32 %v6527_v46, %v8530_v41 }
 0x2a8   : > { %v3812_v32 = vrot.slane %v8806_v9, 1  ;;  %v3811_v35 = vrot.slane %v8808_v22, 1  ;;  %v3988_v57 = vrot.slane %v8806_v9, 2  ;;  %v3987_v34 = vrot.slane %v8808_v22, 2  ;;  %v2001_v33 = vpop.f32.mrf.mxu1 }
 0x2a9   : > { %v3063_v56 = vsel %vm2998_vm13, %v2966_v48, %v3031_v21  ;;  %vm2997_vm14 = vcmp.gt.f32.partialorder %v2965_v50, 0.0  ;;  %v3030_v31 = vmul.f32 %v8609_v38, %v2965_v50  ;;  %v2002_v55 = vadd.f32 %v2001_v33, %v8536_v53 }
 0x2aa   : > { %3150 = vst.msk [vmem:[#allocation3 + $0xe1] sm:$0xff] %vm266_vm0, %v3063_v56  ;;  %v3815_v63 = vsel %vm484_vm2, %v3812_v32, %v3814_v14  ;;  %v3813_v54 = vsel %vm484_vm2, %v3811_v35, %v3812_v32  ;;  %v3991_v12 = vsel %vm661_vm3, %v3988_v57, %v3990_v2  ;;  %v3989_v49 = vsel %vm661_vm3, %v3987_v34, %v3988_v57 }
 0x2ab   : > { %v3062_v43 = vsel %vm2997_vm14, %v2965_v50, %v3030_v31  ;;  %3886 = vrot.lane.b32.xlu1 %v3815_v63, %s6833_s9  ;;  %3884 = vrot.lane.b32.xlu0 %v3813_v54, %s6833_s9 }
 0x2ac   : > { %3149 = vst.msk [vmem:[#allocation3 + $0xd9] sm:$0xff] %vm266_vm0, %v3062_v43 }
 0x2ae   : > { %v6579_v24 = vpop.f32.mrf.mxu0 }
 0x2af   : > { %v2929_v17 = vadd.f32 %v6579_v24, %v2007_v18  ;;  %4062 = vrot.lane.b32.xlu1 %v3991_v12, %s6834_s14  ;;  %4060 = vrot.lane.b32.xlu0 %v3989_v49, %s6834_s14 }
 0x2b0   : > { %v2841_v27 = vpop.f32.mrf.mxu0 }
 0x2b1   : > { %v2968_v0 = vadd.f32 %v8602_v6, %v2929_v17  ;;  %v2928_v44 = vadd.f32 %v2841_v27, %v2002_v55  ;;  %v3706_v19 = vld [vmem:[#allocation3 + $0xe8] sm:$0x3] }
 0x2b2   : > { %v3819_v7 = vrot.slane %v3706_v19, 1  ;;  %v3995_v56 = vrot.slane %v3706_v19, 2 }
 0x2b3   : > { %vm3000_vm15 = vcmp.gt.f32.partialorder %v2968_v0, 0.0  ;;  %v3033_v41 = vmul.f32 %v8609_v38, %v2968_v0  ;;  %v2967_v11 = vadd.f32 %v8602_v6, %v2928_v44  ;;  %v8830_v60 = vld [vmem:[#allocation3 + $0xe0] sm:$0xff]  ;;  %v8832_v10 = vld [vmem:[#allocation3 + $0xd8] sm:$0xff] }
 0x2b4   : > { %v3817_v53 = vrot.slane %v8830_v60, 1  ;;  %v3816_v48 = vrot.slane %v8832_v10, 1  ;;  %v3993_v32 = vrot.slane %v8830_v60, 2  ;;  %v3992_v14 = vrot.slane %v8832_v10, 2 }
 0x2b5   : > { %v3065_v39 = vsel %vm3000_vm15, %v2968_v0, %v3033_v41  ;;  %vm2999_vm1 = vcmp.gt.f32.partialorder %v2967_v11, 0.0  ;;  %v3032_v29 = vmul.f32 %v8609_v38, %v2967_v11  ;;  %v6530_v21 = vpop.f32.mrf.mxu1 }
 0x2b6   : > { %3152 = vst.msk [vmem:[#allocation3 + $0xf9] sm:$0xff] %vm266_vm0, %v3065_v39  ;;  %v3820_v50 = vsel %vm484_vm2, %v3817_v53, %v3819_v7  ;;  %v3818_v46 = vsel %vm484_vm2, %v3816_v48, %v3817_v53  ;;  %v2017_v63 = vadd.f32 %v6530_v21, %v8540_v4  ;;  %v3996_v54 = vsel %vm661_vm3, %v3993_v32, %v3995_v56 }
 0x2b7   : > { %v3064_v35 = vsel %vm2999_vm1, %v2967_v11, %v3032_v29  ;;  %3890 = vrot.lane.b32.xlu1 %v3820_v50, %s6833_s9  ;;  %3888 = vrot.lane.b32.xlu0 %v3818_v46, %s6833_s9  ;;  %v2011_v31 = vpop.f32.mrf.mxu1  ;;  %v3994_v57 = vsel %vm661_vm3, %v3992_v14, %v3993_v32 }
 0x2b8   : > { %3151 = vst.msk [vmem:[#allocation3 + $0xf1] sm:$0xff] %vm266_vm0, %v3064_v35  ;;  %v2012_v43 = vadd.f32 %v2011_v31, %v8544_v8 }
 0x2ba   : > { %v6582_v34 = vpop.f32.mrf.mxu0 }
 0x2bb   : > { %4066 = vrot.lane.b32.xlu1 %v3996_v54, %s6834_s14  ;;  %4064 = vrot.lane.b32.xlu0 %v3994_v57, %s6834_s14  ;;  %v2931_v33 = vadd.f32 %v6582_v34, %v2017_v63 }
 0x2bc   : > { %v2851_v2 = vpop.f32.mrf.mxu0 }
 0x2bd   : > { %v3709_v18 = vld [vmem:[#allocation3 + $0x100] sm:$0x3]  ;;  %v2970_v24 = vadd.f32 %v8602_v6, %v2931_v33  ;;  %v2930_v12 = vadd.f32 %v2851_v2, %v2012_v43 }
 0x2be   : > { %v3824_v4 = vrot.slane %v3709_v18, 1  ;;  %v4000_v39 = vrot.slane %v3709_v18, 2 }
 0x2bf   : > { %v8852_v49 = vld [vmem:[#allocation3 + $0xf8] sm:$0xff]  ;;  %v8854_v55 = vld [vmem:[#allocation3 + $0xf0] sm:$0xff]  ;;  %vm3002_vm7 = vcmp.gt.f32.partialorder %v2970_v24, 0.0  ;;  %v3035_v17 = vmul.f32 %v8609_v38, %v2970_v24  ;;  %v2969_v27 = vadd.f32 %v8602_v6, %v2930_v12 }
 0x2c0   : > { %v3822_v0 = vrot.slane %v8852_v49, 1  ;;  %v3821_v8 = vrot.slane %v8854_v55, 1  ;;  %v3998_v44 = vrot.slane %v8852_v49, 2  ;;  %v3997_v7 = vrot.slane %v8854_v55, 2 }
 0x2c1   : > { %v3067_v19 = vsel %vm3002_vm7, %v2970_v24, %v3035_v17  ;;  %vm3001_vm8 = vcmp.gt.f32.partialorder %v2969_v27, 0.0  ;;  %v3034_v41 = vmul.f32 %v8609_v38, %v2969_v27 }
 0x2c2   : > { %v3825_v11 = vsel %vm484_vm2, %v3822_v0, %v3824_v4  ;;  %3154 = vst.msk [vmem:[#allocation3 + $0x111] sm:$0xff] %vm266_vm0, %v3067_v19  ;;  %v3823_v53 = vsel %vm484_vm2, %v3821_v8, %v3822_v0  ;;  %v4001_v21 = vsel %vm661_vm3, %v3998_v44, %v4000_v39  ;;  %v3999_v50 = vsel %vm661_vm3, %v3997_v7, %v3998_v44 }
 0x2c3   : > { %3894 = vrot.lane.b32.xlu1 %v3825_v11, %s6833_s9  ;;  %v3066_v48 = vsel %vm3001_vm8, %v2969_v27, %v3034_v41  ;;  %3892 = vrot.lane.b32.xlu0 %v3823_v53, %s6833_s9 }
 0x2c4   : > { %3153 = vst.msk [vmem:[#allocation3 + $0x109] sm:$0xff] %vm266_vm0, %v3066_v48 }
 0x2c5   : > { %v6533_v29 = vpop.f32.mrf.mxu1 }
 0x2c6   : > { %v2027_v35 = vadd.f32 %v6533_v29, %v8550_v20 }
 0x2c7   : > { %4070 = vrot.lane.b32.xlu1 %v4001_v21, %s6834_s14  ;;  %4068 = vrot.lane.b32.xlu0 %v3999_v50, %s6834_s14  ;;  %v2021_v46 = vpop.f32.mrf.mxu1 }
 0x2c8   : > { %v2022_v63 = vadd.f32 %v2021_v46, %v8556_v16 }
 0x2c9   : > { %v3857_v32 = vpop.permute.xlu0 %3856  ;;  %v3859_v14 = vpop.permute.xlu1 %3858  ;;  %v3712_v56 = vld [vmem:[#allocation3 + $0x118] sm:$0x3] }
 0x2ca   : > { %v6585_v31 = vpop.f32.mrf.mxu0  ;;  %v4128_v54 = vsel %vm266_vm0, %v8638_v62, %v3857_v32  ;;  %v4129_v33 = vsel %vm266_vm0, %v8640_v61, %v3859_v14  ;;  %v3829_v20 = vrot.slane %v3712_v56, 1  ;;  %v4005_v11 = vrot.slane %v3712_v56, 2 }
 0x2cb   : > { %v2933_v57 = vadd.f32 %v6585_v31, %v2027_v35  ;;  %v8877_v34 = vld [vmem:[#allocation3 + $0x110] sm:$0xff]  ;;  %v8879_v43 = vld [vmem:[#allocation3 + $0x108] sm:$0xff] }
 0x2cc   : > { %v2861_v18 = vpop.f32.mrf.mxu0  ;;  %v3827_v24 = vrot.slane %v8877_v34, 1  ;;  %v3826_v12 = vrot.slane %v8879_v43, 1  ;;  %v4003_v27 = vrot.slane %v8877_v34, 2  ;;  %v4002_v44 = vrot.slane %v8879_v43, 2 }
 0x2cd   : > { %v4033_v2 = vpop.permute.xlu0 %4032  ;;  %v2972_v16 = vadd.f32 %v8602_v6, %v2933_v57  ;;  %v2932_v62 = vadd.f32 %v2861_v18, %v2022_v63  ;;  %v4035_v17 = vpop.permute.xlu1 %4034 }
 0x2ce   : > { %v4160_v4 = vsel %vm870_vm5, %v4128_v54, %v4033_v2  ;;  %v4161_v0 = vsel %vm870_vm5, %v4129_v33, %v4035_v17  ;;  %v3830_v61 = vsel %vm484_vm2, %v3827_v24, %v3829_v20  ;;  %v3828_v8 = vsel %vm484_vm2, %v3826_v12, %v3827_v24 }
 0x2cf   : > { %6602 = vmatprep.mubr.msk.f32.mxu1 %vm1420_vm6, %v4160_v4  ;;  %vm3004_vm9 = vcmp.gt.f32.partialorder %v2972_v16, 0.0  ;;  %v3037_v19 = vmul.f32 %v8609_v38, %v2972_v16  ;;  %v2971_v41 = vadd.f32 %v8602_v6, %v2932_v62  ;;  %3898 = vrot.lane.b32.xlu1 %v3830_v61, %s6833_s9  ;;  %v4006_v48 = vsel %vm661_vm3, %v4003_v27, %v4005_v11 }
 0x2d0   : > { %3896 = vrot.lane.b32.xlu0 %v3828_v8, %s6833_s9  ;;  %6603 = vmatmul.mubr.msk.f32.vlgmr.msra.gmra.mxu1 %vm1420_vm6, %v4161_v0  ;;  %v4004_v39 = vsel %vm661_vm3, %v4002_v44, %v4003_v27 }
 0x2d1   : > { %v3069_v53 = vsel %vm3004_vm9, %v2972_v16, %v3037_v19  ;;  %vm3003_vm10 = vcmp.gt.f32.partialorder %v2971_v41, 0.0  ;;  %v3036_v7 = vmul.f32 %v8609_v38, %v2971_v41 }
 0x2d2   : > { %3156 = vst.msk [vmem:[#allocation3 + $0x129] sm:$0xff] %vm266_vm0, %v3069_v53 }
 0x2d3   : > { %v3068_v29 = vsel %vm3003_vm10, %v2971_v41, %v3036_v7  ;;  %4074 = vrot.lane.b32.xlu1 %v4006_v48, %s6834_s14 }
 0x2d4   : > { %4072 = vrot.lane.b32.xlu0 %v4004_v39, %s6834_s14  ;;  %3155 = vst.msk [vmem:[#allocation3 + $0x121] sm:$0xff] %vm266_vm0, %v3068_v29 }
 0x2d5   : > { %v3861_v21 = vpop.permute.xlu0 %3860  ;;  %v6536_v50 = vpop.f32.mrf.mxu1 }
 0x2d6   : > { %v3863_v46 = vpop.permute.xlu1 %3862  ;;  %v4130_v32 = vsel %vm266_vm0, %v8662_v26, %v3861_v21  ;;  %v2037_v56 = vadd.f32 %v6536_v50, %v8560_v5 }
 0x2d7   : > { %v2031_v14 = vpop.f32.mrf.mxu1  ;;  %v4131_v31 = vsel %vm266_vm0, %v8664_v30, %v3863_v46 }
 0x2d8   : > { %v2032_v18 = vadd.f32 %v2031_v14, %v8566_v58 }
 0x2d9   : > { %v4037_v35 = vpop.permute.xlu0 %4036  ;;  %v3715_v57 = vld [vmem:[#allocation3 + $0x130] sm:$0x3] }
 0x2da   : > { %v4162_v63 = vsel %vm870_vm5, %v4130_v32, %v4037_v35  ;;  %v4039_v54 = vpop.permute.xlu1 %4038  ;;  %v6588_v2 = vpop.f32.mrf.mxu0  ;;  %v3834_v12 = vrot.slane %v3715_v57, 1  ;;  %v4010_v41 = vrot.slane %v3715_v57, 2 }
 0x2db   : > { %v4163_v33 = vsel %vm870_vm5, %v4131_v31, %v4039_v54  ;;  %6605 = vmatprep.mubr.msk.f32.mxu1 %vm1420_vm6, %v4162_v63  ;;  %v2935_v24 = vadd.f32 %v6588_v2, %v2037_v56  ;;  %v8915_v26 = vld [vmem:[#allocation3 + $0x128] sm:$0xff]  ;;  %v8917_v5 = vld [vmem:[#allocation3 + $0x120] sm:$0xff] }
 0x2dc   : > { %6606 = vmatmul.mubr.msk.f32.gmra.mxu1 %vm1420_vm6, %v4163_v33  ;;  %v2871_v20 = vpop.f32.mrf.mxu0  ;;  %v3832_v30 = vrot.slane %v8915_v26, 1  ;;  %v3831_v16 = vrot.slane %v8917_v5, 1  ;;  %v4008_v27 = vrot.slane %v8915_v26, 2  ;;  %v4007_v0 = vrot.slane %v8917_v5, 2 }
 0x2dd   : > { %v2974_v4 = vadd.f32 %v8602_v6, %v2935_v24  ;;  %v2934_v62 = vadd.f32 %v2871_v20, %v2032_v18 }
 0x2de   : > { %v3835_v17 = vsel %vm484_vm2, %v3832_v30, %v3834_v12  ;;  %v3833_v58 = vsel %vm484_vm2, %v3831_v16, %v3832_v30  ;;  %v4011_v7 = vsel %vm661_vm3, %v4008_v27, %v4010_v41  ;;  %v4009_v48 = vsel %vm661_vm3, %v4007_v0, %v4008_v27 }
 0x2df   : > { %vm3006_vm11 = vcmp.gt.f32.partialorder %v2974_v4, 0.0  ;;  %v3039_v61 = vmul.f32 %v8609_v38, %v2974_v4  ;;  %v2973_v8 = vadd.f32 %v8602_v6, %v2934_v62  ;;  %3902 = vrot.lane.b32.xlu1 %v3835_v17, %s6833_s9  ;;  %3900 = vrot.lane.b32.xlu0 %v3833_v58, %s6833_s9 }
 0x2e1   : > { %v3865_v44 = vpop.permute.xlu0 %3864  ;;  %v3867_v19 = vpop.permute.xlu1 %3866  ;;  %v3071_v11 = vsel %vm3006_vm11, %v2974_v4, %v3039_v61  ;;  %vm3005_vm12 = vcmp.gt.f32.partialorder %v2973_v8, 0.0  ;;  %v3038_v53 = vmul.f32 %v8609_v38, %v2973_v8 }
 0x2e2   : > { %3158 = vst.msk [vmem:[#allocation3 + $0x141] sm:$0xff] %vm266_vm0, %v3071_v11  ;;  %v4132_v29 = vsel %vm266_vm0, %v8686_v40, %v3865_v44  ;;  %v4133_v46 = vsel %vm266_vm0, %v8688_v59, %v3867_v19 }
 0x2e3   : > { %v3070_v39 = vsel %vm3005_vm12, %v2973_v8, %v3038_v53  ;;  %4078 = vrot.lane.b32.xlu1 %v4011_v7, %s6834_s14  ;;  %4076 = vrot.lane.b32.xlu0 %v4009_v48, %s6834_s14 }
 0x2e4   : > { %3157 = vst.msk [vmem:[#allocation3 + $0x139] sm:$0xff] %vm266_vm0, %v3070_v39 }
 0x2e5   : > { %v4041_v21 = vpop.permute.xlu0 %4040  ;;  %v6539_v50 = vpop.f32.mrf.mxu1 }
 0x2e6   : > { %v4164_v32 = vsel %vm870_vm5, %v4132_v29, %v4041_v21  ;;  %v4043_v14 = vpop.permute.xlu1 %4042  ;;  %v2047_v31 = vadd.f32 %v6539_v50, %v8570_v23 }
 0x2e7   : > { %v4165_v35 = vsel %vm870_vm5, %v4133_v46, %v4043_v14  ;;  %6608 = vmatprep.mubr.msk.f32.mxu1 %vm1420_vm6, %v4164_v32  ;;  %v2041_v56 = vpop.f32.mrf.mxu1 }
 0x2e8   : > { %6609 = vmatmul.mubr.msk.f32.gmra.mxu1 %vm1420_vm6, %v4165_v35  ;;  %v2042_v40 = vadd.f32 %v2041_v56, %v8576_v51 }
 0x2e9   : > { %v3718_v63 = vld [vmem:[#allocation3 + $0x148] sm:$0x3] }
 0x2ea   : > { %v6591_v54 = vpop.f32.mrf.mxu0  ;;  %v3839_v20 = vrot.slane %v3718_v63, 1  ;;  %v4015_v44 = vrot.slane %v3718_v63, 2 }
 0x2eb   : > { %v2937_v57 = vadd.f32 %v6591_v54, %v2047_v31  ;;  %v8947_v33 = vld [vmem:[#allocation3 + $0x140] sm:$0xff]  ;;  %v8949_v59 = vld [vmem:[#allocation3 + $0x138] sm:$0xff] }
 0x2ec   : > { %v2881_v18 = vpop.f32.mrf.mxu0  ;;  %v3837_v24 = vrot.slane %v8947_v33, 1  ;;  %v3836_v30 = vrot.slane %v8949_v59, 1  ;;  %v4013_v62 = vrot.slane %v8947_v33, 2  ;;  %v4012_v17 = vrot.slane %v8949_v59, 2 }
 0x2ed   : > { %v3869_v2 = vpop.permute.xlu0 %3868  ;;  %v2976_v12 = vadd.f32 %v8602_v6, %v2937_v57  ;;  %v2936_v16 = vadd.f32 %v2881_v18, %v2042_v40  ;;  %v3871_v23 = vpop.permute.xlu1 %3870 }
 0x2ee   : > { %v3840_v4 = vsel %vm484_vm2, %v3837_v24, %v3839_v20  ;;  %v3838_v51 = vsel %vm484_vm2, %v3836_v30, %v3837_v24  ;;  %v4134_v0 = vsel %vm266_vm0, %v8712_v3, %v3869_v2  ;;  %v4135_v61 = vsel %vm266_vm0, %v8710_v1, %v3871_v23 }
 0x2ef   : > { %vm3008_vm13 = vcmp.gt.f32.partialorder %v2976_v12, 0.0  ;;  %v3041_v58 = vmul.f32 %v8609_v38, %v2976_v12  ;;  %v2975_v27 = vadd.f32 %v8602_v6, %v2936_v16  ;;  %3906 = vrot.lane.b32.xlu1 %v3840_v4, %s6833_s9  ;;  %3904 = vrot.lane.b32.xlu0 %v3838_v51, %s6833_s9  ;;  %v4016_v3 = vsel %vm661_vm3, %v4013_v62, %v4015_v44 }
 0x2f0   : > { %v4014_v7 = vsel %vm661_vm3, %v4012_v17, %v4013_v62 }
 0x2f1   : > { %v4045_v8 = vpop.permute.xlu0 %4044  ;;  %v3073_v19 = vsel %vm3008_vm13, %v2976_v12, %v3041_v58  ;;  %vm3007_vm14 = vcmp.gt.f32.partialorder %v2975_v27, 0.0  ;;  %v3040_v41 = vmul.f32 %v8609_v38, %v2975_v27  ;;  %v4047_v53 = vpop.permute.xlu1 %4046 }
 0x2f2   : > { %v4166_v11 = vsel %vm870_vm5, %v4134_v0, %v4045_v8  ;;  %3160 = vst.msk [vmem:[#allocation3 + $0x159] sm:$0xff] %vm266_vm0, %v3073_v19  ;;  %v4167_v6 = vsel %vm870_vm5, %v4135_v61, %v4047_v53 }
 0x2f3   : > { %6611 = vmatprep.mubr.msk.f32.mxu1 %vm1420_vm6, %v4166_v11  ;;  %v3072_v1 = vsel %vm3007_vm14, %v2975_v27, %v3040_v41  ;;  %4082 = vrot.lane.b32.xlu1 %v4016_v3, %s6834_s14 }
 0x2f4   : > { %4080 = vrot.lane.b32.xlu0 %v4014_v7, %s6834_s14  ;;  %3159 = vst.msk [vmem:[#allocation3 + $0x151] sm:$0xff] %vm266_vm0, %v3072_v1  ;;  %6612 = vmatmul.mubr.msk.f32.gmra.mxu1 %vm1420_vm6, %v4167_v6 }
 0x2f5   : > { %v6542_v48 = vpop.f32.mrf.mxu1 }
 0x2f6   : > { %v2057_v50 = vadd.f32 %v6542_v48, %v8580_v15 }
 0x2f7   : > { %v2051_v39 = vpop.f32.mrf.mxu1 }
 0x2f8   : > { %v2052_v14 = vadd.f32 %v2051_v39, %v8586_v37  ;;  %v8992_v37 = vld [vmem:[%s10240_s2] ss:$0 sm:$0xff] }
 0x2f9   : > { %v3873_v29 = vpop.permute.xlu0 %3872  ;;  %v3875_v21 = vpop.permute.xlu1 %3874  ;;  %v3721_v46 = vld [vmem:[#allocation3 + $0x160] sm:$0x3] }
 0x2fa   : > { %v6594_v32 = vpop.f32.mrf.mxu0  ;;  %v4136_v35 = vsel %vm266_vm0, %v8736_v36, %v3873_v29  ;;  %v4137_v54 = vsel %vm266_vm0, %v8734_v28, %v3875_v21  ;;  %v3844_v15 = vrot.slane %v3721_v46, 1  ;;  %v4020_v17 = vrot.slane %v3721_v46, 2 }
 0x2fb   : > { %v2939_v56 = vadd.f32 %v6594_v32, %v2057_v50  ;;  %v8981_v31 = vld [vmem:[#allocation3 + $0x158] sm:$0xff]  ;;  %v8983_v63 = vld [vmem:[#allocation3 + $0x150] sm:$0xff] }
 0x2fc   : > { %v2891_v57 = vpop.f32.mrf.mxu0  ;;  %v3842_v2 = vrot.slane %v8981_v31, 1  ;;  %v3841_v18 = vrot.slane %v8983_v63, 1  ;;  %v4018_v28 = vrot.slane %v8981_v31, 2  ;;  %v4017_v4 = vrot.slane %v8983_v63, 2 }
 0x2fd   : > { %v4049_v40 = vpop.permute.xlu0 %4048  ;;  %v2978_v36 = vadd.f32 %v8992_v37, %v2939_v56  ;;  %v2938_v20 = vadd.f32 %v2891_v57, %v2052_v14  ;;  %v4051_v30 = vpop.permute.xlu1 %4050 }
 0x2fe   : > { %v4168_v24 = vsel %vm870_vm5, %v4136_v35, %v4049_v40  ;;  %v4169_v12 = vsel %vm870_vm5, %v4137_v54, %v4051_v30  ;;  %v3845_v16 = vsel %vm484_vm2, %v3842_v2, %v3844_v15  ;;  %v3843_v23 = vsel %vm484_vm2, %v3841_v18, %v3842_v2 }
 0x2ff   : > { %6614 = vmatprep.mubr.msk.f32.mxu1 %vm1420_vm6, %v4168_v24  ;;  %vm3010_vm15 = vcmp.gt.f32.partialorder %v2978_v36, 0.0  ;;  %v3043_v51 = vmul.f32 %v8609_v38, %v2978_v36  ;;  %v2977_v62 = vadd.f32 %v8992_v37, %v2938_v20  ;;  %3910 = vrot.lane.b32.xlu1 %v3845_v16, %s6833_s9  ;;  %v4021_v0 = vsel %vm661_vm3, %v4018_v28, %v4020_v17 }
 0x300   : > { %3908 = vrot.lane.b32.xlu0 %v3843_v23, %s6833_s9  ;;  %6615 = vmatmul.mubr.msk.f32.gmra.mxu1 %vm1420_vm6, %v4169_v12  ;;  %v4019_v61 = vsel %vm661_vm3, %v4017_v4, %v4018_v28 }
 0x301   : > { %v3075_v58 = vsel %vm3010_vm15, %v2978_v36, %v3043_v51  ;;  %vm3009_vm1 = vcmp.gt.f32.partialorder %v2977_v62, 0.0  ;;  %v3042_v27 = vmul.f32 %v8609_v38, %v2977_v62 }
 0x302   : > { %3162 = vst.msk [vmem:[#allocation3 + $0x171] sm:$0xff] %vm266_vm0, %v3075_v58 }
 0x303   : > { %v3074_v8 = vsel %vm3009_vm1, %v2977_v62, %v3042_v27  ;;  %4086 = vrot.lane.b32.xlu1 %v4021_v0, %s6834_s14 }
 0x304   : > { %4084 = vrot.lane.b32.xlu0 %v4019_v61, %s6834_s14  ;;  %3161 = vst.msk [vmem:[#allocation3 + $0x169] sm:$0xff] %vm266_vm0, %v3074_v8 }
 0x305   : > { %v3877_v44 = vpop.permute.xlu0 %3876  ;;  %v3879_v19 = vpop.permute.xlu1 %3878 }
 0x306   : > { %v6545_v41 = vpop.f32.mrf.mxu1  ;;  %v4138_v11 = vsel %vm266_vm0, %v8760_v25, %v3877_v44  ;;  %v4139_v6 = vsel %vm266_vm0, %v8758_v13, %v3879_v19 }
 0x307   : > { %v2067_v29 = vadd.f32 %v6545_v41, %v8590_v47 }
 0x308   : > { %v2061_v48 = vpop.f32.mrf.mxu1 }
 0x309   : > { %v4053_v53 = vpop.permute.xlu0 %4052  ;;  %v4055_v7 = vpop.permute.xlu1 %4054  ;;  %v3724_v1 = vld [vmem:[#allocation3 + $0x178] sm:$0x3]  ;;  %v2062_v14 = vadd.f32 %v2061_v48, %v8596_v52 }
 0x30a   : > { %v4170_v3 = vsel %vm870_vm5, %v4138_v11, %v4053_v53  ;;  %v4171_v39 = vsel %vm870_vm5, %v4139_v6, %v4055_v7  ;;  %v3849_v46 = vrot.slane %v3724_v1, 1  ;;  %v4025_v52 = vrot.slane %v3724_v1, 2  ;;  %v3679_v6 = vld [vmem:[%s10241_s3 + $0x8] sm:$0xf]  ;;  %v3168_v1 = vld [vmem:[#allocation3 + $0x10] sm:$0x3] }
 0x30b   : > { %6617 = vmatprep.mubr.msk.f32.mxu1 %vm1420_vm6, %v4170_v3  ;;  %v9023_v21 = vld [vmem:[#allocation3 + $0x170] sm:$0xff]  ;;  %v9025_v25 = vld [vmem:[#allocation3 + $0x168] sm:$0xff]  ;;  %6650 = vmatprep.subr.msk.mxu0 %vm1517_vm4, %v3679_v6 }
 0x30c   : > { %6618 = vmatmul.mubr.msk.f32.gmra.mxu1 %vm1420_vm6, %v4171_v39  ;;  %v3847_v13 = vrot.slane %v9023_v21, 1  ;;  %v3846_v32 = vrot.slane %v9025_v25, 1  ;;  %v4023_v40 = vrot.slane %v9023_v21, 2  ;;  %v4022_v57 = vrot.slane %v9025_v25, 2  ;;  %6651 = vmatpush3.msk.msra.mxu0 %vm1517_vm4, %v3679_v6  ;;  %v3171_v6 = vld [vmem:[#allocation3 + $0x28] sm:$0x3] }
 0x30d   : > { %v6597_v50 = vpop.f32.mrf.mxu0 }
 0x30e   : > { %v2941_v35 = vadd.f32 %v6597_v50, %v2067_v29  ;;  %v3850_v54 = vsel %vm484_vm2, %v3847_v13, %v3849_v46  ;;  %v3848_v47 = vsel %vm484_vm2, %v3846_v32, %v3847_v13  ;;  %v4026_v30 = vsel %vm661_vm3, %v4023_v40, %v4025_v52  ;;  %v9098_v52 = vld [vmem:[#allocation3 + $0x38] sm:$0xff] }
 0x30f   : > { %v2901_v56 = vpop.f32.mrf.mxu0  ;;  %3914 = vrot.lane.b32.xlu1 %v3850_v54, %s6833_s9  ;;  %3912 = vrot.lane.b32.xlu0 %v3848_v47, %s6833_s9  ;;  %v4024_v28 = vsel %vm661_vm3, %v4022_v57, %v4023_v40  ;;  %v3441_v57 = vrot.slane %v3168_v1, 2 }
 0x310   : > { %v2980_v2 = vadd.f32 %v8992_v37, %v2941_v35  ;;  %v2940_v15 = vadd.f32 %v2901_v56, %v2062_v14  ;;  %v3265_v35 = vrot.slane %v3168_v1, 1 }
 0x311   : > { %v3881_v18 = vpop.permute.xlu0 %3880  ;;  %v3883_v36 = vpop.permute.xlu1 %3882 }
 0x312   : > { %vm3012_vm7 = vcmp.gt.f32.partialorder %v2980_v2, 0.0  ;;  %v3045_v24 = vmul.f32 %v8609_v38, %v2980_v2  ;;  %v2979_v20 = vadd.f32 %v8992_v37, %v2940_v15  ;;  %v4140_v23 = vsel %vm266_vm0, %v8784_v45, %v3881_v18  ;;  %v9056_v45 = vld [vmem:[#allocation3 + $0x8] sm:$0xff] }
 0x313   : > { %4090 = vrot.lane.b32.xlu1 %v4026_v30, %s6834_s14  ;;  %4088 = vrot.lane.b32.xlu0 %v4024_v28, %s6834_s14  ;;  %v4141_v37 = vsel %vm266_vm0, %v8782_v42, %v3883_v36  ;;  %v3263_v53 = vrot.slane %v9056_v45, 1  ;;  %v3439_v54 = vrot.slane %v9056_v45, 2 }
 0x314   : > { %v3077_v12 = vsel %vm3012_vm7, %v2980_v2, %v3045_v24  ;;  %vm3011_vm8 = vcmp.gt.f32.partialorder %v2979_v20, 0.0  ;;  %v3044_v16 = vmul.f32 %v8609_v38, %v2979_v20  ;;  %v9054_v38 = vld [vmem:[#allocation3] sm:$0xff]  ;;  %v9100_v24 = vld [vmem:[#allocation3 + $0x30] sm:$0xff] }
 0x315   : > { %3164 = vst.msk [vmem:[#allocation3 + $0x189] sm:$0xff] %vm266_vm0, %v3077_v12  ;;  %v4057_v4 = vpop.permute.xlu0 %4056  ;;  %v4059_v51 = vpop.permute.xlu1 %4058  ;;  %v3262_v44 = vrot.slane %v9054_v38, 1  ;;  %v3266_v47 = vsel %vm484_vm2, %v3263_v53, %v3265_v35  ;;  %v3438_v2 = vrot.slane %v9054_v38, 2  ;;  %v3442_v30 = vsel %vm661_vm3, %v3439_v54, %v3441_v57  ;;  %v4846_v12 = vld [vmem:[#allocation3 + $0x40] sm:$0x3] }
 0x316   : > { %v3076_v62 = vsel %vm3011_vm8, %v2979_v20, %v3044_v16  ;;  %v4172_v17 = vsel %vm870_vm5, %v4140_v23, %v4057_v4  ;;  %v4173_v58 = vsel %vm870_vm5, %v4141_v37, %v4059_v51  ;;  %v6199_v20 = vld [vmem:[%s10241_s3 + $0x28] sm:$0xf]  ;;  %v9114_v51 = vrot.slane %v9098_v52, 1 }
 0x317   : > { %3163 = vst.msk [vmem:[#allocation3 + $0x181] sm:$0xff] %vm266_vm0, %v3076_v62  ;;  %6620 = vmatprep.mubr.msk.f32.mxu1 %vm1420_vm6, %v4172_v17  ;;  %v3264_v14 = vsel %vm484_vm2, %v3262_v44, %v3263_v53  ;;  %v3440_v28 = vsel %vm661_vm3, %v3438_v2, %v3439_v54  ;;  %6702 = vmatprep.subr.msk.mxu1 %vm1517_vm4, %v6199_v20  ;;  %v4940_v62 = vrot.slane %v9100_v24, 1  ;;  %v9117_v17 = vld [vmem:[#allocation3 + $0x18] sm:$0xff]  ;;  %v9138_v53 = vrot.slane %v9098_v52, 2  ;;  %v9162_v54 = vld [vmem:[#allocation3 + $0x50] sm:$0xff] }
 0x318   : > { %6621 = vmatmul.mubr.msk.f32.gmra.mxu1 %vm1420_vm6, %v4173_v58  ;;  %v9119_v58 = vld [vmem:[#allocation3 + $0x20] sm:$0xff]  ;;  %v4849_v57 = vld [vmem:[#allocation3 + $0x58] sm:$0x3] }
 0x319   : > { %6703 = vmatpush3.msk.msra.mxu1 %vm1517_vm4, %v6199_v20  ;;  %v3268_v44 = vrot.slane %v9119_v58, 1 }
 0x31c   : > { %v3727_v27 = vld [vmem:[#allocation3 + $0x190] sm:$0x3] }
 0x31d   : > { %v3885_v0 = vpop.permute.xlu0 %3884  ;;  %v3887_v42 = vpop.permute.xlu1 %3886  ;;  %v3854_v41 = vrot.slane %v3727_v27, 1  ;;  %v4030_v40 = vrot.slane %v3727_v27, 2  ;;  %v6198_v27 = vld [vmem:[%s10241_s3 + $0x20] sm:$0xff] }
 0x31e   : > { %v9058_v61 = vld [vmem:[#allocation3 + $0x188] sm:$0xff]  ;;  %v9060_v8 = vld [vmem:[#allocation3 + $0x180] sm:$0xff]  ;;  %v4142_v3 = vsel %vm266_vm0, %v8808_v22, %v3885_v0  ;;  %v4143_v7 = vsel %vm266_vm0, %v8806_v9, %v3887_v42  ;;  %v3678_v9 = vld [vmem:[%s10241_s3] sm:$0xff]  ;;  %6704 = vmatprep.subr.mxu1 %v6198_v27  ;;  %v3267_v42 = vrot.slane %v9117_v17, 1 }
 0x31f   : > { %v3852_v19 = vrot.slane %v9058_v61, 1  ;;  %v3851_v11 = vrot.slane %v9060_v8, 1  ;;  %v4027_v13 = vrot.slane %v9060_v8, 2  ;;  %v4028_v46 = vrot.slane %v9058_v61, 2  ;;  %6652 = vmatprep.subr.mxu0 %v3678_v9  ;;  %6705 = vmatpush3.msra.mxu1 %v6198_v27 }
 0x320   : > { %6653 = vmatpush3.msra.mxu0 %v3678_v9  ;;  %v3443_v9 = vrot.slane %v9117_v17, 2 }
 0x321   : > { %v4061_v48 = vpop.permute.xlu0 %4060  ;;  %v4063_v39 = vpop.permute.xlu1 %4062  ;;  %v3855_v29 = vsel %vm484_vm2, %v3852_v19, %v3854_v41  ;;  %v3853_v50 = vsel %vm484_vm2, %v3851_v11, %v3852_v19  ;;  %v4029_v56 = vsel %vm661_vm3, %v4027_v13, %v4028_v46  ;;  %v4031_v36 = vsel %vm661_vm3, %v4028_v46, %v4030_v40 }
 0x322   : > { %v4174_v22 = vsel %vm870_vm5, %v4142_v3, %v4061_v48  ;;  %v4175_v32 = vsel %vm870_vm5, %v4143_v7, %v4063_v39  ;;  %3918 = vrot.lane.b32.xlu1 %v3855_v29, %s6833_s9  ;;  %3916 = vrot.lane.b32.xlu0 %v3853_v50, %s6833_s9  ;;  %v4942_v41 = vsel %vm484_vm2, %v4940_v62, %v9114_v51  ;;  %v5116_v11 = vrot.slane %v9100_v24, 2 }
 0x323   : > { %6623 = vmatprep.mubr.msk.f32.mxu1 %vm1420_vm6, %v4174_v22  ;;  %v3269_v7 = vsel %vm484_vm2, %v3267_v42, %v3268_v44  ;;  %v3270_v39 = vrot.slane %v3171_v6, 1  ;;  %v5119_v29 = vrot.slane %v4846_v12, 2  ;;  %v3444_v50 = vrot.slane %v9119_v58, 2 }
 0x324   : > { %6624 = vmatmul.mubr.msk.f32.gmra.mxu1 %vm1420_vm6, %v4175_v32  ;;  %v9145_v1 = vsel %vm661_vm3, %v5116_v11, %v9138_v53  ;;  %v3446_v40 = vrot.slane %v3171_v6, 2  ;;  %v9207_v11 = vld [vmem:[#allocation3 + $0x60] sm:$0xff] }
 0x325   : > { %v3271_v22 = vsel %vm484_vm2, %v3268_v44, %v3270_v39  ;;  %v5120_v32 = vsel %vm661_vm3, %v9138_v53, %v5119_v29  ;;  %v3445_v2 = vsel %vm661_vm3, %v3443_v9, %v3444_v50 }
 0x326   : > { %3342 = vrot.lane.b32.xlu1 %v3264_v14, %s6833_s9  ;;  %4092 = vrot.lane.b32.xlu0 %v4029_v56, %s6834_s14 }
 0x329   : > { %v3889_v15 = vpop.permute.xlu0 %3888  ;;  %v3891_v18 = vpop.permute.xlu1 %3890 }
 0x32a   : > { %3344 = vrot.lane.b32.xlu1 %v3266_v47, %s6833_s9  ;;  %4094 = vrot.lane.b32.xlu0 %v4031_v36, %s6834_s14  ;;  %v4144_v16 = vsel %vm266_vm0, %v8832_v10, %v3889_v15  ;;  %v4145_v23 = vsel %vm266_vm0, %v8830_v60, %v3891_v18  ;;  %v4943_v60 = vrot.slane %v4846_v12, 1  ;;  %v9172_v15 = vrot.slane %v9162_v54, 1 }
 0x32b   : > { %v4948_v36 = vrot.slane %v4849_v57, 1  ;;  %v9183_v12 = vrot.slane %v9162_v54, 2 }
 0x32c   : > { %v4944_v19 = vsel %vm484_vm2, %v9114_v51, %v4943_v60 }
 0x32d   : > { %v4065_v37 = vpop.permute.xlu0 %4064  ;;  %v4067_v4 = vpop.permute.xlu1 %4066  ;;  %v4949_v20 = vsel %vm484_vm2, %v9172_v15, %v4948_v36 }
 0x32e   : > { %v4176_v10 = vsel %vm870_vm5, %v4144_v16, %v4065_v37  ;;  %v4177_v0 = vsel %vm870_vm5, %v4145_v23, %v4067_v4  ;;  %3520 = vrot.lane.b32.xlu1 %v3442_v30, %s6834_s14  ;;  %3518 = vrot.lane.b32.xlu0 %v3440_v28, %s6834_s14  ;;  %v3174_v37 = vld [vmem:[#allocation3 + $0x40] sm:$0x3] }
 0x32f   : > { %6626 = vmatprep.mubr.msk.f32.mxu1 %vm1420_vm6, %v4176_v10  ;;  %v3275_v44 = vrot.slane %v3174_v37, 1  ;;  %v3451_v6 = vrot.slane %v3174_v37, 2 }
 0x330   : > { %6627 = vmatmul.mubr.msk.f32.gmra.mxu1 %vm1420_vm6, %v4177_v0 }
 0x332   : > { %5022 = vrot.lane.b32.xlu1 %v4944_v19, %s6833_s9  ;;  %5020 = vrot.lane.b32.xlu0 %v4942_v41, %s6833_s9  ;;  %v5124_v19 = vrot.slane %v4849_v57, 2 }
 0x335   : > { %v3895_v3 = vpop.permute.xlu1 %3894  ;;  %v3893_v48 = vpop.permute.xlu0 %3892 }
 0x336   : > { %3346 = vrot.lane.b32.xlu1 %v3269_v7, %s6833_s9  ;;  %5196 = vrot.lane.b32.xlu0 %v9145_v1, %s6834_s14  ;;  %v4147_v13 = vsel %vm266_vm0, %v8852_v49, %v3895_v3  ;;  %v4146_v14 = vsel %vm266_vm0, %v8854_v55, %v3893_v48  ;;  %v9164_v49 = vld [vmem:[#allocation3 + $0x48] sm:$0xff]  ;;  %v3447_v55 = vsel %vm661_vm3, %v3444_v50, %v3446_v40  ;;  %v4852_v3 = vld [vmem:[#allocation3 + $0x70] sm:$0x3] }
 0x337   : > { %v4945_v18 = vrot.slane %v9164_v49, 1  ;;  %v5121_v28 = vrot.slane %v9164_v49, 2  ;;  %v3452_v7 = vsel %vm661_vm3, %v9138_v53, %v3451_v6  ;;  %v4953_v39 = vrot.slane %v4852_v3, 1 }
 0x339   : > { %v4071_v46 = vpop.permute.xlu1 %4070  ;;  %v4069_v35 = vpop.permute.xlu0 %4068  ;;  %v4947_v30 = vsel %vm484_vm2, %v4945_v18, %v9172_v15  ;;  %v5123_v4 = vsel %vm661_vm3, %v5121_v28, %v9183_v12  ;;  %v9248_v18 = vld [vmem:[#allocation3 + $0x78] sm:$0xff] }
 0x33a   : > { %v4179_v56 = vsel %vm870_vm5, %v4147_v13, %v4071_v46  ;;  %3348 = vrot.lane.b32.xlu1 %v3271_v22, %s6833_s9  ;;  %5198 = vrot.lane.b32.xlu0 %v5120_v32, %s6834_s14  ;;  %v4178_v47 = vsel %vm870_vm5, %v4146_v14, %v4069_v35  ;;  %v5126_v13 = vrot.slane %v9207_v11, 2  ;;  %v3177_v32 = vld [vmem:[#allocation3 + $0x58] sm:$0x3] }
 0x33b   : > { %6629 = vmatprep.mubr.msk.f32.mxu1 %vm1420_vm6, %v4178_v47  ;;  %v3280_v57 = vrot.slane %v3177_v32, 1  ;;  %v3456_v36 = vrot.slane %v3177_v32, 2 }
 0x33c   : > { %6630 = vmatmul.mubr.msk.f32.gmra.mxu1 %vm1420_vm6, %v4179_v56 }
 0x33e   : > { %3524 = vrot.lane.b32.xlu1 %v3447_v55, %s6834_s14  ;;  %3522 = vrot.lane.b32.xlu0 %v3445_v2, %s6834_s14  ;;  %v5129_v55 = vrot.slane %v4852_v3, 2  ;;  %v9246_v2 = vld [vmem:[#allocation3 + $0x80] sm:$0xff] }
 0x33f   : > { %v9253_v28 = vrot.slane %v9246_v2, 1 }
 0x341   : > { %v3899_v23 = vpop.permute.xlu1 %3898 }
 0x342   : > { %v3897_v16 = vpop.permute.xlu0 %3896  ;;  %5026 = vrot.lane.b32.xlu1 %v4949_v20, %s6833_s9  ;;  %5024 = vrot.lane.b32.xlu0 %v4947_v30, %s6833_s9  ;;  %v4149_v27 = vsel %vm266_vm0, %v8877_v34, %v3899_v23  ;;  %v5125_v34 = vsel %vm661_vm3, %v9183_v12, %v5124_v19  ;;  %v4855_v20 = vld [vmem:[#allocation3 + $0x88] sm:$0x3] }
 0x343   : > { %v4148_v62 = vsel %vm266_vm0, %v8879_v43, %v3897_v16  ;;  %v3276_v43 = vsel %vm484_vm2, %v9114_v51, %v3275_v44  ;;  %v4950_v51 = vrot.slane %v9207_v11, 1  ;;  %v4958_v16 = vrot.slane %v4855_v20, 1 }
 0x344   : > { %v5134_v3 = vrot.slane %v4855_v20, 2 }
 0x345   : > { %v4075_v0 = vpop.permute.xlu1 %4074  ;;  %v4959_v23 = vsel %vm484_vm2, %v9253_v28, %v4958_v16 }
 0x346   : > { %v4073_v10 = vpop.permute.xlu0 %4072  ;;  %3350 = vrot.lane.b32.xlu1 %v4942_v41, %s6833_s9  ;;  %5200 = vrot.lane.b32.xlu0 %v5123_v4, %s6834_s14  ;;  %v4181_v42 = vsel %vm870_vm5, %v4149_v27, %v4075_v0  ;;  %v9205_v41 = vld [vmem:[#allocation3 + $0x68] sm:$0xff]  ;;  %v3180_v0 = vld [vmem:[#allocation3 + $0x70] sm:$0x3] }
 0x347   : > { %v4180_v60 = vsel %vm870_vm5, %v4148_v62, %v4073_v10  ;;  %v9212_v48 = vrot.slane %v9205_v41, 1  ;;  %v9224_v53 = vrot.slane %v9205_v41, 2  ;;  %v5131_v62 = vrot.slane %v9248_v18, 2 }
 0x348   : > { %6632 = vmatprep.mubr.msk.f32.mxu1 %vm1420_vm6, %v4180_v60  ;;  %v3285_v6 = vrot.slane %v3180_v0, 1 }
 0x349   : > { %6633 = vmatmul.mubr.msk.f32.gmra.mxu1 %vm1420_vm6, %v4181_v42  ;;  %v4954_v29 = vsel %vm484_vm2, %v9212_v48, %v4953_v39  ;;  %v4952_v50 = vsel %vm484_vm2, %v4950_v51, %v9212_v48  ;;  %v9288_v51 = vld [vmem:[#allocation3 + $0x98] sm:$0xff]  ;;  %v3461_v39 = vrot.slane %v3180_v0, 2 }
 0x34a   : > { %3352 = vrot.lane.b32.xlu1 %v3276_v43, %s6833_s9  ;;  %5202 = vrot.lane.b32.xlu0 %v5125_v34, %s6834_s14 }
 0x34e   : > { %3528 = vrot.lane.b32.xlu1 %v3452_v7, %s6834_s14  ;;  %3526 = vrot.lane.b32.xlu0 %v9145_v1, %s6834_s14  ;;  %v5128_v1 = vsel %vm661_vm3, %v5126_v13, %v9224_v53  ;;  %v9286_v7 = vld [vmem:[#allocation3 + $0x90] sm:$0xff] }
 0x34f   : > { %v4960_v13 = vrot.slane %v9286_v7, 1 }
 0x351   : > { %v3901_v46 = vpop.permute.xlu0 %3900  ;;  %v3903_v22 = vpop.permute.xlu1 %3902 }
 0x352   : > { %5030 = vrot.lane.b32.xlu1 %v4954_v29, %s6833_s9  ;;  %5028 = vrot.lane.b32.xlu0 %v4952_v50, %s6833_s9  ;;  %v4150_v9 = vsel %vm266_vm0, %v8917_v5, %v3901_v46  ;;  %v4151_v14 = vsel %vm266_vm0, %v8915_v26, %v3903_v22  ;;  %v3281_v5 = vsel %vm484_vm2, %v9172_v15, %v3280_v57  ;;  %v4955_v15 = vrot.slane %v9248_v18, 1  ;;  %v4858_v29 = vld [vmem:[#allocation3 + $0xa0] sm:$0x3] }
 0x353   : > { %v5130_v26 = vsel %vm661_vm3, %v9224_v53, %v5129_v55  ;;  %v4963_v46 = vrot.slane %v4858_v29, 1 }
 0x354   : > { %v4957_v37 = vsel %vm484_vm2, %v4955_v15, %v9253_v28  ;;  %v9328_v15 = vld [vmem:[#allocation3 + $0xb0] sm:$0xff] }
 0x355   : > { %v4077_v35 = vpop.permute.xlu0 %4076  ;;  %v4079_v56 = vpop.permute.xlu1 %4078 }
 0x356   : > { %3354 = vrot.lane.b32.xlu1 %v4947_v30, %s6833_s9  ;;  %5204 = vrot.lane.b32.xlu0 %v5128_v1, %s6834_s14  ;;  %v4182_v47 = vsel %vm870_vm5, %v4150_v9, %v4077_v35  ;;  %v4183_v40 = vsel %vm870_vm5, %v4151_v14, %v4079_v56  ;;  %v3457_v30 = vsel %vm661_vm3, %v9183_v12, %v3456_v36  ;;  %v9264_v12 = vrot.slane %v9246_v2, 2  ;;  %v3183_v35 = vld [vmem:[#allocation3 + $0x88] sm:$0x3] }
 0x357   : > { %6635 = vmatprep.mubr.msk.f32.mxu1 %vm1420_vm6, %v4182_v47  ;;  %v5136_v9 = vrot.slane %v9286_v7, 2  ;;  %v5139_v36 = vrot.slane %v4858_v29, 2  ;;  %v3290_v20 = vrot.slane %v3183_v35, 1  ;;  %v3466_v16 = vrot.slane %v3183_v35, 2 }
 0x358   : > { %6636 = vmatmul.mubr.msk.f32.gmra.mxu1 %vm1420_vm6, %v4183_v40 }
 0x35a   : > { %3356 = vrot.lane.b32.xlu1 %v3281_v5, %s6833_s9  ;;  %5206 = vrot.lane.b32.xlu0 %v5130_v26, %s6834_s14 }
 0x35e   : > { %3532 = vrot.lane.b32.xlu1 %v3457_v30, %s6834_s14  ;;  %3530 = vrot.lane.b32.xlu0 %v5123_v4, %s6834_s14  ;;  %v5133_v4 = vsel %vm661_vm3, %v5131_v62, %v9264_v12  ;;  %v9326_v30 = vld [vmem:[#allocation3 + $0xa8] sm:$0xff] }
 0x35f   : > { %v4965_v62 = vrot.slane %v9326_v30, 1 }
 0x361   : > { %v3905_v27 = vpop.permute.xlu0 %3904  ;;  %v3907_v10 = vpop.permute.xlu1 %3906 }
 0x362   : > { %5034 = vrot.lane.b32.xlu1 %v4959_v23, %s6833_s9  ;;  %5032 = vrot.lane.b32.xlu0 %v4957_v37, %s6833_s9  ;;  %v4152_v60 = vsel %vm266_vm0, %v8949_v59, %v3905_v27  ;;  %v4153_v42 = vsel %vm266_vm0, %v8947_v33, %v3907_v10  ;;  %v3286_v59 = vsel %vm484_vm2, %v9212_v48, %v3285_v6  ;;  %v9294_v48 = vrot.slane %v9288_v51, 1  ;;  %v4861_v23 = vld [vmem:[#allocation3 + $0xb8] sm:$0x3] }
 0x363   : > { %v5135_v33 = vsel %vm661_vm3, %v9264_v12, %v5134_v3  ;;  %v4966_v27 = vrot.slane %v9328_v15, 1 }
 0x364   : > { %v4962_v22 = vsel %vm484_vm2, %v4960_v13, %v9294_v48  ;;  %v4964_v32 = vsel %vm484_vm2, %v9294_v48, %v4963_v46  ;;  %v9364_v13 = vld [vmem:[#allocation3 + $0xc8] sm:$0xff] }
 0x365   : > { %v4083_v19 = vpop.permute.xlu1 %4082  ;;  %v4967_v10 = vsel %vm484_vm2, %v4965_v62, %v4966_v27  ;;  %v9401_v62 = vld [vmem:[#allocation3 + $0xe0] sm:$0xff] }
 0x366   : > { %v4081_v44 = vpop.permute.xlu0 %4080  ;;  %3358 = vrot.lane.b32.xlu1 %v4952_v50, %s6833_s9  ;;  %5208 = vrot.lane.b32.xlu0 %v5133_v4, %s6834_s14  ;;  %v4185_v34 = vsel %vm870_vm5, %v4153_v42, %v4083_v19  ;;  %v3462_v50 = vsel %vm661_vm3, %v9224_v53, %v3461_v39  ;;  %v9304_v53 = vrot.slane %v9288_v51, 2  ;;  %v9340_v42 = vrot.slane %v9328_v15, 2  ;;  %v3186_v19 = vld [vmem:[#allocation3 + $0xa0] sm:$0x3] }
 0x367   : > { %v4184_v43 = vsel %vm870_vm5, %v4152_v60, %v4081_v44  ;;  %v5141_v60 = vrot.slane %v9326_v30, 2  ;;  %v5144_v39 = vrot.slane %v4861_v23, 2  ;;  %v3295_v29 = vrot.slane %v3186_v19, 1 }
 0x368   : > { %6638 = vmatprep.mubr.msk.f32.mxu1 %vm1420_vm6, %v4184_v43  ;;  %v5138_v56 = vsel %vm661_vm3, %v5136_v9, %v9304_v53  ;;  %v3471_v46 = vrot.slane %v3186_v19, 2  ;;  %v9411_v19 = vrot.slane %v9401_v62, 1 }
 0x369   : > { %6639 = vmatmul.mubr.msk.f32.gmra.mxu1 %vm1420_vm6, %v4185_v34 }
 0x36a   : > { %3360 = vrot.lane.b32.xlu1 %v3286_v59, %s6833_s9  ;;  %5210 = vrot.lane.b32.xlu0 %v5135_v33, %s6834_s14 }
 0x36e   : > { %3534 = vrot.lane.b32.xlu0 %v5128_v1, %s6834_s14  ;;  %3536 = vrot.lane.b32.xlu1 %v3462_v50, %s6834_s14  ;;  %v9362_v50 = vld [vmem:[#allocation3 + $0xc0] sm:$0xff] }
 0x36f   : > { %v4970_v9 = vrot.slane %v9362_v50, 1 }
 0x371   : > { %v3911_v1 = vpop.permute.xlu1 %3910 }
 0x372   : > { %v3909_v14 = vpop.permute.xlu0 %3908  ;;  %5036 = vrot.lane.b32.xlu0 %v4962_v22, %s6833_s9  ;;  %5038 = vrot.lane.b32.xlu1 %v4964_v32, %s6833_s9  ;;  %v4155_v40 = vsel %vm266_vm0, %v8981_v31, %v3911_v1  ;;  %v3291_v31 = vsel %vm484_vm2, %v9253_v28, %v3290_v20  ;;  %v4968_v28 = vrot.slane %v4861_v23, 1  ;;  %v3472_v32 = vsel %vm661_vm3, %v9304_v53, %v3471_v46 }
 0x373   : > { %v4154_v47 = vsel %vm266_vm0, %v8983_v63, %v3909_v14  ;;  %v5140_v63 = vsel %vm661_vm3, %v9304_v53, %v5139_v36  ;;  %v9370_v14 = vrot.slane %v9364_v13, 1  ;;  %v9380_v53 = vrot.slane %v9364_v13, 2 }
 0x374   : > { %v4969_v0 = vsel %vm484_vm2, %v4966_v27, %v4968_v28 }
 0x375   : > { %v4087_v55 = vpop.permute.xlu1 %4086  ;;  %v4972_v1 = vsel %vm484_vm2, %v4970_v9, %v9370_v14 }
 0x376   : > { %v4085_v57 = vpop.permute.xlu0 %4084  ;;  %5212 = vrot.lane.b32.xlu0 %v5138_v56, %s6834_s14  ;;  %3362 = vrot.lane.b32.xlu1 %v4957_v37, %s6833_s9  ;;  %v4187_v26 = vsel %vm870_vm5, %v4155_v40, %v4087_v55  ;;  %v3467_v37 = vsel %vm661_vm3, %v9264_v12, %v3466_v16 }
 0x377   : > { %v4186_v5 = vsel %vm870_vm5, %v4154_v47, %v4085_v57  ;;  %v5146_v47 = vrot.slane %v9362_v50, 2  ;;  %v3189_v57 = vld [vmem:[#allocation3 + $0xb8] sm:$0x3] }
 0x378   : > { %6641 = vmatprep.mubr.msk.f32.mxu1 %vm1420_vm6, %v4186_v5 }
 0x379   : > { %6642 = vmatmul.mubr.msk.f32.gmra.mxu1 %vm1420_vm6, %v4187_v26  ;;  %v9386_v55 = vsel %vm661_vm3, %v5146_v47, %v9380_v53  ;;  %v3300_v26 = vrot.slane %v3189_v57, 1 }
 0x37a   : > { %5214 = vrot.lane.b32.xlu0 %v5140_v63, %s6834_s14  ;;  %3364 = vrot.lane.b32.xlu1 %v3291_v31, %s6833_s9 }
 0x37b   : > { %v3301_v23 = vsel %vm484_vm2, %v4966_v27, %v3300_v26 }
 0x37e   : > { %3538 = vrot.lane.b32.xlu0 %v5133_v4, %s6834_s14  ;;  %3540 = vrot.lane.b32.xlu1 %v3467_v37, %s6834_s14  ;;  %v5143_v4 = vsel %vm661_vm3, %v5141_v60, %v9340_v42  ;;  %v9399_v37 = vld [vmem:[#allocation3 + $0xd8] sm:$0xff] }
 0x381   : > { %v3913_v44 = vpop.permute.xlu0 %3912  ;;  %v3915_v12 = vpop.permute.xlu1 %3914 }
 0x382   : > { %5040 = vrot.lane.b32.xlu0 %v4967_v10, %s6833_s9  ;;  %5042 = vrot.lane.b32.xlu1 %v4969_v0, %s6833_s9  ;;  %v4156_v43 = vsel %vm266_vm0, %v9025_v25, %v3913_v44  ;;  %v4157_v34 = vsel %vm266_vm0, %v9023_v21, %v3915_v12  ;;  %v5145_v25 = vsel %vm661_vm3, %v9340_v42, %v5144_v39  ;;  %v4867_v0 = vld [vmem:[#allocation3 + $0xe8] sm:$0x3]  ;;  %v4975_v12 = vrot.slane %v9399_v37, 1 }
 0x383   : > { %v3296_v21 = vsel %vm484_vm2, %v9294_v48, %v3295_v29  ;;  %v3192_v29 = vld [vmem:[#allocation3 + $0xd0] sm:$0x3]  ;;  %v5154_v46 = vrot.slane %v4867_v0, 2 }
 0x385   : > { %v4089_v6 = vpop.permute.xlu0 %4088  ;;  %v4091_v3 = vpop.permute.xlu1 %4090 }
 0x386   : > { %5216 = vrot.lane.b32.xlu0 %v5143_v4, %s6834_s14  ;;  %3366 = vrot.lane.b32.xlu1 %v4962_v22, %s6833_s9  ;;  %v4188_v59 = vsel %vm870_vm5, %v4156_v43, %v4089_v6  ;;  %v4189_v33 = vsel %vm870_vm5, %v4157_v34, %v4091_v3  ;;  %v4864_v22 = vld [vmem:[#allocation3 + $0xd0] sm:$0x3]  ;;  %v5151_v6 = vrot.slane %v9399_v37, 2 }
 0x387   : > { %6644 = vmatprep.mubr.msk.f32.mxu1 %vm1420_vm6, %v4188_v59  ;;  %v4973_v48 = vrot.slane %v4864_v22, 1  ;;  %v5149_v5 = vrot.slane %v4864_v22, 2  ;;  %v3305_v22 = vrot.slane %v3192_v29, 1 }
 0x388   : > { %6645 = vmatmul.mubr.msk.f32.gmra.mxu1 %vm1420_vm6, %v4189_v33  ;;  %v4977_v33 = vsel %vm484_vm2, %v4975_v12, %v9411_v19  ;;  %v3195_v12 = vld [vmem:[#allocation3 + $0xe8] sm:$0x3] }
 0x389   : > { %v4974_v35 = vsel %vm484_vm2, %v9370_v14, %v4973_v48  ;;  %v5150_v16 = vsel %vm661_vm3, %v9380_v53, %v5149_v5 }
 0x38a   : > { %5218 = vrot.lane.b32.xlu0 %v5145_v25, %s6834_s14  ;;  %3368 = vrot.lane.b32.xlu1 %v3296_v21, %s6833_s9 }
 0x38e   : > { %3542 = vrot.lane.b32.xlu0 %v5138_v56, %s6834_s14  ;;  %3544 = vrot.lane.b32.xlu1 %v3472_v32, %s6834_s14 }
 0x392   : > { %5044 = vrot.lane.b32.xlu0 %v4972_v1, %s6833_s9  ;;  %5046 = vrot.lane.b32.xlu1 %v4974_v35, %s6833_s9 }
 0x394   : > { %v3917_v40 = vpop.permute.xlu0 %3916  ;;  %v3919_v56 = vpop.permute.xlu1 %3918 }
 0x395   : > { %v4158_v36 = vsel %vm266_vm0, %v9060_v8, %v3917_v40  ;;  %v3476_v8 = vrot.slane %v3189_v57, 2  ;;  %v4159_v28 = vsel %vm266_vm0, %v9058_v61, %v3919_v56  ;;  %v4978_v61 = vrot.slane %v4867_v0, 1  ;;  %v9452_v56 = vld [vmem:[#allocation3 + $0xf8] sm:$0xff] }
 0x396   : > { %5220 = vrot.lane.b32.xlu0 %v9386_v55, %s6834_s14  ;;  %3370 = vrot.lane.b32.xlu1 %v4967_v10, %s6833_s9  ;;  %v3306_v40 = vsel %vm484_vm2, %v9370_v14, %v3305_v22  ;;  %v3481_v57 = vrot.slane %v3192_v29, 2  ;;  %v9504_v29 = vld [vmem:[#allocation3 + $0x110] sm:$0xff] }
 0x397   : > { %v3477_v27 = vsel %vm661_vm3, %v9340_v42, %v3476_v8  ;;  %v9420_v42 = vrot.slane %v9401_v62, 2  ;;  %v4979_v39 = vsel %vm484_vm2, %v9411_v19, %v4978_v61 }
 0x398   : > { %v4093_v20 = vpop.permute.xlu0 %4092  ;;  %v3343_v63 = vpop.permute.xlu1 %3342  ;;  %v3482_v14 = vsel %vm661_vm3, %v9380_v53, %v3481_v57  ;;  %v9472_v53 = vrot.slane %v9452_v56, 2 }
 0x399   : > { %v4190_v31 = vsel %vm870_vm5, %v4158_v36, %v4093_v20  ;;  %v3614_v43 = vsel %vm266_vm0, %v9054_v38, %v3343_v63  ;;  %v9436_v21 = vsel %vm661_vm3, %v5151_v6, %v9420_v42  ;;  %v5155_v47 = vsel %vm661_vm3, %v9420_v42, %v5154_v46  ;;  %v4870_v36 = vld [vmem:[#allocation3 + $0x100] sm:$0x3] }
 0x39a   : > { %5222 = vrot.lane.b32.xlu0 %v5150_v16, %s6834_s14  ;;  %3372 = vrot.lane.b32.xlu1 %v3301_v23, %s6833_s9  ;;  %v9462_v16 = vrot.slane %v9452_v56, 1  ;;  %v4983_v23 = vrot.slane %v4870_v36, 1  ;;  %v3310_v6 = vrot.slane %v3195_v12, 1 }
 0x39b   : > { %6647 = vmatprep.mubr.msk.f32.mxu1 %vm1420_vm6, %v4190_v31 }
 0x39c   : > { %v4095_v10 = vpop.permute.xlu0 %4094  ;;  %v3345_v44 = vpop.permute.xlu1 %3344 }
 0x39d   : > { %v4191_v60 = vsel %vm870_vm5, %v4159_v28, %v4095_v10  ;;  %v3615_v3 = vsel %vm266_vm0, %v9056_v45, %v3345_v44 }
 0x39e   : > { %3546 = vrot.lane.b32.xlu0 %v5143_v4, %s6834_s14  ;;  %3548 = vrot.lane.b32.xlu1 %v3477_v27, %s6834_s14  ;;  %v4984_v27 = vsel %vm484_vm2, %v9462_v16, %v4983_v23 }
 0x39f   : > { %6648 = vmatmul.mubr.msk.f32.gmra.mxu1 %vm1420_vm6, %v4191_v60 }
 0x3a0   : > { %v3519_v34 = vpop.permute.xlu0 %3518  ;;  %v3521_v4 = vpop.permute.xlu1 %3520 }
 0x3a1   : > { %v3646_v59 = vsel %vm870_vm5, %v3614_v43, %v3519_v34  ;;  %v3647_v38 = vsel %vm870_vm5, %v3615_v3, %v3521_v4  ;;  %v5159_v34 = vrot.slane %v4870_v36, 2 }
 0x3a2   : > { %5048 = vrot.lane.b32.xlu0 %v4977_v33, %s6833_s9  ;;  %5050 = vrot.lane.b32.xlu1 %v4979_v39, %s6833_s9 }
 0x3a3   : > { %6654 = vmatprep.mubr.msk.f32.mxu0 %vm1420_vm6, %v3646_v59 }
 0x3a4   : > { %6655 = vmatmul.mubr.msk.f32.vlgmr.msra.gmra.mxu0 %vm1420_vm6, %v3647_v38  ;;  %v5021_v45 = vpop.permute.xlu0 %5020  ;;  %v5023_v25 = vpop.permute.xlu1 %5022  ;;  %v5160_v38 = vsel %vm661_vm3, %v9472_v53, %v5159_v34  ;;  %v4876_v34 = vld [vmem:[#allocation3 + $0x130] sm:$0x3] }
 0x3a5   : > { %v5292_v32 = vsel %vm266_vm0, %v9100_v24, %v5021_v45  ;;  %v5293_v5 = vsel %vm266_vm0, %v9098_v52, %v5023_v25  ;;  %v3311_v45 = vsel %vm484_vm2, %v9411_v19, %v3310_v6  ;;  %v3486_v25 = vrot.slane %v3195_v12, 2  ;;  %v9552_v12 = vld [vmem:[#allocation3 + $0x120] sm:$0xff] }
 0x3a6   : > { %5224 = vrot.lane.b32.xlu0 %v9436_v21, %s6834_s14  ;;  %3374 = vrot.lane.b32.xlu1 %v4972_v1, %s6833_s9  ;;  %v9450_v1 = vld [vmem:[#allocation3 + $0xf0] sm:$0xff] }
 0x3a7   : > { %v4980_v31 = vrot.slane %v9450_v1, 1  ;;  %v5156_v10 = vrot.slane %v9450_v1, 2  ;;  %v3487_v19 = vsel %vm661_vm3, %v9420_v42, %v3486_v25  ;;  %v9524_v42 = vrot.slane %v9504_v29, 2 }
 0x3a8   : > { %v5197_v9 = vpop.permute.xlu0 %5196  ;;  %v3347_v35 = vpop.permute.xlu1 %3346 }
 0x3a9   : > { %v5324_v48 = vsel %vm870_vm5, %v5292_v32, %v5197_v9  ;;  %v3616_v8 = vsel %vm266_vm0, %v9117_v17, %v3347_v35  ;;  %v4982_v44 = vsel %vm484_vm2, %v4980_v31, %v9462_v16  ;;  %v9488_v43 = vsel %vm661_vm3, %v5156_v10, %v9472_v53  ;;  %v4873_v32 = vld [vmem:[#allocation3 + $0x118] sm:$0x3]  ;;  %v3198_v31 = vld [vmem:[#allocation3 + $0x100] sm:$0x3] }
 0x3aa   : > { %5226 = vrot.lane.b32.xlu0 %v5155_v47, %s6834_s14  ;;  %3376 = vrot.lane.b32.xlu1 %v3306_v40, %s6833_s9  ;;  %v9514_v47 = vrot.slane %v9504_v29, 1  ;;  %v4988_v40 = vrot.slane %v4873_v32, 1  ;;  %v3315_v10 = vrot.slane %v3198_v31, 1 }
 0x3ab   : > { %6706 = vmatprep.mubr.msk.f32.mxu1 %vm1420_vm6, %v5324_v48 }
 0x3ac   : > { %v5199_v26 = vpop.permute.xlu0 %5198  ;;  %v3349_v63 = vpop.permute.xlu1 %3348 }
 0x3ad   : > { %v5325_v20 = vsel %vm870_vm5, %v5293_v5, %v5199_v26  ;;  %v3617_v0 = vsel %vm266_vm0, %v9119_v58, %v3349_v63 }
 0x3ae   : > { %3550 = vrot.lane.b32.xlu0 %v9386_v55, %s6834_s14  ;;  %3552 = vrot.lane.b32.xlu1 %v3482_v14, %s6834_s14  ;;  %v4989_v14 = vsel %vm484_vm2, %v9514_v47, %v4988_v40 }
 0x3af   : > { %6707 = vmatmul.mubr.msk.f32.vlgmr.msra.gmra.mxu1 %vm1420_vm6, %v5325_v20 }
 0x3b0   : > { %v3523_v28 = vpop.permute.xlu0 %3522  ;;  %v3525_v55 = vpop.permute.xlu1 %3524 }
 0x3b1   : > { %v3648_v60 = vsel %vm870_vm5, %v3616_v8, %v3523_v28  ;;  %v3649_v17 = vsel %vm870_vm5, %v3617_v0, %v3525_v55  ;;  %v5164_v28 = vrot.slane %v4873_v32, 2 }
 0x3b2   : > { %5052 = vrot.lane.b32.xlu0 %v4982_v44, %s6833_s9  ;;  %5054 = vrot.lane.b32.xlu1 %v4984_v27, %s6833_s9 }
 0x3b3   : > { %6657 = vmatprep.mubr.msk.f32.mxu0 %vm1420_vm6, %v3648_v60 }
 0x3b4   : > { %6658 = vmatmul.mubr.msk.f32.gmra.mxu0 %vm1420_vm6, %v3649_v17  ;;  %v5025_v58 = vpop.permute.xlu0 %5024  ;;  %v5027_v61 = vpop.permute.xlu1 %5026  ;;  %v5165_v17 = vsel %vm661_vm3, %v9524_v42, %v5164_v28 }
 0x3b5   : > { %v5294_v3 = vsel %vm266_vm0, %v9164_v49, %v5025_v58  ;;  %v5295_v46 = vsel %vm266_vm0, %v9162_v54, %v5027_v61  ;;  %v3316_v58 = vsel %vm484_vm2, %v9462_v16, %v3315_v10  ;;  %v9554_v61 = vld [vmem:[#allocation3 + $0x128] sm:$0xff] }
 0x3b6   : > { %5228 = vrot.lane.b32.xlu0 %v9488_v43, %s6834_s14  ;;  %3378 = vrot.lane.b32.xlu1 %v4977_v33, %s6833_s9  ;;  %v9502_v33 = vld [vmem:[#allocation3 + $0x108] sm:$0xff]  ;;  %v9563_v16 = vrot.slane %v9554_v61, 1 }
 0x3b7   : > { %v4985_v35 = vrot.slane %v9502_v33, 1  ;;  %v5161_v26 = vrot.slane %v9502_v33, 2 }
 0x3b8   : > { %v5201_v59 = vpop.permute.xlu0 %5200  ;;  %v3351_v39 = vpop.permute.xlu1 %3350 }
 0x3b9   : > { %v5326_v4 = vsel %vm870_vm5, %v5294_v3, %v5201_v59  ;;  %v3618_v57 = vsel %vm266_vm0, %v9100_v24, %v3351_v39  ;;  %v4987_v63 = vsel %vm484_vm2, %v4985_v35, %v9514_v47  ;;  %v9540_v8 = vsel %vm661_vm3, %v5161_v26, %v9524_v42  ;;  %v3201_v35 = vld [vmem:[#allocation3 + $0x118] sm:$0x3] }
 0x3ba   : > { %5230 = vrot.lane.b32.xlu0 %v5160_v38, %s6834_s14  ;;  %3380 = vrot.lane.b32.xlu1 %v3311_v45, %s6833_s9  ;;  %v4990_v59 = vrot.slane %v9552_v12, 1  ;;  %v4993_v45 = vrot.slane %v4876_v34, 1  ;;  %v3320_v26 = vrot.slane %v3201_v35, 1 }
 0x3bb   : > { %6709 = vmatprep.mubr.msk.f32.mxu1 %vm1420_vm6, %v5326_v4 }
 0x3bc   : > { %v5203_v22 = vpop.permute.xlu0 %5202  ;;  %v3353_v48 = vpop.permute.xlu1 %3352  ;;  %v4994_v32 = vsel %vm484_vm2, %v9563_v16, %v4993_v45 }
 0x3bd   : > { %v5327_v9 = vsel %vm870_vm5, %v5295_v46, %v5203_v22  ;;  %v3619_v36 = vsel %vm266_vm0, %v9098_v52, %v3353_v48  ;;  %v9576_v22 = vsel %vm484_vm2, %v4990_v59, %v9563_v16  ;;  %v5166_v48 = vrot.slane %v9552_v12, 2 }
 0x3be   : > { %3554 = vrot.lane.b32.xlu0 %v9436_v21, %s6834_s14  ;;  %3556 = vrot.lane.b32.xlu1 %v3487_v19, %s6834_s14  ;;  %v9585_v19 = vrot.slane %v9554_v61, 2 }
 0x3bf   : > { %6710 = vmatmul.mubr.msk.f32.gmra.mxu1 %vm1420_vm6, %v5327_v9 }
 0x3c0   : > { %v3527_v5 = vpop.permute.xlu0 %3526  ;;  %v3529_v21 = vpop.permute.xlu1 %3528 }
 0x3c1   : > { %v3650_v20 = vsel %vm870_vm5, %v3618_v57, %v3527_v5  ;;  %v3651_v24 = vsel %vm870_vm5, %v3619_v36, %v3529_v21  ;;  %v9595_v57 = vsel %vm661_vm3, %v5166_v48, %v9585_v19  ;;  %v5169_v5 = vrot.slane %v4876_v34, 2 }
 0x3c2   : > { %5056 = vrot.lane.b32.xlu0 %v4987_v63, %s6833_s9  ;;  %5058 = vrot.lane.b32.xlu1 %v4989_v14, %s6833_s9 }
 0x3c3   : > { %6660 = vmatprep.mubr.msk.f32.mxu0 %vm1420_vm6, %v3650_v20 }
 0x3c4   : > { %6661 = vmatmul.mubr.msk.f32.gmra.mxu0 %vm1420_vm6, %v3651_v24  ;;  %v5029_v52 = vpop.permute.xlu0 %5028  ;;  %v5031_v23 = vpop.permute.xlu1 %5030  ;;  %v5170_v24 = vsel %vm661_vm3, %v9585_v19, %v5169_v5 }
 0x3c5   : > { %v5296_v0 = vsel %vm266_vm0, %v9207_v11, %v5029_v52  ;;  %v5297_v6 = vsel %vm266_vm0, %v9205_v41, %v5031_v23  ;;  %v3321_v52 = vsel %vm484_vm2, %v9514_v47, %v3320_v26  ;;  %v3496_v23 = vrot.slane %v3201_v35, 2  ;;  %v9664_v35 = vld [vmem:[#allocation3 + $0x158] sm:$0xff] }
 0x3c6   : > { %5232 = vrot.lane.b32.xlu0 %v9540_v8, %s6834_s14  ;;  %3382 = vrot.lane.b32.xlu1 %v4982_v44, %s6833_s9  ;;  %v3491_v44 = vrot.slane %v3198_v31, 2  ;;  %v9611_v31 = vld [vmem:[#allocation3 + $0x140] sm:$0xff] }
 0x3c7   : > { %v3497_v47 = vsel %vm661_vm3, %v9524_v42, %v3496_v23  ;;  %v9631_v42 = vrot.slane %v9611_v31, 2 }
 0x3c8   : > { %v5205_v60 = vpop.permute.xlu0 %5204  ;;  %v3355_v27 = vpop.permute.xlu1 %3354  ;;  %v3492_v38 = vsel %vm661_vm3, %v9472_v53, %v3491_v44 }
 0x3c9   : > { %v5328_v55 = vsel %vm870_vm5, %v5296_v0, %v5205_v60  ;;  %v3620_v25 = vsel %vm266_vm0, %v9164_v49, %v3355_v27  ;;  %v4879_v0 = vld [vmem:[#allocation3 + $0x148] sm:$0x3] }
 0x3ca   : > { %5234 = vrot.lane.b32.xlu0 %v5165_v17, %s6834_s14  ;;  %3384 = vrot.lane.b32.xlu1 %v3316_v58, %s6833_s9  ;;  %v9621_v17 = vrot.slane %v9611_v31, 1  ;;  %v4998_v58 = vrot.slane %v4879_v0, 1 }
 0x3cb   : > { %6712 = vmatprep.mubr.msk.f32.mxu1 %vm1420_vm6, %v5328_v55 }
 0x3cc   : > { %v5207_v3 = vpop.permute.xlu0 %5206  ;;  %v3357_v39 = vpop.permute.xlu1 %3356 }
 0x3cd   : > { %v5329_v4 = vsel %vm870_vm5, %v5297_v6, %v5207_v3  ;;  %v3621_v53 = vsel %vm266_vm0, %v9162_v54, %v3357_v39  ;;  %v4999_v39 = vsel %vm484_vm2, %v9621_v17, %v4998_v58 }
 0x3ce   : > { %3558 = vrot.lane.b32.xlu0 %v9488_v43, %s6834_s14  ;;  %3560 = vrot.lane.b32.xlu1 %v3492_v38, %s6834_s14  ;;  %v3204_v38 = vld [vmem:[#allocation3 + $0x130] sm:$0x3] }
 0x3cf   : > { %6713 = vmatmul.mubr.msk.f32.gmra.mxu1 %vm1420_vm6, %v5329_v4 }
 0x3d0   : > { %v3531_v46 = vpop.permute.xlu0 %3530  ;;  %v3533_v9 = vpop.permute.xlu1 %3532 }
 0x3d1   : > { %v3652_v43 = vsel %vm870_vm5, %v3620_v25, %v3531_v46  ;;  %v3653_v49 = vsel %vm870_vm5, %v3621_v53, %v3533_v9  ;;  %v5174_v46 = vrot.slane %v4879_v0, 2 }
 0x3d2   : > { %5060 = vrot.lane.b32.xlu0 %v9576_v22, %s6833_s9  ;;  %5062 = vrot.lane.b32.xlu1 %v4994_v32, %s6833_s9  ;;  %v3325_v32 = vrot.slane %v3204_v38, 1 }
 0x3d3   : > { %6663 = vmatprep.mubr.msk.f32.mxu0 %vm1420_vm6, %v3652_v43 }
 0x3d4   : > { %6664 = vmatmul.mubr.msk.f32.gmra.mxu0 %vm1420_vm6, %v3653_v49  ;;  %v5033_v54 = vpop.permute.xlu0 %5032  ;;  %v5035_v40 = vpop.permute.xlu1 %5034  ;;  %v5175_v49 = vsel %vm661_vm3, %v9631_v42, %v5174_v46 }
 0x3d5   : > { %v5298_v36 = vsel %vm266_vm0, %v9248_v18, %v5033_v54  ;;  %v5299_v28 = vsel %vm266_vm0, %v9246_v2, %v5035_v40  ;;  %v3326_v54 = vsel %vm484_vm2, %v9563_v16, %v3325_v32  ;;  %v3501_v40 = vrot.slane %v3204_v38, 2  ;;  %v9712_v38 = vld [vmem:[#allocation3 + $0x168] sm:$0xff] }
 0x3d6   : > { %5236 = vrot.lane.b32.xlu0 %v9595_v57, %s6834_s14  ;;  %3386 = vrot.lane.b32.xlu1 %v4987_v63, %s6833_s9  ;;  %v9609_v63 = vld [vmem:[#allocation3 + $0x138] sm:$0xff] }
 0x3d7   : > { %v4995_v27 = vrot.slane %v9609_v63, 1  ;;  %v5171_v6 = vrot.slane %v9609_v63, 2  ;;  %v3502_v16 = vsel %vm661_vm3, %v9585_v19, %v3501_v40  ;;  %v9684_v19 = vrot.slane %v9664_v35, 2 }
 0x3d8   : > { %v5209_v20 = vpop.permute.xlu0 %5208  ;;  %v3359_v14 = vpop.permute.xlu1 %3358 }
 0x3d9   : > { %v5330_v21 = vsel %vm870_vm5, %v5298_v36, %v5209_v20  ;;  %v3622_v44 = vsel %vm266_vm0, %v9207_v11, %v3359_v14  ;;  %v4997_v4 = vsel %vm484_vm2, %v4995_v27, %v9621_v17  ;;  %v9647_v25 = vsel %vm661_vm3, %v5171_v6, %v9631_v42  ;;  %v4882_v36 = vld [vmem:[#allocation3 + $0x160] sm:$0x3]  ;;  %v3207_v27 = vld [vmem:[#allocation3 + $0x148] sm:$0x3] }
 0x3da   : > { %5238 = vrot.lane.b32.xlu0 %v5170_v24, %s6834_s14  ;;  %3388 = vrot.lane.b32.xlu1 %v3321_v52, %s6833_s9  ;;  %v9674_v24 = vrot.slane %v9664_v35, 1  ;;  %v5003_v52 = vrot.slane %v4882_v36, 1  ;;  %v3330_v6 = vrot.slane %v3207_v27, 1 }
 0x3db   : > { %6715 = vmatprep.mubr.msk.f32.mxu1 %vm1420_vm6, %v5330_v21 }
 0x3dc   : > { %v5211_v10 = vpop.permute.xlu0 %5210  ;;  %v3361_v55 = vpop.permute.xlu1 %3360 }
 0x3dd   : > { %v5331_v60 = vsel %vm870_vm5, %v5299_v28, %v5211_v10  ;;  %v3623_v3 = vsel %vm266_vm0, %v9205_v41, %v3361_v55 }
 0x3de   : > { %3562 = vrot.lane.b32.xlu0 %v9540_v8, %s6834_s14  ;;  %3564 = vrot.lane.b32.xlu1 %v3497_v47, %s6834_s14  ;;  %v5004_v47 = vsel %vm484_vm2, %v9674_v24, %v5003_v52 }
 0x3df   : > { %6716 = vmatmul.mubr.msk.f32.gmra.mxu1 %vm1420_vm6, %v5331_v60 }
 0x3e0   : > { %v3535_v34 = vpop.permute.xlu0 %3534  ;;  %v3537_v8 = vpop.permute.xlu1 %3536 }
 0x3e1   : > { %v3654_v59 = vsel %vm870_vm5, %v3622_v44, %v3535_v34  ;;  %v3655_v11 = vsel %vm870_vm5, %v3623_v3, %v3537_v8  ;;  %v5179_v34 = vrot.slane %v4882_v36, 2  ;;  %v5181_v36 = vrot.slane %v9712_v38, 2 }
 0x3e2   : > { %5064 = vrot.lane.b32.xlu0 %v4997_v4, %s6833_s9  ;;  %5066 = vrot.lane.b32.xlu1 %v4999_v39, %s6833_s9 }
 0x3e3   : > { %6666 = vmatprep.mubr.msk.f32.mxu0 %vm1420_vm6, %v3654_v59 }
 0x3e4   : > { %6667 = vmatmul.mubr.msk.f32.gmra.mxu0 %vm1420_vm6, %v3655_v11  ;;  %v5037_v41 = vpop.permute.xlu0 %5036  ;;  %v5039_v45 = vpop.permute.xlu1 %5038  ;;  %v5180_v11 = vsel %vm661_vm3, %v9684_v19, %v5179_v34 }
 0x3e5   : > { %v5300_v53 = vsel %vm266_vm0, %v9286_v7, %v5037_v41  ;;  %v5301_v5 = vsel %vm266_vm0, %v9288_v51, %v5039_v45  ;;  %v3331_v41 = vsel %vm484_vm2, %v9621_v17, %v3330_v6  ;;  %v9714_v45 = vld [vmem:[#allocation3 + $0x170] sm:$0xff]  ;;  %v4885_v17 = vld [vmem:[#allocation3 + $0x178] sm:$0x3] }
 0x3e6   : > { %5240 = vrot.lane.b32.xlu0 %v9647_v25, %s6834_s14  ;;  %3390 = vrot.lane.b32.xlu1 %v9576_v22, %s6833_s9  ;;  %v9662_v22 = vld [vmem:[#allocation3 + $0x150] sm:$0xff] }
 0x3e7   : > { %v5000_v14 = vrot.slane %v9662_v22, 1  ;;  %v5176_v10 = vrot.slane %v9662_v22, 2 }
 0x3e8   : > { %v5213_v43 = vpop.permute.xlu0 %5212  ;;  %v3363_v48 = vpop.permute.xlu1 %3362 }
 0x3e9   : > { %v5332_v9 = vsel %vm870_vm5, %v5300_v53, %v5213_v43  ;;  %v3624_v23 = vsel %vm266_vm0, %v9248_v18, %v3363_v48  ;;  %v5002_v55 = vsel %vm484_vm2, %v5000_v14, %v9674_v24  ;;  %v9700_v44 = vsel %vm661_vm3, %v5176_v10, %v9684_v19  ;;  %v3210_v14 = vld [vmem:[#allocation3 + $0x160] sm:$0x3] }
 0x3ea   : > { %5242 = vrot.lane.b32.xlu0 %v5175_v49, %s6834_s14  ;;  %3392 = vrot.lane.b32.xlu1 %v3326_v54, %s6833_s9  ;;  %v5005_v53 = vrot.slane %v9712_v38, 1  ;;  %v9723_v43 = vrot.slane %v9714_v45, 1  ;;  %v5008_v54 = vrot.slane %v4885_v17, 1  ;;  %v3335_v10 = vrot.slane %v3210_v14, 1 }
 0x3eb   : > { %6718 = vmatprep.mubr.msk.f32.mxu1 %vm1420_vm6, %v5332_v9 }
 0x3ec   : > { %v5215_v26 = vpop.permute.xlu0 %5214  ;;  %v3365_v21 = vpop.permute.xlu1 %3364 }
 0x3ed   : > { %v5333_v20 = vsel %vm870_vm5, %v5301_v5, %v5215_v26  ;;  %v3625_v0 = vsel %vm266_vm0, %v9246_v2, %v3365_v21  ;;  %v9736_v26 = vsel %vm484_vm2, %v5005_v53, %v9723_v43  ;;  %v5009_v21 = vsel %vm484_vm2, %v9723_v43, %v5008_v54 }
 0x3ee   : > { %3566 = vrot.lane.b32.xlu0 %v9595_v57, %s6834_s14  ;;  %3568 = vrot.lane.b32.xlu1 %v3502_v16, %s6834_s14  ;;  %v9745_v16 = vrot.slane %v9714_v45, 2 }
 0x3ef   : > { %6719 = vmatmul.mubr.msk.f32.gmra.mxu1 %vm1420_vm6, %v5333_v20 }
 0x3f0   : > { %v3539_v28 = vpop.permute.xlu0 %3538  ;;  %v3541_v57 = vpop.permute.xlu1 %3540 }
 0x3f1   : > { %v3656_v60 = vsel %vm870_vm5, %v3624_v23, %v3539_v28  ;;  %v3657_v18 = vsel %vm870_vm5, %v3625_v0, %v3541_v57  ;;  %v9755_v23 = vsel %vm661_vm3, %v5181_v36, %v9745_v16  ;;  %v5184_v28 = vrot.slane %v4885_v17, 2 }
 0x3f2   : > { %5068 = vrot.lane.b32.xlu0 %v5002_v55, %s6833_s9  ;;  %5070 = vrot.lane.b32.xlu1 %v5004_v47, %s6833_s9 }
 0x3f3   : > { %6669 = vmatprep.mubr.msk.f32.mxu0 %vm1420_vm6, %v3656_v60 }
 0x3f4   : > { %6670 = vmatmul.mubr.msk.f32.gmra.mxu0 %vm1420_vm6, %v3657_v18  ;;  %v5041_v2 = vpop.permute.xlu0 %5040  ;;  %v5043_v58 = vpop.permute.xlu1 %5042  ;;  %v5185_v18 = vsel %vm661_vm3, %v9745_v16, %v5184_v28  ;;  %v4891_v28 = vld [vmem:[#allocation3 + $0x1a8] sm:$0x3] }
 0x3f5   : > { %v5302_v3 = vsel %vm266_vm0, %v9326_v30, %v5041_v2  ;;  %v5303_v46 = vsel %vm266_vm0, %v9328_v15, %v5043_v58  ;;  %v3336_v2 = vsel %vm484_vm2, %v9674_v24, %v3335_v10  ;;  %v3511_v58 = vrot.slane %v3210_v14, 2 }
 0x3f6   : > { %5244 = vrot.lane.b32.xlu0 %v9700_v44, %s6834_s14  ;;  %3394 = vrot.lane.b32.xlu1 %v4997_v4, %s6833_s9  ;;  %v3506_v4 = vrot.slane %v3207_v27, 2  ;;  %v9771_v27 = vld [vmem:[#allocation3 + $0x188] sm:$0xff] }
 0x3f7   : > { %v3512_v24 = vsel %vm661_vm3, %v9684_v19, %v3511_v58  ;;  %v5187_v53 = vrot.slane %v9771_v27, 2  ;;  %v5018_v58 = vrot.slane %v4891_v28, 1 }
 0x3f8   : > { %v5217_v59 = vpop.permute.xlu0 %5216  ;;  %v3367_v39 = vpop.permute.xlu1 %3366  ;;  %v3507_v49 = vsel %vm661_vm3, %v9631_v42, %v3506_v4 }
 0x3f9   : > { %v5334_v8 = vsel %vm870_vm5, %v5302_v3, %v5217_v59  ;;  %v3626_v40 = vsel %vm266_vm0, %v9286_v7, %v3367_v39  ;;  %v4888_v3 = vld [vmem:[#allocation3 + $0x190] sm:$0x3] }
 0x3fa   : > { %5246 = vrot.lane.b32.xlu0 %v5180_v11, %s6834_s14  ;;  %3396 = vrot.lane.b32.xlu1 %v3331_v41, %s6833_s9  ;;  %v5011_v11 = vrot.slane %v9771_v27, 1  ;;  %v9781_v41 = vpop.f32.mrf.mxu1  ;;  %v5013_v4 = vrot.slane %v4888_v3, 1 }
 0x3fb   : > { %6721 = vmatprep.mubr.msk.f32.mxu1 %vm1420_vm6, %v5334_v8 }
 0x3fc   : > { %v5219_v32 = vpop.permute.xlu0 %5218  ;;  %v3369_v48 = vpop.permute.xlu1 %3368 }
 0x3fd   : > { %v5335_v9 = vsel %vm870_vm5, %v5303_v46, %v5219_v32  ;;  %v3627_v42 = vsel %vm266_vm0, %v9288_v51, %v3369_v48  ;;  %v9796_v54 = vpop.f32.mrf.mxu1 }
 0x3fe   : > { %3570 = vrot.lane.b32.xlu0 %v9647_v25, %s6834_s14  ;;  %3572 = vrot.lane.b32.xlu1 %v3507_v49, %s6834_s14  ;;  %v5014_v49 = vsel %vm484_vm2, %v5011_v11, %v5013_v4 }
 0x3ff   : > { %6722 = vmatmul.mubr.msk.f32.gmra.mxu1 %vm1420_vm6, %v5335_v9 }
 0x400   : > { %v3543_v5 = vpop.permute.xlu0 %3542  ;;  %v3545_v20 = vpop.permute.xlu1 %3544 }
 0x401   : > { %v3658_v25 = vsel %vm870_vm5, %v3626_v40, %v3543_v5  ;;  %v3659_v7 = vsel %vm870_vm5, %v3627_v42, %v3545_v20  ;;  %v3213_v5 = vld [vmem:[#allocation3 + $0x178] sm:$0x3] }
 0x402   : > { %5072 = vrot.lane.b32.xlu0 %v9736_v26, %s6833_s9  ;;  %5074 = vrot.lane.b32.xlu1 %v5009_v21, %s6833_s9  ;;  %v3340_v20 = vrot.slane %v3213_v5, 1  ;;  %v9809_v21 = vld [vmem:[#allocation3 + $0x198] sm:$0xff] }
 0x403   : > { %6672 = vmatprep.mubr.msk.f32.mxu0 %vm1420_vm6, %v3658_v25  ;;  %v5189_v25 = vrot.slane %v4888_v3, 2 }
 0x404   : > { %6673 = vmatmul.mubr.msk.f32.gmra.mxu0 %vm1420_vm6, %v3659_v7  ;;  %v5045_v51 = vpop.permute.xlu0 %5044  ;;  %v5047_v52 = vpop.permute.xlu1 %5046  ;;  %v9811_v7 = vld [vmem:[#allocation3 + $0x1a0] sm:$0xff] }
 0x405   : > { %v5304_v0 = vsel %vm266_vm0, %v9362_v50, %v5045_v51  ;;  %v5305_v34 = vsel %vm266_vm0, %v9364_v13, %v5047_v52  ;;  %v5192_v4 = vrot.slane %v9811_v7, 2 }
 0x406   : > { %5248 = vrot.lane.b32.xlu0 %v9755_v23, %s6834_s14  ;;  %3398 = vrot.lane.b32.xlu1 %v5002_v55, %s6833_s9  ;;  %v9769_v55 = vld [vmem:[#allocation3 + $0x180] sm:$0xff] }
 0x407   : > { %v5010_v39 = vrot.slane %v9769_v55, 1  ;;  %v5186_v19 = vrot.slane %v9769_v55, 2 }
 0x408   : > { %v5221_v60 = vpop.permute.xlu0 %5220  ;;  %v3371_v47 = vpop.permute.xlu1 %3370 }
 0x409   : > { %v5336_v57 = vsel %vm870_vm5, %v5304_v0, %v5221_v60  ;;  %v3628_v46 = vsel %vm266_vm0, %v9326_v30, %v3371_v47  ;;  %v9802_v30 = vpop.f32.mrf.mxu1  ;;  %v5188_v42 = vsel %vm661_vm3, %v5186_v19, %v5187_v53  ;;  %v5190_v60 = vsel %vm661_vm3, %v5187_v53, %v5189_v25 }
 0x40a   : > { %5250 = vrot.lane.b32.xlu0 %v5185_v18, %s6834_s14  ;;  %3400 = vrot.lane.b32.xlu1 %v3336_v2, %s6833_s9  ;;  %v5015_v47 = vrot.slane %v9809_v21, 1  ;;  %v5016_v18 = vrot.slane %v9811_v7, 1  ;;  %v3516_v2 = vrot.slane %v3213_v5, 2 }
 0x40b   : > { %6724 = vmatprep.mubr.msk.f32.mxu1 %vm1420_vm6, %v5336_v57  ;;  %v9813_v51 = vpop.f32.mrf.mxu1 }
 0x40c   : > { %v5223_v6 = vpop.permute.xlu0 %5222  ;;  %v3373_v8 = vpop.permute.xlu1 %3372 }
 0x40d   : > { %v5337_v59 = vsel %vm870_vm5, %v5305_v34, %v5223_v6  ;;  %v3629_v17 = vsel %vm266_vm0, %v9328_v15, %v3373_v8  ;;  %v9821_v57 = vpop.f32.mrf.mxu1 }
 0x40e   : > { %3574 = vrot.lane.b32.xlu0 %v9700_v44, %s6834_s14  ;;  %3576 = vrot.lane.b32.xlu1 %v3512_v24, %s6834_s14  ;;  %v5012_v44 = vsel %vm484_vm2, %v5010_v39, %v5011_v11  ;;  %v5017_v24 = vsel %vm484_vm2, %v5015_v47, %v5016_v18  ;;  %v5019_v39 = vsel %vm484_vm2, %v5016_v18, %v5018_v58  ;;  %v5191_v11 = vrot.slane %v9809_v21, 2 }
 0x40f   : > { %6725 = vmatmul.mubr.msk.f32.gmra.mxu1 %vm1420_vm6, %v5337_v59  ;;  %v3517_v59 = vsel %vm661_vm3, %v9745_v16, %v3516_v2  ;;  %v9833_v8 = vpop.f32.mrf.mxu1 }
 0x410   : > { %v3547_v32 = vpop.permute.xlu0 %3546  ;;  %v3549_v48 = vpop.permute.xlu1 %3548 }
 0x411   : > { %v3660_v9 = vsel %vm870_vm5, %v3628_v46, %v3547_v32  ;;  %v3661_v40 = vsel %vm870_vm5, %v3629_v17, %v3549_v48  ;;  %v5194_v46 = vrot.slane %v4891_v28, 2  ;;  %v9843_v32 = vpop.f32.mrf.mxu1  ;;  %v5193_v48 = vsel %vm661_vm3, %v5191_v11, %v5192_v4 }
 0x412   : > { %5076 = vrot.lane.b32.xlu0 %v5012_v44, %s6833_s9  ;;  %5078 = vrot.lane.b32.xlu1 %v5014_v49, %s6833_s9 }
 0x413   : > { %6675 = vmatprep.mubr.msk.f32.mxu0 %vm1420_vm6, %v3660_v9  ;;  %v5195_v44 = vsel %vm661_vm3, %v5192_v4, %v5194_v46 }
 0x414   : > { %6676 = vmatmul.mubr.msk.f32.gmra.mxu0 %vm1420_vm6, %v3661_v40  ;;  %v5049_v15 = vpop.permute.xlu0 %5048  ;;  %v5051_v36 = vpop.permute.xlu1 %5050 }
 0x415   : > { %v5306_v14 = vsel %vm266_vm0, %v9399_v37, %v5049_v15  ;;  %v5307_v34 = vsel %vm266_vm0, %v9401_v62, %v5051_v36 }
 0x416   : > { %5252 = vrot.lane.b32.xlu0 %v5188_v42, %s6834_s14  ;;  %3402 = vrot.lane.b32.xlu1 %v9736_v26, %s6833_s9  ;;  %v3341_v26 = vsel %vm484_vm2, %v9723_v43, %v3340_v20 }
 0x418   : > { %v5225_v52 = vpop.permute.xlu0 %5224  ;;  %v3375_v0 = vpop.permute.xlu1 %3374 }
 0x419   : > { %v5338_v10 = vsel %vm870_vm5, %v5306_v14, %v5225_v52  ;;  %v3630_v16 = vsel %vm266_vm0, %v9362_v50, %v3375_v0  ;;  %v9856_v50 = vpop.f32.mrf.mxu1 }
 0x41a   : > { %5254 = vrot.lane.b32.xlu0 %v5190_v60, %s6834_s14  ;;  %3404 = vrot.lane.b32.xlu1 %v3341_v26, %s6833_s9 }
 0x41b   : > { %6727 = vmatprep.mubr.msk.f32.mxu1 %vm1420_vm6, %v5338_v10  ;;  %v9859_v40 = vpop.f32.mrf.mxu1 }
 0x41c   : > { %v5227_v6 = vpop.permute.xlu0 %5226  ;;  %v3377_v3 = vpop.permute.xlu1 %3376 }
 0x41d   : > { %v5339_v43 = vsel %vm870_vm5, %v5307_v34, %v5227_v6  ;;  %v9866_v25 = vpop.f32.mrf.mxu1 }
 0x41e   : > { %3578 = vrot.lane.b32.xlu0 %v9755_v23, %s6834_s14  ;;  %3580 = vrot.lane.b32.xlu1 %v3517_v59, %s6834_s14  ;;  %v3631_v23 = vsel %vm266_vm0, %v9364_v13, %v3377_v3 }
 0x41f   : > { %6728 = vmatmul.mubr.msk.f32.gmra.mxu1 %vm1420_vm6, %v5339_v43  ;;  %v9869_v20 = vpop.f32.mrf.mxu1 }
 0x420   : > { %v3551_v19 = vpop.permute.xlu0 %3550  ;;  %v3553_v17 = vpop.permute.xlu1 %3552 }
 0x421   : > { %v3662_v53 = vsel %vm870_vm5, %v3630_v16, %v3551_v19  ;;  %v3663_v9 = vsel %vm870_vm5, %v3631_v23, %v3553_v17  ;;  %v9875_v0 = vpop.f32.mrf.mxu1 }
 0x422   : > { %5080 = vrot.lane.b32.xlu0 %v5017_v24, %s6833_s9  ;;  %5082 = vrot.lane.b32.xlu1 %v5019_v39, %s6833_s9  ;;  %s6129_s9 = sld [smem:[#allocation4 + $0x1]] }
 0x423   : > { %6678 = vmatprep.mubr.msk.f32.mxu0 %vm1420_vm6, %v3662_v53  ;;  %v9882_v58 = vpop.f32.mrf.mxu1 }
 0x424   : > { %6679 = vmatmul.mubr.msk.f32.gmra.mxu0 %vm1420_vm6, %v3663_v9  ;;  %v5053_v13 = vpop.permute.xlu0 %5052  ;;  %v5055_v49 = vpop.permute.xlu1 %5054 }
 0x425   : > { %v5308_v15 = vsel %vm266_vm0, %v9450_v1, %v5053_v13  ;;  %v5309_v14 = vsel %vm266_vm0, %v9452_v56, %v5055_v49  ;;  %v9887_v3 = vpop.f32.mrf.mxu1 }
 0x426   : > { %5256 = vrot.lane.b32.xlu0 %v5193_v48, %s6834_s14  ;;  %5258 = vrot.lane.b32.xlu1 %v5195_v44, %s6834_s14 }
 0x428   : > { %v5229_v5 = vpop.permute.xlu0 %5228  ;;  %v3379_v42 = vpop.permute.xlu1 %3378 }
 0x429   : > { %v5340_v36 = vsel %vm870_vm5, %v5308_v15, %v5229_v5  ;;  %v3632_v60 = vsel %vm266_vm0, %v9399_v37, %v3379_v42  ;;  %v9889_v37 = vpop.f32.mrf.mxu1 }
 0x42a   : > { %6730 = vmatprep.mubr.msk.f32.mxu1 %vm1420_vm6, %v5340_v36 }
 0x42b   : > { %v9895_v11 = vpop.f32.mrf.mxu1 }
 0x42c   : > { %v5231_v52 = vpop.permute.xlu0 %5230  ;;  %v3381_v10 = vpop.permute.xlu1 %3380 }
 0x42d   : > { %v5341_v28 = vsel %vm870_vm5, %v5309_v14, %v5231_v52  ;;  %v3633_v47 = vsel %vm266_vm0, %v9401_v62, %v3381_v10  ;;  %v9900_v23 = vpop.f32.mrf.mxu1 }
 0x42e   : > { %6731 = vmatmul.mubr.msk.f32.gmra.mxu1 %vm1420_vm6, %v5341_v28 }
 0x42f   : > { %v9908_v13 = vpop.f32.mrf.mxu1 }
 0x430   : > { %v3555_v26 = vpop.permute.xlu0 %3554  ;;  %v3557_v2 = vpop.permute.xlu1 %3556 }
 0x431   : > { %v3664_v18 = vsel %vm870_vm5, %v3632_v60, %v3555_v26  ;;  %v3665_v34 = vsel %vm870_vm5, %v3633_v47, %v3557_v2  ;;  %v9913_v15 = vpop.f32.mrf.mxu1 }
 0x432   : > { %6681 = vmatprep.mubr.msk.f32.mxu0 %vm1420_vm6, %v3664_v18 }
 0x433   : > { %6682 = vmatmul.mubr.msk.f32.gmra.mxu0 %vm1420_vm6, %v3665_v34 }
 0x434   : > { %v5057_v6 = vpop.permute.xlu0 %5056  ;;  %v5059_v43 = vpop.permute.xlu1 %5058 }
 0x435   : > { %v5310_v62 = vsel %vm266_vm0, %v9502_v33, %v5057_v6  ;;  %v5311_v4 = vsel %vm266_vm0, %v9504_v29, %v5059_v43 }
 0x438   : > { %v5233_v59 = vpop.permute.xlu0 %5232  ;;  %v3383_v39 = vpop.permute.xlu1 %3382 }
 0x439   : > { %v5342_v24 = vsel %vm870_vm5, %v5310_v62, %v5233_v59  ;;  %v3634_v53 = vsel %vm266_vm0, %v9450_v1, %v3383_v39  ;;  %v9915_v1 = vpop.f32.mrf.mxu1 }
 0x43a   : > { %6733 = vmatprep.mubr.msk.f32.mxu1 %vm1420_vm6, %v5342_v24 }
 0x43b   : > { %v9920_v28 = vpop.f32.mrf.mxu1 }
 0x43c   : > { %v5235_v46 = vpop.permute.xlu0 %5234  ;;  %v3385_v19 = vpop.permute.xlu1 %3384 }
 0x43d   : > { %v5343_v16 = vsel %vm870_vm5, %v5311_v4, %v5235_v46  ;;  %v3635_v9 = vsel %vm266_vm0, %v9452_v56, %v3385_v19  ;;  %v9926_v18 = vpop.f32.mrf.mxu1 }
 0x43e   : > { %6734 = vmatmul.mubr.msk.f32.gmra.mxu1 %vm1420_vm6, %v5343_v16 }
 0x43f   : > { %v9929_v2 = vpop.f32.mrf.mxu1 }
 0x440   : > { %v3559_v17 = vpop.permute.xlu0 %3558  ;;  %v3561_v44 = vpop.permute.xlu1 %3560 }
 0x441   : > { %v3666_v48 = vsel %vm870_vm5, %v3634_v53, %v3559_v17  ;;  %v3667_v49 = vsel %vm870_vm5, %v3635_v9, %v3561_v44  ;;  %v9939_v39 = vpop.f32.mrf.mxu1 }
 0x442   : > { %6684 = vmatprep.mubr.msk.f32.mxu0 %vm1420_vm6, %v3666_v48 }
 0x443   : > { %6685 = vmatmul.mubr.msk.f32.gmra.mxu0 %vm1420_vm6, %v3667_v49  ;;  %v9941_v16 = vpop.f32.mrf.mxu1 }
 0x444   : > { %v5061_v5 = vpop.permute.xlu0 %5060  ;;  %v5063_v36 = vpop.permute.xlu1 %5062 }
 0x445   : > { %v5312_v56 = vsel %vm266_vm0, %v9552_v12, %v5061_v5  ;;  %v5313_v10 = vsel %vm266_vm0, %v9554_v61, %v5063_v36  ;;  %v9946_v17 = vpop.f32.mrf.mxu1 }
 0x447   : > { %v9949_v9 = vpop.f32.mrf.mxu1 }
 0x448   : > { %v5237_v42 = vpop.permute.xlu0 %5236  ;;  %v3387_v52 = vpop.permute.xlu1 %3386 }
 0x449   : > { %v5344_v14 = vsel %vm870_vm5, %v5312_v56, %v5237_v42  ;;  %v3636_v34 = vsel %vm266_vm0, %v9502_v33, %v3387_v52  ;;  %v9955_v36 = vpop.f32.mrf.mxu1 }
 0x44a   : > { %6736 = vmatprep.mubr.msk.f32.mxu1 %vm1420_vm6, %v5344_v14 }
 0x44c   : > { %v5239_v60 = vpop.permute.xlu0 %5238  ;;  %v3389_v47 = vpop.permute.xlu1 %3388 }
 0x44d   : > { %v5345_v26 = vsel %vm870_vm5, %v5313_v10, %v5239_v60  ;;  %v3637_v43 = vsel %vm266_vm0, %v9504_v29, %v3389_v47  ;;  %v9962_v60 = vpop.f32.mrf.mxu1 }
 0x44e   : > { %6737 = vmatmul.mubr.msk.f32.gmra.mxu1 %vm1420_vm6, %v5345_v26 }
 0x450   : > { %v3563_v6 = vpop.permute.xlu0 %3562  ;;  %v3565_v59 = vpop.permute.xlu1 %3564 }
 0x451   : > { %v3668_v62 = vsel %vm870_vm5, %v3636_v34, %v3563_v6  ;;  %v3669_v24 = vsel %vm870_vm5, %v3637_v43, %v3565_v59  ;;  %v9967_v6 = vpop.f32.mrf.mxu1 }
 0x452   : > { %6687 = vmatprep.mubr.msk.f32.mxu0 %vm1420_vm6, %v3668_v62 }
 0x453   : > { %6688 = vmatmul.mubr.msk.f32.gmra.mxu0 %vm1420_vm6, %v3669_v24 }
 0x454   : > { %v5065_v4 = vpop.permute.xlu0 %5064  ;;  %v5067_v46 = vpop.permute.xlu1 %5066 }
 0x455   : > { %v5314_v33 = vsel %vm266_vm0, %v9609_v63, %v5065_v4  ;;  %v5315_v48 = vsel %vm266_vm0, %v9611_v31, %v5067_v46 }
 0x458   : > { %v5241_v19 = vpop.permute.xlu0 %5240  ;;  %v3391_v53 = vpop.permute.xlu1 %3390 }
 0x459   : > { %v5346_v29 = vsel %vm870_vm5, %v5314_v33, %v5241_v19  ;;  %v3638_v56 = vsel %vm266_vm0, %v9552_v12, %v3391_v53 }
 0x45a   : > { %6739 = vmatprep.mubr.msk.f32.mxu1 %vm1420_vm6, %v5346_v29 }
 0x45c   : > { %v5243_v44 = vpop.permute.xlu0 %5242  ;;  %v3393_v5 = vpop.permute.xlu1 %3392 }
 0x45d   : > { %v5347_v49 = vsel %vm870_vm5, %v5315_v48, %v5243_v44  ;;  %v3639_v14 = vsel %vm266_vm0, %v9554_v61, %v3393_v5 }
 0x45e   : > { %6740 = vmatmul.mubr.msk.f32.gmra.mxu1 %vm1420_vm6, %v5347_v49  ;;  %v9985_v49 = vld [vmem:[%s10242_s4] ss:$0 sm:$0xff] }
 0x45f   : > { %v9969_v12 = vpop.f32.mrf.mxu1 }
 0x460   : > { %v3567_v42 = vpop.permute.xlu0 %3566  ;;  %v3569_v10 = vpop.permute.xlu1 %3568 }
 0x461   : > { %v3670_v52 = vsel %vm870_vm5, %v3638_v56, %v3567_v42  ;;  %v3671_v26 = vsel %vm870_vm5, %v3639_v14, %v3569_v10  ;;  %v9975_v4 = vpop.f32.mrf.mxu1 }
 0x462   : > { %6690 = vmatprep.mubr.msk.f32.mxu0 %vm1420_vm6, %v3670_v52 }
 0x463   : > { %6691 = vmatmul.mubr.msk.f32.gmra.mxu0 %vm1420_vm6, %v3671_v26 }
 0x464   : > { %v5069_v47 = vpop.permute.xlu0 %5068  ;;  %v5071_v34 = vpop.permute.xlu1 %5070 }
 0x465   : > { %v5316_v61 = vsel %vm266_vm0, %v9662_v22, %v5069_v47  ;;  %v6656_v62 = vpop.f32.mrf.mxu0  ;;  %v5317_v46 = vsel %vm266_vm0, %v9664_v35, %v5071_v34 }
 0x466   : > { %v4690_v48 = vadd.f32 %v6656_v62, %v9781_v41  ;;  %v9992_v41 = vstv %s6129_s9 }
 0x467   : > { %v4684_v19 = vpop.f32.mrf.mxu0 }
 0x468   : > { %v5245_v43 = vpop.permute.xlu0 %5244  ;;  %v3395_v24 = vpop.permute.xlu1 %3394  ;;  %v4685_v5 = vadd.f32 %v4684_v19, %v9796_v54 }
 0x469   : > { %v5348_v59 = vsel %vm870_vm5, %v5316_v61, %v5245_v43  ;;  %v3640_v56 = vsel %vm266_vm0, %v9609_v63, %v3395_v24 }
 0x46a   : > { %6742 = vmatprep.mubr.msk.f32.mxu1 %vm1420_vm6, %v5348_v59 }
 0x46c   : > { %v5247_v33 = vpop.permute.xlu0 %5246  ;;  %v3397_v53 = vpop.permute.xlu1 %3396 }
 0x46d   : > { %v5349_v29 = vsel %vm870_vm5, %v5317_v46, %v5247_v33  ;;  %v3641_v52 = vsel %vm266_vm0, %v9611_v31, %v3397_v53  ;;  %v5852_v31 = vld [vmem:[%s7126_s8 + $0x8] sm:$0xff]  ;;  %v5851_v33 = vld [vmem:[%s7126_s8] sm:$0xff] }
 0x46e   : > { %6743 = vmatmul.mubr.msk.f32.gmra.mxu1 %vm1420_vm6, %v5349_v29 }
 0x46f   : > { %v6708_v44 = vpop.f32.mrf.mxu1 }
 0x470   : > { %v5684_v42 = vadd.f32 %v6708_v44, %v4690_v48  ;;  %v3571_v14 = vpop.permute.xlu0 %3570  ;;  %v3573_v47 = vpop.permute.xlu1 %3572 }
 0x471   : > { %v3672_v10 = vsel %vm870_vm5, %v3640_v56, %v3571_v14  ;;  %v5524_v26 = vpop.f32.mrf.mxu1  ;;  %v3673_v61 = vsel %vm870_vm5, %v3641_v52, %v3573_v47 }
 0x472   : > { %v5723_v34 = vadd.f32 %v9985_v49, %v5684_v42  ;;  %v5683_v54 = vadd.f32 %v5524_v26, %v4685_v5  ;;  %6693 = vmatprep.mubr.msk.f32.mxu0 %vm1420_vm6, %v3672_v10 }
 0x473   : > { %6694 = vmatmul.mubr.msk.f32.gmra.mxu0 %vm1420_vm6, %v3673_v61 }
 0x474   : > { %vm5755_vm2 = vcmp.gt.f32.partialorder %v5723_v34, 0.0  ;;  %v5788_v63 = vmul.f32 %v9992_v41, %v5723_v34  ;;  %v5722_v43 = vadd.f32 %v9985_v49, %v5683_v54  ;;  %v5073_v62 = vpop.permute.xlu0 %5072  ;;  %v5075_v59 = vpop.permute.xlu1 %5074 }
 0x475   : > { %v5318_v53 = vsel %vm266_vm0, %v9712_v38, %v5073_v62  ;;  %v6659_v5 = vpop.f32.mrf.mxu0  ;;  %v5319_v14 = vsel %vm266_vm0, %v9714_v45, %v5075_v59 }
 0x476   : > { %v5820_v24 = vsel %vm5755_vm2, %v5723_v34, %v5788_v63  ;;  %vm5754_vm3 = vcmp.gt.f32.partialorder %v5722_v43, 0.0  ;;  %v5787_v46 = vmul.f32 %v9992_v41, %v5722_v43  ;;  %v4700_v34 = vadd.f32 %v6659_v5, %v9802_v30  ;;  %v5853_v5 = vld [vmem:[%s7126_s8 + $0x10] sm:$0xff] }
 0x477   : > { %v5884_v19 = vadd.f32 %v5852_v31, %v5820_v24  ;;  %v4694_v10 = vpop.f32.mrf.mxu0 }
 0x478   : > { %v5819_v29 = vsel %vm5754_vm3, %v5722_v43, %v5787_v46  ;;  %v5249_v48 = vpop.permute.xlu0 %5248  ;;  %v3399_v42 = vpop.permute.xlu1 %3398  ;;  %v4695_v61 = vadd.f32 %v4694_v10, %v9813_v51  ;;  %v5854_v51 = vld [vmem:[%s7126_s8 + $0x18] sm:$0xff] }
 0x479   : > { %5916 = vst.msk [vmem:[%s10007_s27 + $0x8] sm:$0xff] %vm266_vm0, %v5884_v19  ;;  %v5883_v44 = vadd.f32 %v5851_v33, %v5819_v29  ;;  %v5350_v56 = vsel %vm870_vm5, %v5318_v53, %v5249_v48  ;;  %v3642_v63 = vsel %vm266_vm0, %v9662_v22, %v3399_v42 }
 0x47a   : > { %6745 = vmatprep.mubr.msk.f32.mxu1 %vm1420_vm6, %v5350_v56 }
 0x47b   : > { %5915 = vst.msk [vmem:[%s10007_s27] sm:$0xff] %vm266_vm0, %v5883_v44 }
 0x47c   : > { %v5251_v52 = vpop.permute.xlu0 %5250  ;;  %v3401_v47 = vpop.permute.xlu1 %3400 }
 0x47d   : > { %v5351_v26 = vsel %vm870_vm5, %v5319_v14, %v5251_v52  ;;  %v3643_v62 = vsel %vm266_vm0, %v9664_v35, %v3401_v47 }
 0x47e   : > { %6746 = vmatmul.mubr.msk.f32.gmra.mxu1 %vm1420_vm6, %v5351_v26 }
 0x47f   : > { %v6711_v54 = vpop.f32.mrf.mxu1 }
 0x480   : > { %v5686_v31 = vadd.f32 %v6711_v54, %v4700_v34  ;;  %v3575_v43 = vpop.permute.xlu0 %3574  ;;  %v3577_v46 = vpop.permute.xlu1 %3576 }
 0x481   : > { %v3674_v59 = vsel %vm870_vm5, %v3642_v63, %v3575_v43  ;;  %v5534_v24 = vpop.f32.mrf.mxu1  ;;  %v3675_v19 = vsel %vm870_vm5, %v3643_v62, %v3577_v46 }
 0x482   : > { %v5725_v30 = vadd.f32 %v9985_v49, %v5686_v31  ;;  %v5685_v33 = vadd.f32 %v5534_v24, %v4695_v61  ;;  %6696 = vmatprep.mubr.msk.f32.mxu0 %vm1420_vm6, %v3674_v59 }
 0x483   : > { %6697 = vmatmul.mubr.msk.f32.gmra.mxu0 %vm1420_vm6, %v3675_v19 }
 0x484   : > { %vm5757_vm4 = vcmp.gt.f32.partialorder %v5725_v30, 0.0  ;;  %v5790_v22 = vmul.f32 %v9992_v41, %v5725_v30  ;;  %v5724_v35 = vadd.f32 %v9985_v49, %v5685_v33  ;;  %v5077_v29 = vpop.permute.xlu0 %5076  ;;  %v5079_v53 = vpop.permute.xlu1 %5078 }
 0x485   : > { %v5320_v14 = vsel %vm266_vm0, %v9769_v55, %v5077_v29  ;;  %v6662_v26 = vpop.f32.mrf.mxu0  ;;  %v5321_v54 = vsel %vm266_vm0, %v9771_v27, %v5079_v53 }
 0x486   : > { %v5822_v48 = vsel %vm5757_vm4, %v5725_v30, %v5790_v22  ;;  %vm5756_vm9 = vcmp.gt.f32.partialorder %v5724_v35, 0.0  ;;  %v5789_v44 = vmul.f32 %v9992_v41, %v5724_v35  ;;  %v4710_v43 = vadd.f32 %v6662_v26, %v9821_v57 }
 0x487   : > { %v5886_v56 = vadd.f32 %v5854_v51, %v5822_v48  ;;  %v4704_v63 = vpop.f32.mrf.mxu0 }
 0x488   : > { %v5821_v42 = vsel %vm5756_vm9, %v5724_v35, %v5789_v44  ;;  %v5253_v52 = vpop.permute.xlu0 %5252  ;;  %v3403_v34 = vpop.permute.xlu1 %3402  ;;  %v4705_v59 = vadd.f32 %v4704_v63, %v9833_v8  ;;  %v5856_v8 = vld [vmem:[%s7126_s8 + $0x28] sm:$0xff] }
 0x489   : > { %5918 = vst.msk [vmem:[%s10007_s27 + $0x18] sm:$0xff] %vm266_vm0, %v5886_v56  ;;  %v5885_v10 = vadd.f32 %v5853_v5, %v5821_v42  ;;  %v5352_v47 = vsel %vm870_vm5, %v5320_v14, %v5253_v52  ;;  %v3644_v24 = vsel %vm266_vm0, %v9712_v38, %v3403_v34  ;;  %v5855_v5 = vld [vmem:[%s7126_s8 + $0x20] sm:$0xff] }
 0x48a   : > { %6748 = vmatprep.mubr.msk.f32.mxu1 %vm1420_vm6, %v5352_v47 }
 0x48b   : > { %5917 = vst.msk [vmem:[%s10007_s27 + $0x10] sm:$0xff] %vm266_vm0, %v5885_v10 }
 0x48c   : > { %v5255_v61 = vpop.permute.xlu0 %5254  ;;  %v3405_v55 = vpop.permute.xlu1 %3404 }
 0x48d   : > { %v5353_v31 = vsel %vm870_vm5, %v5321_v54, %v5255_v61  ;;  %v3645_v27 = vsel %vm266_vm0, %v9714_v45, %v3405_v55 }
 0x48e   : > { %6749 = vmatmul.mubr.msk.f32.gmra.mxu1 %vm1420_vm6, %v5353_v31 }
 0x48f   : > { %v6714_v62 = vpop.f32.mrf.mxu1 }
 0x490   : > { %v5688_v46 = vadd.f32 %v6714_v62, %v4710_v43  ;;  %v3579_v30 = vpop.permute.xlu0 %3578  ;;  %v3581_v22 = vpop.permute.xlu1 %3580 }
 0x491   : > { %v3676_v33 = vsel %vm870_vm5, %v3644_v24, %v3579_v30  ;;  %v5544_v19 = vpop.f32.mrf.mxu1  ;;  %v3677_v35 = vsel %vm870_vm5, %v3645_v27, %v3581_v22 }
 0x492   : > { %v5727_v57 = vadd.f32 %v9985_v49, %v5688_v46  ;;  %v5687_v51 = vadd.f32 %v5544_v19, %v4705_v59  ;;  %6699 = vmatprep.mubr.msk.f32.mxu0 %vm1420_vm6, %v3676_v33  ;;  %v5858_v46 = vld [vmem:[%s7126_s8 + $0x38] sm:$0xff]  ;;  %v5857_v33 = vld [vmem:[%s7126_s8 + $0x30] sm:$0xff] }
 0x493   : > { %6700 = vmatmul.mubr.msk.f32.gmra.mxu0 %vm1420_vm6, %v3677_v35 }
 0x494   : > { %vm5759_vm10 = vcmp.gt.f32.partialorder %v5727_v57, 0.0  ;;  %v5792_v38 = vmul.f32 %v9992_v41, %v5727_v57  ;;  %v5726_v45 = vadd.f32 %v9985_v49, %v5687_v51  ;;  %v5081_v29 = vpop.permute.xlu0 %5080  ;;  %v5083_v53 = vpop.permute.xlu1 %5082 }
 0x495   : > { %v5322_v14 = vsel %vm266_vm0, %v9809_v21, %v5081_v29  ;;  %v6665_v26 = vpop.f32.mrf.mxu0  ;;  %v5323_v47 = vsel %vm266_vm0, %v9811_v7, %v5083_v53 }
 0x496   : > { %v5824_v48 = vsel %vm5759_vm10, %v5727_v57, %v5792_v38  ;;  %vm5758_vm11 = vcmp.gt.f32.partialorder %v5726_v45, 0.0  ;;  %v5791_v44 = vmul.f32 %v9992_v41, %v5726_v45  ;;  %v4720_v63 = vadd.f32 %v6665_v26, %v9843_v32 }
 0x497   : > { %v5888_v56 = vadd.f32 %v5856_v8, %v5824_v48  ;;  %v4714_v21 = vpop.f32.mrf.mxu0 }
 0x498   : > { %v5823_v42 = vsel %vm5758_vm11, %v5726_v45, %v5791_v44  ;;  %v5257_v52 = vpop.permute.xlu0 %5256  ;;  %v5259_v54 = vpop.permute.xlu1 %5258  ;;  %v4715_v7 = vadd.f32 %v4714_v21, %v9856_v50 }
 0x499   : > { %5920 = vst.msk [vmem:[%s10007_s27 + $0x28] sm:$0xff] %vm266_vm0, %v5888_v56  ;;  %v5887_v10 = vadd.f32 %v5855_v5, %v5823_v42  ;;  %v5354_v34 = vsel %vm870_vm5, %v5322_v14, %v5257_v52  ;;  %v5355_v61 = vsel %vm870_vm5, %v5323_v47, %v5259_v54  ;;  %v5860_v5 = vld [vmem:[%s7126_s8 + $0x48] sm:$0xff]  ;;  %v5859_v14 = vld [vmem:[%s7126_s8 + $0x40] sm:$0xff] }
 0x49a   : > { %6751 = vmatprep.mubr.msk.f32.mxu1 %vm1420_vm6, %v5354_v34 }
 0x49b   : > { %5919 = vst.msk [vmem:[%s10007_s27 + $0x20] sm:$0xff] %vm266_vm0, %v5887_v10  ;;  %6752 = vmatmul.mubr.msk.f32.gmra.mxu1 %vm1420_vm6, %v5355_v61 }
 0x49f   : > { %v6717_v31 = vpop.f32.mrf.mxu1 }
 0x4a0   : > { %v5690_v55 = vadd.f32 %v6717_v31, %v4720_v63 }
 0x4a1   : > { %v5554_v43 = vpop.f32.mrf.mxu1 }
 0x4a2   : > { %v5729_v62 = vadd.f32 %v9985_v49, %v5690_v55  ;;  %v5689_v59 = vadd.f32 %v5554_v43, %v4715_v7  ;;  %v5862_v43 = vld [vmem:[%s7126_s8 + $0x58] sm:$0xff] }
 0x4a4   : > { %vm5761_vm5 = vcmp.gt.f32.partialorder %v5729_v62, 0.0  ;;  %v5794_v24 = vmul.f32 %v9992_v41, %v5729_v62  ;;  %v5728_v30 = vadd.f32 %v9985_v49, %v5689_v59  ;;  %v6668_v57 = vpop.f32.mrf.mxu0 }
 0x4a5   : > { %v4730_v35 = vadd.f32 %v6668_v57, %v9859_v40 }
 0x4a6   : > { %v5826_v27 = vsel %vm5761_vm5, %v5729_v62, %v5794_v24  ;;  %vm5760_vm6 = vcmp.gt.f32.partialorder %v5728_v30, 0.0  ;;  %v5793_v32 = vmul.f32 %v9992_v41, %v5728_v30  ;;  %v4724_v51 = vpop.f32.mrf.mxu0  ;;  %v5861_v24 = vld [vmem:[%s7126_s8 + $0x50] sm:$0xff] }
 0x4a7   : > { %v5890_v19 = vadd.f32 %v5858_v46, %v5826_v27  ;;  %v4725_v8 = vadd.f32 %v4724_v51, %v9866_v25 }
 0x4a8   : > { %v5825_v50 = vsel %vm5760_vm6, %v5728_v30, %v5793_v32 }
 0x4a9   : > { %5922 = vst.msk [vmem:[%s10007_s27 + $0x38] sm:$0xff] %vm266_vm0, %v5890_v19  ;;  %v5889_v22 = vadd.f32 %v5857_v33, %v5825_v50 }
 0x4ab   : > { %5921 = vst.msk [vmem:[%s10007_s27 + $0x30] sm:$0xff] %vm266_vm0, %v5889_v22 }
 0x4af   : > { %v6720_v38 = vpop.f32.mrf.mxu1 }
 0x4b0   : > { %v5692_v45 = vadd.f32 %v6720_v38, %v4730_v35 }
 0x4b1   : > { %v5564_v29 = vpop.f32.mrf.mxu1 }
 0x4b2   : > { %v5731_v53 = vadd.f32 %v9985_v49, %v5692_v45  ;;  %v5691_v48 = vadd.f32 %v5564_v29, %v4725_v8  ;;  %v5864_v8 = vld [vmem:[%s7126_s8 + $0x68] sm:$0xff] }
 0x4b4   : > { %vm5763_vm12 = vcmp.gt.f32.partialorder %v5731_v53, 0.0  ;;  %v5796_v44 = vmul.f32 %v9992_v41, %v5731_v53  ;;  %v5730_v56 = vadd.f32 %v9985_v49, %v5691_v48  ;;  %v6671_v26 = vpop.f32.mrf.mxu0 }
 0x4b5   : > { %v4740_v34 = vadd.f32 %v6671_v26, %v9869_v20 }
 0x4b6   : > { %v5828_v42 = vsel %vm5763_vm12, %v5731_v53, %v5796_v44  ;;  %vm5762_vm13 = vcmp.gt.f32.partialorder %v5730_v56, 0.0  ;;  %v5795_v40 = vmul.f32 %v9992_v41, %v5730_v56  ;;  %v4734_v47 = vpop.f32.mrf.mxu0  ;;  %v5863_v53 = vld [vmem:[%s7126_s8 + $0x60] sm:$0xff] }
 0x4b7   : > { %v5892_v52 = vadd.f32 %v5860_v5, %v5828_v42  ;;  %v4735_v61 = vadd.f32 %v4734_v47, %v9875_v0 }
 0x4b8   : > { %v5827_v25 = vsel %vm5762_vm13, %v5730_v56, %v5795_v40 }
 0x4b9   : > { %5924 = vst.msk [vmem:[%s10007_s27 + $0x48] sm:$0xff] %vm266_vm0, %v5892_v52  ;;  %v5891_v10 = vadd.f32 %v5859_v14, %v5827_v25 }
 0x4bb   : > { %5923 = vst.msk [vmem:[%s10007_s27 + $0x40] sm:$0xff] %vm266_vm0, %v5891_v10 }
 0x4bf   : > { %v6723_v54 = vpop.f32.mrf.mxu1 }
 0x4c0   : > { %v5694_v21 = vadd.f32 %v6723_v54, %v4740_v34  ;;  %v5866_v34 = vld [vmem:[%s7126_s8 + $0x78] sm:$0xff] }
 0x4c1   : > { %v5574_v63 = vpop.f32.mrf.mxu1 }
 0x4c2   : > { %v5733_v31 = vadd.f32 %v9985_v49, %v5694_v21  ;;  %v5693_v7 = vadd.f32 %v5574_v63, %v4735_v61  ;;  %v5865_v21 = vld [vmem:[%s7126_s8 + $0x70] sm:$0xff] }
 0x4c4   : > { %vm5765_vm14 = vcmp.gt.f32.partialorder %v5733_v31, 0.0  ;;  %v5798_v55 = vmul.f32 %v9992_v41, %v5733_v31  ;;  %v5732_v62 = vadd.f32 %v9985_v49, %v5693_v7  ;;  %v6674_v27 = vpop.f32.mrf.mxu0 }
 0x4c5   : > { %v4750_v33 = vadd.f32 %v6674_v27, %v9882_v58  ;;  %v5868_v27 = vld [vmem:[%s7126_s8 + $0x88] sm:$0xff] }
 0x4c6   : > { %v5830_v59 = vsel %vm5765_vm14, %v5733_v31, %v5798_v55  ;;  %vm5764_vm15 = vcmp.gt.f32.partialorder %v5732_v62, 0.0  ;;  %v5797_v20 = vmul.f32 %v9992_v41, %v5732_v62  ;;  %v4744_v32 = vpop.f32.mrf.mxu0 }
 0x4c7   : > { %v5894_v46 = vadd.f32 %v5862_v43, %v5830_v59  ;;  %v4745_v50 = vadd.f32 %v4744_v32, %v9887_v3 }
 0x4c8   : > { %v5829_v0 = vsel %vm5764_vm15, %v5732_v62, %v5797_v20 }
 0x4c9   : > { %5926 = vst.msk [vmem:[%s10007_s27 + $0x58] sm:$0xff] %vm266_vm0, %v5894_v46  ;;  %v5893_v30 = vadd.f32 %v5861_v24, %v5829_v0 }
 0x4cb   : > { %5925 = vst.msk [vmem:[%s10007_s27 + $0x50] sm:$0xff] %vm266_vm0, %v5893_v30 }
 0x4cf   : > { %v6726_v19 = vpop.f32.mrf.mxu1 }
 0x4d0   : > { %v5696_v22 = vadd.f32 %v6726_v19, %v4750_v33  ;;  %v5867_v19 = vld [vmem:[%s7126_s8 + $0x80] sm:$0xff] }
 0x4d1   : > { %v5584_v57 = vpop.f32.mrf.mxu1 }
 0x4d2   : > { %v5735_v51 = vadd.f32 %v9985_v49, %v5696_v22  ;;  %v5695_v35 = vadd.f32 %v5584_v57, %v4745_v50 }
 0x4d4   : > { %vm5767_vm1 = vcmp.gt.f32.partialorder %v5735_v51, 0.0  ;;  %v5800_v38 = vmul.f32 %v9992_v41, %v5735_v51  ;;  %v5734_v45 = vadd.f32 %v9985_v49, %v5695_v35  ;;  %v6677_v5 = vpop.f32.mrf.mxu0 }
 0x4d5   : > { %v4760_v42 = vadd.f32 %v6677_v5, %v9889_v37 }
 0x4d6   : > { %v5832_v29 = vsel %vm5767_vm1, %v5735_v51, %v5800_v38  ;;  %vm5766_vm7 = vcmp.gt.f32.partialorder %v5734_v45, 0.0  ;;  %v5799_v58 = vmul.f32 %v9992_v41, %v5734_v45  ;;  %v4754_v56 = vpop.f32.mrf.mxu0 }
 0x4d7   : > { %v5896_v48 = vadd.f32 %v5864_v8, %v5832_v29  ;;  %v4755_v14 = vadd.f32 %v4754_v56, %v9895_v11  ;;  %v5869_v56 = vld [vmem:[%s7126_s8 + $0x90] sm:$0xff] }
 0x4d8   : > { %v5831_v3 = vsel %vm5766_vm7, %v5734_v45, %v5799_v58 }
 0x4d9   : > { %5928 = vst.msk [vmem:[%s10007_s27 + $0x68] sm:$0xff] %vm266_vm0, %v5896_v48  ;;  %v5895_v44 = vadd.f32 %v5863_v53, %v5831_v3  ;;  %v5870_v3 = vld [vmem:[%s7126_s8 + $0x98] sm:$0xff] }
 0x4db   : > { %5927 = vst.msk [vmem:[%s10007_s27 + $0x60] sm:$0xff] %vm266_vm0, %v5895_v44 }
 0x4df   : > { %v6729_v40 = vpop.f32.mrf.mxu1 }
 0x4e0   : > { %v5698_v52 = vadd.f32 %v6729_v40, %v4760_v42 }
 0x4e1   : > { %v5594_v25 = vpop.f32.mrf.mxu1 }
 0x4e2   : > { %v5737_v10 = vadd.f32 %v9985_v49, %v5698_v52  ;;  %v5697_v26 = vadd.f32 %v5594_v25, %v4755_v14 }
 0x4e4   : > { %vm5769_vm8 = vcmp.gt.f32.partialorder %v5737_v10, 0.0  ;;  %v5802_v47 = vmul.f32 %v9992_v41, %v5737_v10  ;;  %v5736_v54 = vadd.f32 %v9985_v49, %v5697_v26  ;;  %v6680_v31 = vpop.f32.mrf.mxu0 }
 0x4e5   : > { %v4770_v43 = vadd.f32 %v6680_v31, %v9900_v23  ;;  %v5871_v31 = vld [vmem:[%s7126_s8 + $0xa0] sm:$0xff] }
 0x4e6   : > { %v5834_v61 = vsel %vm5769_vm8, %v5737_v10, %v5802_v47  ;;  %vm5768_vm2 = vcmp.gt.f32.partialorder %v5736_v54, 0.0  ;;  %v5801_v37 = vmul.f32 %v9992_v41, %v5736_v54  ;;  %v4764_v55 = vpop.f32.mrf.mxu0 }
 0x4e7   : > { %v5898_v63 = vadd.f32 %v5866_v34, %v5834_v61  ;;  %v4765_v59 = vadd.f32 %v4764_v55, %v9908_v13 }
 0x4e8   : > { %v5833_v11 = vsel %vm5768_vm2, %v5736_v54, %v5801_v37 }
 0x4e9   : > { %5930 = vst.msk [vmem:[%s10007_s27 + $0x78] sm:$0xff] %vm266_vm0, %v5898_v63  ;;  %v5897_v7 = vadd.f32 %v5865_v21, %v5833_v11  ;;  %v5872_v21 = vld [vmem:[%s7126_s8 + $0xa8] sm:$0xff] }
 0x4eb   : > { %5929 = vst.msk [vmem:[%s10007_s27 + $0x70] sm:$0xff] %vm266_vm0, %v5897_v7 }
 0x4ee   : > { %v6732_v62 = vpop.f32.mrf.mxu1 }
 0x4ef   : > { %v5700_v20 = vadd.f32 %v6732_v62, %v4770_v43 }
 0x4f0   : > { %v5604_v24 = vpop.f32.mrf.mxu1 }
 0x4f1   : > { %v5739_v46 = vadd.f32 %v9985_v49, %v5700_v20  ;;  %v5699_v0 = vadd.f32 %v5604_v24, %v4765_v59 }
 0x4f3   : > { %vm5771_vm3 = vcmp.gt.f32.partialorder %v5739_v46, 0.0  ;;  %v5804_v30 = vmul.f32 %v9992_v41, %v5739_v46  ;;  %v5738_v32 = vadd.f32 %v9985_v49, %v5699_v0  ;;  %v6683_v57 = vpop.f32.mrf.mxu0 }
 0x4f4   : > { %v4780_v35 = vadd.f32 %v6683_v57, %v9913_v15 }
 0x4f5   : > { %v5836_v33 = vsel %vm5771_vm3, %v5739_v46, %v5804_v30  ;;  %vm5770_vm4 = vcmp.gt.f32.partialorder %v5738_v32, 0.0  ;;  %v5803_v23 = vmul.f32 %v9992_v41, %v5738_v32  ;;  %v4774_v51 = vpop.f32.mrf.mxu0 }
 0x4f6   : > { %v5900_v50 = vadd.f32 %v5868_v27, %v5836_v33  ;;  %v4775_v8 = vadd.f32 %v4774_v51, %v9915_v1  ;;  %v5874_v33 = vld [vmem:[%s7126_s8 + $0xb8] sm:$0xff] }
 0x4f7   : > { %v5835_v13 = vsel %vm5770_vm4, %v5738_v32, %v5803_v23 }
 0x4f8   : > { %5932 = vst.msk [vmem:[%s10007_s27 + $0x88] sm:$0xff] %vm266_vm0, %v5900_v50  ;;  %v5899_v22 = vadd.f32 %v5867_v19, %v5835_v13  ;;  %v5873_v50 = vld [vmem:[%s7126_s8 + $0xb0] sm:$0xff] }
 0x4fa   : > { %5931 = vst.msk [vmem:[%s10007_s27 + $0x80] sm:$0xff] %vm266_vm0, %v5899_v22 }
 0x4fe   : > { %v6735_v38 = vpop.f32.mrf.mxu1 }
 0x4ff   : > { %v5702_v45 = vadd.f32 %v6735_v38, %v4780_v35 }
 0x500   : > { %v5614_v29 = vpop.f32.mrf.mxu1 }
 0x501   : > { %v5741_v58 = vadd.f32 %v9985_v49, %v5702_v45  ;;  %v5701_v53 = vadd.f32 %v5614_v29, %v4775_v8 }
 0x503   : > { %vm5773_vm9 = vcmp.gt.f32.partialorder %v5741_v58, 0.0  ;;  %v5806_v48 = vmul.f32 %v9992_v41, %v5741_v58  ;;  %v5740_v44 = vadd.f32 %v9985_v49, %v5701_v53  ;;  %v6686_v14 = vpop.f32.mrf.mxu0 }
 0x504   : > { %v4790_v25 = vadd.f32 %v6686_v14, %v9920_v28 }
 0x505   : > { %v5838_v5 = vsel %vm5773_vm9, %v5741_v58, %v5806_v48  ;;  %vm5772_vm10 = vcmp.gt.f32.partialorder %v5740_v44, 0.0  ;;  %v5805_v15 = vmul.f32 %v9992_v41, %v5740_v44  ;;  %v4784_v52 = vpop.f32.mrf.mxu0 }
 0x506   : > { %v5902_v42 = vadd.f32 %v5870_v3, %v5838_v5  ;;  %v4785_v26 = vadd.f32 %v4784_v52, %v9926_v18  ;;  %v5876_v3 = vld [vmem:[%s7126_s8 + $0xc8] sm:$0xff] }
 0x507   : > { %v5837_v1 = vsel %vm5772_vm10, %v5740_v44, %v5805_v15  ;;  %v5875_v15 = vld [vmem:[%s7126_s8 + $0xc0] sm:$0xff] }
 0x508   : > { %5934 = vst.msk [vmem:[%s10007_s27 + $0x98] sm:$0xff] %vm266_vm0, %v5902_v42  ;;  %v5901_v40 = vadd.f32 %v5869_v56, %v5837_v1 }
 0x50a   : > { %5933 = vst.msk [vmem:[%s10007_s27 + $0x90] sm:$0xff] %vm266_vm0, %v5901_v40 }
 0x50e   : > { %v6738_v10 = vpop.f32.mrf.mxu1 }
 0x50f   : > { %v5704_v47 = vadd.f32 %v6738_v10, %v4790_v25 }
 0x510   : > { %v5624_v34 = vpop.f32.mrf.mxu1 }
 0x511   : > { %v5743_v54 = vadd.f32 %v9985_v49, %v5704_v47  ;;  %v5703_v61 = vadd.f32 %v5624_v34, %v4785_v26 }
 0x513   : > { %vm5775_vm11 = vcmp.gt.f32.partialorder %v5743_v54, 0.0  ;;  %v5808_v37 = vmul.f32 %v9992_v41, %v5743_v54  ;;  %v5742_v63 = vadd.f32 %v9985_v49, %v5703_v61  ;;  %v6689_v43 = vpop.f32.mrf.mxu0  ;;  %v5878_v61 = vld [vmem:[%s7126_s8 + $0xd8] sm:$0xff] }
 0x514   : > { %v4800_v59 = vadd.f32 %v6689_v43, %v9929_v2 }
 0x515   : > { %v5840_v11 = vsel %vm5775_vm11, %v5743_v54, %v5808_v37  ;;  %vm5774_vm5 = vcmp.gt.f32.partialorder %v5742_v63, 0.0  ;;  %v5807_v28 = vmul.f32 %v9992_v41, %v5742_v63  ;;  %v4794_v62 = vpop.f32.mrf.mxu0 }
 0x516   : > { %v5904_v7 = vadd.f32 %v5872_v21, %v5840_v11  ;;  %v4795_v24 = vadd.f32 %v4794_v62, %v9939_v39 }
 0x517   : > { %v5839_v18 = vsel %vm5774_vm5, %v5742_v63, %v5807_v28  ;;  %v5877_v63 = vld [vmem:[%s7126_s8 + $0xd0] sm:$0xff] }
 0x518   : > { %5936 = vst.msk [vmem:[%s10007_s27 + $0xa8] sm:$0xff] %vm266_vm0, %v5904_v7  ;;  %v5903_v55 = vadd.f32 %v5871_v31, %v5839_v18 }
 0x51a   : > { %5935 = vst.msk [vmem:[%s10007_s27 + $0xa0] sm:$0xff] %vm266_vm0, %v5903_v55 }
 0x51e   : > { %v6741_v20 = vpop.f32.mrf.mxu1 }
 0x51f   : > { %v5706_v46 = vadd.f32 %v6741_v20, %v4800_v59 }
 0x520   : > { %v5634_v0 = vpop.f32.mrf.mxu1 }
 0x521   : > { %v5745_v30 = vadd.f32 %v9985_v49, %v5706_v46  ;;  %v5705_v27 = vadd.f32 %v5634_v0, %v4795_v24  ;;  %v5880_v0 = vld [vmem:[%s7126_s8 + $0xe8] sm:$0xff] }
 0x523   : > { %vm5777_vm6 = vcmp.gt.f32.partialorder %v5745_v30, 0.0  ;;  %v5810_v32 = vmul.f32 %v9992_v41, %v5745_v30  ;;  %v5744_v23 = vadd.f32 %v9985_v49, %v5705_v27  ;;  %v6692_v57 = vpop.f32.mrf.mxu0 }
 0x524   : > { %v4810_v35 = vadd.f32 %v6692_v57, %v9941_v16 }
 0x525   : > { %v5842_v19 = vsel %vm5777_vm6, %v5745_v30, %v5810_v32  ;;  %vm5776_vm12 = vcmp.gt.f32.partialorder %v5744_v23, 0.0  ;;  %v5809_v2 = vmul.f32 %v9992_v41, %v5744_v23  ;;  %v4804_v51 = vpop.f32.mrf.mxu0  ;;  %v5879_v32 = vld [vmem:[%s7126_s8 + $0xe0] sm:$0xff] }
 0x526   : > { %v5906_v13 = vadd.f32 %v5874_v33, %v5842_v19  ;;  %v4805_v8 = vadd.f32 %v4804_v51, %v9946_v17 }
 0x527   : > { %v5841_v39 = vsel %vm5776_vm12, %v5744_v23, %v5809_v2 }
 0x528   : > { %5938 = vst.msk [vmem:[%s10007_s27 + $0xb8] sm:$0xff] %vm266_vm0, %v5906_v13  ;;  %v5905_v22 = vadd.f32 %v5873_v50, %v5841_v39 }
 0x52a   : > { %5937 = vst.msk [vmem:[%s10007_s27 + $0xb0] sm:$0xff] %vm266_vm0, %v5905_v22 }
 0x52e   : > { %v6744_v38 = vpop.f32.mrf.mxu1 }
 0x52f   : > { %v5708_v45 = vadd.f32 %v6744_v38, %v4810_v35 }
 0x530   : > { %v5644_v29 = vpop.f32.mrf.mxu1 }
 0x531   : > { %v5747_v58 = vadd.f32 %v9985_v49, %v5708_v45  ;;  %v5707_v53 = vadd.f32 %v5644_v29, %v4805_v8  ;;  %v5882_v8 = vld [vmem:[%s7126_s8 + $0xf8] sm:$0xff] }
 0x533   : > { %vm5779_vm13 = vcmp.gt.f32.partialorder %v5747_v58, 0.0  ;;  %v5812_v48 = vmul.f32 %v9992_v41, %v5747_v58  ;;  %v5746_v44 = vadd.f32 %v9985_v49, %v5707_v53  ;;  %v6695_v1 = vpop.f32.mrf.mxu0 }
 0x534   : > { %v4820_v14 = vadd.f32 %v6695_v1, %v9949_v9 }
 0x535   : > { %v5844_v5 = vsel %vm5779_vm13, %v5747_v58, %v5812_v48  ;;  %vm5778_vm14 = vcmp.gt.f32.partialorder %v5746_v44, 0.0  ;;  %v5811_v16 = vmul.f32 %v9992_v41, %v5746_v44  ;;  %v4814_v40 = vpop.f32.mrf.mxu0  ;;  %v5881_v58 = vld [vmem:[%s7126_s8 + $0xf0] sm:$0xff] }
 0x536   : > { %v5908_v56 = vadd.f32 %v5876_v3, %v5844_v5  ;;  %v4815_v25 = vadd.f32 %v4814_v40, %v9955_v36 }
 0x537   : > { %v5843_v17 = vsel %vm5778_vm14, %v5746_v44, %v5811_v16 }
 0x538   : > { %5940 = vst.msk [vmem:[%s10007_s27 + $0xc8] sm:$0xff] %vm266_vm0, %v5908_v56  ;;  %v5907_v42 = vadd.f32 %v5875_v15, %v5843_v17 }
 0x53a   : > { %5939 = vst.msk [vmem:[%s10007_s27 + $0xc0] sm:$0xff] %vm266_vm0, %v5907_v42 }
 0x53e   : > { %v6747_v52 = vpop.f32.mrf.mxu1 }
 0x53f   : > { %v5710_v10 = vadd.f32 %v6747_v52, %v4820_v14 }
 0x540   : > { %v5654_v26 = vpop.f32.mrf.mxu1 }
 0x541   : > { %v5749_v47 = vadd.f32 %v9985_v49, %v5710_v10  ;;  %v5709_v34 = vadd.f32 %v5654_v26, %v4815_v25 }
 0x543   : > { %vm5781_vm15 = vcmp.gt.f32.partialorder %v5749_v47, 0.0  ;;  %v5814_v54 = vmul.f32 %v9992_v41, %v5749_v47  ;;  %v5748_v37 = vadd.f32 %v9985_v49, %v5709_v34  ;;  %v6698_v31 = vpop.f32.mrf.mxu0 }
 0x544   : > { %v4830_v18 = vadd.f32 %v6698_v31, %v9962_v60 }
 0x545   : > { %v5846_v21 = vsel %vm5781_vm15, %v5749_v47, %v5814_v54  ;;  %vm5780_vm1 = vcmp.gt.f32.partialorder %v5748_v37, 0.0  ;;  %v5813_v9 = vmul.f32 %v9992_v41, %v5748_v37  ;;  %v4824_v7 = vpop.f32.mrf.mxu0 }
 0x546   : > { %v5910_v11 = vadd.f32 %v5878_v61, %v5846_v21  ;;  %v4825_v43 = vadd.f32 %v4824_v7, %v9967_v6 }
 0x547   : > { %v5845_v36 = vsel %vm5780_vm1, %v5748_v37, %v5813_v9 }
 0x548   : > { %5942 = vst.msk [vmem:[%s10007_s27 + $0xd8] sm:$0xff] %vm266_vm0, %v5910_v11  ;;  %v5909_v28 = vadd.f32 %v5877_v63, %v5845_v36 }
 0x54a   : > { %5941 = vst.msk [vmem:[%s10007_s27 + $0xd0] sm:$0xff] %vm266_vm0, %v5909_v28 }
 0x54e   : > { %v6750_v55 = vpop.f32.mrf.mxu1 }
 0x54f   : > { %v5712_v62 = vadd.f32 %v6750_v55, %v4830_v18 }
 0x550   : > { %v5664_v59 = vpop.f32.mrf.mxu1 }
 0x551   : > { %v5751_v20 = vadd.f32 %v9985_v49, %v5712_v62  ;;  %v5711_v24 = vadd.f32 %v5664_v59, %v4825_v43 }
 0x553   : > { %vm5783_vm7 = vcmp.gt.f32.partialorder %v5751_v20, 0.0  ;;  %v5816_v46 = vmul.f32 %v9992_v41, %v5751_v20  ;;  %v5750_v30 = vadd.f32 %v9985_v49, %v5711_v24  ;;  %v6701_v33 = vpop.f32.mrf.mxu0 }
 0x554   : > { %v4840_v50 = vadd.f32 %v6701_v33, %v9969_v12 }
 0x555   : > { %v5848_v27 = vsel %vm5783_vm7, %v5751_v20, %v5816_v46  ;;  %vm5782_vm8 = vcmp.gt.f32.partialorder %v5750_v30, 0.0  ;;  %v5815_v60 = vmul.f32 %v9992_v41, %v5750_v30  ;;  %v4834_v2 = vpop.f32.mrf.mxu0 }
 0x556   : > { %v5912_v6 = vadd.f32 %v5880_v0, %v5848_v27  ;;  %v4835_v39 = vadd.f32 %v4834_v2, %v9975_v4 }
 0x557   : > { %v5847_v23 = vsel %vm5782_vm8, %v5750_v30, %v5815_v60 }
 0x558   : > { %5944 = vst.msk [vmem:[%s10007_s27 + $0xe8] sm:$0xff] %vm266_vm0, %v5912_v6  ;;  %v5911_v19 = vadd.f32 %v5879_v32, %v5847_v23 }
 0x55a   : > { %5943 = vst.msk [vmem:[%s10007_s27 + $0xe0] sm:$0xff] %vm266_vm0, %v5911_v19 }
 0x55b   : > { %v6753_v13 = vpop.f32.mrf.mxu1 }
 0x55c   : > { %v5714_v22 = vadd.f32 %v6753_v13, %v4840_v50 }
 0x55d   : > { %v5674_v57 = vpop.f32.mrf.mxu1 }
 0x55e   : > { %v5753_v51 = vadd.f32 %v9985_v49, %v5714_v22  ;;  %v5713_v35 = vadd.f32 %v5674_v57, %v4835_v39 }
 0x560   : > { %vm5785_vm2 = vcmp.gt.f32.partialorder %v5753_v51, 0.0  ;;  %v5818_v38 = vmul.f32 %v9992_v41, %v5753_v51  ;;  %v5752_v45 = vadd.f32 %v9985_v49, %v5713_v35 }
 0x562   : > { %v5850_v29 = vsel %vm5785_vm2, %v5753_v51, %v5818_v38  ;;  %vm5784_vm3 = vcmp.gt.f32.partialorder %v5752_v45, 0.0  ;;  %v5817_v12 = vmul.f32 %v9992_v41, %v5752_v45 }
 0x563   : > { %v5914_v53 = vadd.f32 %v5882_v8, %v5850_v29 }
 0x564   : > { %v5849_v48 = vsel %vm5784_vm3, %v5752_v45, %v5817_v12 }
 0x565   : > { %5946 = vst.msk [vmem:[%s10007_s27 + $0xf8] sm:$0xff] %vm266_vm0, %v5914_v53  ;;  %v5913_v4 = vadd.f32 %v5881_v58, %v5849_v48 }
 0x567   : > { %5945 = vst.msk [vmem:[%s10007_s27 + $0xf0] sm:$0xff] %vm266_vm0, %v5913_v4 }
 0x568 PF: > { %s17_s21 = sadd.s32 1, %s6829_s21  }
 0x569   : > { %p14_p1 = scmp.ge.s32.totalorder %s17_s21, 4  }
 0x56b   :  { %16 = sbr.rel (!%p14_p1) target bundleno = 1 (0x1), region = 87 }
 0x570   :  { %5968 = vsyncpa [#allocation5], 1 }
 0x571   :  { %5970 = vsyncpa [#allocation5 + $0x1], 1 }

</bundles_post_ra>
